<compile_context>
chip_gen: v5e
topology: v5e:2x2
jax: 0.10.0
libtpu: 0.0.40
codegen_flags: <defaults>
</compile_context>

<pallas_src>
import functools

import jax
import jax.numpy as jnp
import numpy as np
from jax.experimental import pallas as pl
from jax.experimental.pallas import tpu as pltpu


# ---------------------------------------------------------------------------
# Pallas kernel: one (batch, spatial-tile) block, TN rows at a time.
# ---------------------------------------------------------------------------
def _hgt_attention_kernel(
    x_ref,        # (TN, L*C)          bf16   per-CAV features, layout [i, c]
    addmask_ref,  # (TN, L*M*L)        f32    additive mask, layout [i, m, j] (0 / -inf)
    wqkv_ref,     # (L*C, 3*L*M*D)     bf16   block-diag fused QKV weights
    bqkv_ref,     # (1, 3*L*M*D)       f32
    watt_ref,     # (L*M*D, L*M*L*D)   bf16   block-diag relation_att (scale folded in)
    wmsg_ref,     # (M*L*D, L*M*L*D)   bf16   block-diag relation_msg
    wout_ref,     # (L*M*L*D, L*C)     bf16   sum_j + output projection, fused
    bout_ref,     # (1, L*C)           f32
    rred_ref,     # (L*M*L*D, L*M*L)   bf16   constant: sum over D chunks
    sgrp_ref,     # (L*M*L, L*M*L)     f32    constant: per-(i,m) group sum, broadcast back
    eexp_ref,     # (L*M*L, L*M*L*D)   bf16   constant: broadcast probs over D
    out_ref,      # (TN, L*C)          f32
    *,
    num_cavs: int,
):
    L = num_cavs
    f32 = jnp.float32
    bf16 = jnp.bfloat16

    # ---- fused per-type QKV projection: one block-diagonal matmul -------------------------
    x = x_ref[...]
    qkv = jnp.dot(x, wqkv_ref[...], preferred_element_type=f32) + bqkv_ref[...]
    LI = watt_ref.shape[0]                       # L * heads * dim_head
    q = qkv[:, :LI].astype(bf16)                 # layout [i, m, d]
    k = qkv[:, LI:2 * LI]                        # layout [m, j, d]  (f32)
    v = qkv[:, 2 * LI:3 * LI].astype(bf16)       # layout [m, j, d]

    # ---- heterogeneous attention logits ----------------------------------------------------
    # t[n, (i,m,j,q)] = sum_p q[n,(i,m,p)] * scale * relation_att[rel(i,j), m, p, q]
    t = jnp.dot(q, watt_ref[...], preferred_element_type=f32)            # (TN, L*M*L*D)
    k_tiled = jnp.concatenate([k] * L, axis=-1)                          # broadcast K over i
    prod = (t * k_tiled).astype(bf16)
    logits = jnp.dot(prod, rred_ref[...], preferred_element_type=f32)    # (TN, L*M*L)
    logits = logits + addmask_ref[...]                                   # hoisted mask

    # ---- softmax over j within every (i, m) group ------------------------------------------
    # Row-global max shift: constant within each group -> softmax unchanged; masked entries
    # are -inf so they contribute exactly 0.
    row_max = jnp.max(logits, axis=-1, keepdims=True)
    e = jnp.exp(logits - row_max)
    denom = jnp.dot(e, sgrp_ref[...], preferred_element_type=f32)        # per-group sums
    p = e * pl.reciprocal(denom, approx=True)                            # (TN, L*M*L)

    # ---- message passing + fused sum_j / output projection ---------------------------------
    # vmsg[n, (i,m,j,c)] = sum_p v[n,(m,j,p)] * relation_msg[rel(i,j), m, p, c]
    vmsg = jnp.dot(v, wmsg_ref[...], preferred_element_type=f32)         # (TN, L*M*L*D)
    p_bc = jnp.dot(p.astype(bf16), eexp_ref[...], preferred_element_type=f32)
    attended = (p_bc * vmsg).astype(bf16)
    out_ref[...] = (jnp.dot(attended, wout_ref[...], preferred_element_type=f32)
                    + bout_ref[...])                                     # single 128-lane store


# ---------------------------------------------------------------------------
# Wrapper: builds per-batch block-diagonal weights and launches pallas_call.
# ---------------------------------------------------------------------------
def hgt_cav_attention(x, mask, prior_encoding, params, *,
                      heads, dim_head, num_types, tile_n=128):
    B, L, H, W, C = x.shape
    M, D = heads, dim_head
    inner = M * D
    N = H * W
    tile_n = min(tile_n, N)
    assert N % tile_n == 0 and tile_n % 8 == 0
    scale = float(D) ** -0.5
    hi = jax.lax.Precision.HIGHEST
    bf16 = jnp.bfloat16

    types = prior_encoding[:, :, 0, 0, 2].astype(jnp.int32)              # (B, L)
    eyeL = jnp.eye(L, dtype=jnp.float32)
    eyeM = jnp.eye(M, dtype=jnp.float32)
    onesL = jnp.ones((L,), jnp.float32)

    # ---- fused block-diagonal QKV weight / bias --------------------------------------------
    # column layout: Q -> [i, m, d] (CAV-major), K/V -> [m, j, d] (head-major)
    Wq = params["q_w"][types]                                            # (B, L, C, inner)
    Wk = params["k_w"][types].reshape(B, L, C, M, D)
    Wv = params["v_w"][types].reshape(B, L, C, M, D)
    Wq_big = jnp.einsum("blco,lk->blcko", Wq, eyeL,
                        precision=hi).reshape(B, L * C, L * inner)
    Wk_big = jnp.einsum("bjcmd,jk->bjcmkd", Wk, eyeL,
                        precision=hi).reshape(B, L * C, M * L * D)
    Wv_big = jnp.einsum("bjcmd,jk->bjcmkd", Wv, eyeL,
                        precision=hi).reshape(B, L * C, M * L * D)
    W_qkv = jnp.concatenate([Wq_big, Wk_big, Wv_big], axis=-1).astype(bf16)

    bq = params["q_b"][types].reshape(B, L * inner)
    bk = params["k_b"][types].reshape(B, L, M, D).transpose(0, 2, 1, 3).reshape(B, M * L * D)
    bv = params["v_b"][types].reshape(B, L, M, D).transpose(0, 2, 1, 3).reshape(B, M * L * D)
    b_qkv = jnp.concatenate([bq, bk, bv], axis=-1)[:, None, :].astype(jnp.float32)

    # ---- per-(i,j) relation matrices, block-diagonalized ------------------------------------
    rel = types[:, :, None] * num_types + types[:, None, :]              # (B, L, L)
    watt = params["relation_att"][rel]                                   # (B, L, L, M, D, D)
    wmsg = params["relation_msg"][rel]
    W_att_big = (jnp.einsum("bijmpq,ik,mn->bimpknjq", watt, eyeL, eyeM, precision=hi)
                 .reshape(B, L * inner, L * M * L * D) * scale).astype(bf16)
    W_msg_big = (jnp.einsum("bijmpc,mn,jk->bmjpinkc", wmsg, eyeM, eyeL, precision=hi)
                 .reshape(B, M * L * D, L * M * L * D)).astype(bf16)

    # ---- output projection fused with the sum over j ----------------------------------------
    Wa = params["a_w"][types].reshape(B, L, M, D, C)
    W_out_big = (jnp.einsum("bimdc,ik,j->bimjdkc", Wa, eyeL, onesL, precision=hi)
                 .reshape(B, L * M * L * D, L * C)).astype(bf16)
    b_out = params["a_b"][types].reshape(B, 1, L * C).astype(jnp.float32)

    # ---- constant reduce / broadcast matrices ------------------------------------------------
    R_red = jnp.asarray(np.kron(np.eye(L * M * L), np.ones((D, 1))), bf16)     # (L*M*L*D, L*M*L)
    S_grp = jnp.asarray(np.kron(np.eye(L * M), np.ones((L, L))), jnp.float32)  # (L*M*L, L*M*L)
    E_exp = jnp.asarray(np.kron(np.eye(L * M * L), np.ones((1, D))), bf16)     # (L*M*L, L*M*L*D)

    # ---- lane-dense data layouts --------------------------------------------------------------
    x_slab = jnp.transpose(x, (0, 2, 3, 1, 4)).reshape(B, N, L * C).astype(bf16)
    mask_flat = mask.reshape(B, N, L)
    addmask = jnp.tile(jnp.where(mask_flat == 0, -jnp.inf, 0.0).astype(jnp.float32),
                       (1, 1, L * M))                                    # (B, N, L*M*L)

    kernel = functools.partial(_hgt_attention_kernel, num_cavs=L)
    LC = L * C
    W3 = 3 * L * inner
    WT = L * M * L * D
    G = L * M * L

    out_slab = pl.pallas_call(
        kernel,
        out_shape=jax.ShapeDtypeStruct((B, N, LC), jnp.float32),
        grid_spec=pltpu.PrefetchScalarGridSpec(
            num_scalar_prefetch=0,
            grid=(B, N // tile_n),
            in_specs=[
                pl.BlockSpec((None, tile_n, LC),    lambda b, n: (b, n, 0)),   # x
                pl.BlockSpec((None, tile_n, G),     lambda b, n: (b, n, 0)),   # additive mask
                pl.BlockSpec((None, LC, W3),        lambda b, n: (b, 0, 0)),   # W_qkv
                pl.BlockSpec((None, 1, W3),         lambda b, n: (b, 0, 0)),   # b_qkv
                pl.BlockSpec((None, L * inner, WT), lambda b, n: (b, 0, 0)),   # W_att
                pl.BlockSpec((None, M * L * D, WT), lambda b, n: (b, 0, 0)),   # W_msg
                pl.BlockSpec((None, WT, LC),        lambda b, n: (b, 0, 0)),   # W_out
                pl.BlockSpec((None, 1, LC),         lambda b, n: (b, 0, 0)),   # b_out
                pl.BlockSpec((WT, G),               lambda b, n: (0, 0)),      # R_red
                pl.BlockSpec((G, G),                lambda b, n: (0, 0)),      # S_grp
                pl.BlockSpec((G, WT),               lambda b, n: (0, 0)),      # E_exp
            ],
            out_specs=pl.BlockSpec((None, tile_n, LC), lambda b, n: (b, n, 0)),
        ),
        compiler_params=pltpu.CompilerParams(
            dimension_semantics=("parallel", "parallel")),
    )(x_slab, addmask, W_qkv, b_qkv, W_att_big, W_msg_big, W_out_big, b_out,
      R_red, S_grp, E_exp)

    out = out_slab.reshape(B, H, W, L, C)
    return jnp.transpose(out, (0, 3, 1, 2, 4))                           # (B, L, H, W, C)


# ---------------------------------------------------------------------------
# Pure-JAX reference (mirrors the PyTorch forward exactly, f32 HIGHEST).
# ---------------------------------------------------------------------------
def hgt_cav_attention_ref(x, mask, prior_encoding, params, *,
                          heads, dim_head, num_types):
    B, L, H, W, C = x.shape
    M, D = heads, dim_head
    scale = float(D) ** -0.5
    hi = jax.lax.Precision.HIGHEST
    types = prior_encoding[:, :, 0, 0, 2].astype(jnp.int32)

    xp = jnp.transpose(x, (0, 2, 3, 1, 4))                               # (B,H,W,L,C)

    def proj(w, b):
        Wg = params[w][types]                                            # (B,L,C,out)
        bg = params[b][types]                                            # (B,L,out)
        return jnp.einsum("bhwlc,blco->bhwlo", xp, Wg, precision=hi) + bg[:, None, None]

    q, k, v = proj("q_w", "q_b"), proj("k_w", "k_b"), proj("v_w", "v_b")

    def split_heads(t):
        t = t.reshape(B, H, W, L, M, D)
        return jnp.transpose(t, (0, 4, 1, 2, 3, 5))                      # (B,M,H,W,L,D)

    qh, kh, vh = map(split_heads, (q, k, v))

    rel = types[:, :, None] * num_types + types[:, None, :]
    w_att = jnp.transpose(params["relation_att"][rel], (0, 3, 1, 2, 4, 5))
    w_msg = jnp.transpose(params["relation_msg"][rel], (0, 3, 1, 2, 4, 5))

    att = jnp.einsum("bmhwip,bmijpq,bmhwjq->bmhwij", qh, w_att, kh, precision=hi) * scale
    maskb = mask[:, None]                                                # (B,1,H,W,1,L)
    att = jnp.where(maskb == 0, -jnp.inf, att)
    att = jax.nn.softmax(att, axis=-1)

    vmsg = jnp.einsum("bmijpc,bmhwjp->bmhwijc", w_msg, vh, precision=hi)
    out = jnp.einsum("bmhwij,bmhwijc->bmhwic", att, vmsg, precision=hi)
    out = jnp.transpose(out, (0, 2, 3, 4, 1, 5)).reshape(B, H, W, L, M * D)

    Wa = params["a_w"][types]
    ba = params["a_b"][types]
    out = jnp.einsum("bhwlo,bloc->bhwlc", out, Wa, precision=hi) + ba[:, None, None]
    return jnp.transpose(out, (0, 3, 1, 2, 4))                           # (B,L,H,W,C)


# ---------------------------------------------------------------------------
if __name__ == "__main__":
    B, L, H, W = 2, 4, 16, 16
    dim, heads, dim_head = 32, 2, 16
    num_types, num_relations = 2, 4
    inner = heads * dim_head

    key = jax.random.PRNGKey(0)
    ks = jax.random.split(key, 16)

    def rnd(k, shape, s=0.1):
        return (s * jax.random.normal(k, shape)).astype(jnp.float32)

    params = {
        "q_w": rnd(ks[0], (num_types, dim, inner)),
        "q_b": rnd(ks[1], (num_types, inner)),
        "k_w": rnd(ks[2], (num_types, dim, inner)),
        "k_b": rnd(ks[3], (num_types, inner)),
        "v_w": rnd(ks[4], (num_types, dim, inner)),
        "v_b": rnd(ks[5], (num_types, inner)),
        "a_w": rnd(ks[6], (num_types, inner, dim)),
        "a_b": rnd(ks[7], (num_types, dim)),
        "relation_att": rnd(ks[8], (num_relations, heads, dim_head, dim_head)),
        "relation_msg": rnd(ks[9], (num_relations, heads, dim_head, dim_head)),
    }

    x = rnd(ks[10], (B, L, H, W, dim), s=1.0)

    # mask: random per-(b,h,w,cav) validity; CAV 0 always valid so no fully-masked softmax row.
    mask = (jax.random.uniform(ks[12], (B, H, W, 1, L)) > 0.4).astype(jnp.float32)
    mask = mask.at[..., 0].set(1.0)

    types = jax.random.randint(ks[11], (B, L), 0, num_types)
    prior_encoding = jnp.zeros((B, L, H, W, 3), jnp.float32)
    prior_encoding = prior_encoding.at[..., 2].set(
        types[:, :, None, None].astype(jnp.float32))

    out = hgt_cav_attention(x, mask, prior_encoding, params,
                            heads=heads, dim_head=dim_head,
                            num_types=num_types, tile_n=128)
    out = jax.block_until_ready(out)

    ref = hgt_cav_attention_ref(x, mask, prior_encoding, params,
                                heads=heads, dim_head=dim_head,
                                num_types=num_types)
    ref = jax.block_until_ready(ref)

    # kernel uses bf16 MXU operands -> compare at bf16-level tolerance
    np.testing.assert_allclose(np.asarray(out), np.asarray(ref), rtol=2e-2, atol=2e-2)
    print("KERNEL_OK")
</pallas_src>

<mosaic_0001>
module attributes {stable_mosaic.version = 11 : i64} {
  func.func @_hgt_attention_kernel(%arg0: i32, %arg1: i32, %arg2: memref<1x128x128xbf16, #tpu.memory_space<vmem>>, %arg3: memref<1x128x32xf32, #tpu.memory_space<vmem>>, %arg4: memref<1x128x384xbf16, #tpu.memory_space<vmem>>, %arg5: memref<1x1x384xf32, #tpu.memory_space<vmem>>, %arg6: memref<1x128x512xbf16, #tpu.memory_space<vmem>>, %arg7: memref<1x128x512xbf16, #tpu.memory_space<vmem>>, %arg8: memref<1x512x128xbf16, #tpu.memory_space<vmem>>, %arg9: memref<1x1x128xf32, #tpu.memory_space<vmem>>, %arg10: memref<512x32xbf16, #tpu.memory_space<vmem>>, %arg11: memref<32x32xf32, #tpu.memory_space<vmem>>, %arg12: memref<32x512xbf16, #tpu.memory_space<vmem>>, %arg13: memref<1x128x128xf32, #tpu.memory_space<vmem>>) attributes {dimension_semantics = [#tpu.dimension_semantics<parallel>, #tpu.dimension_semantics<parallel>], iteration_bounds = array<i64: 2, 2>, scalar_prefetch = 0 : i64, scratch_operands = 0 : i64, tpu.core_type = #tpu.core_type<tc>, window_params = [{transform_indices = @transform_0, window_bounds = array<i64: 1, 128, 128>}, {transform_indices = @transform_1, window_bounds = array<i64: 1, 128, 32>}, {transform_indices = @transform_2, window_bounds = array<i64: 1, 128, 384>}, {transform_indices = @transform_3, window_bounds = array<i64: 1, 1, 384>}, {transform_indices = @transform_4, window_bounds = array<i64: 1, 128, 512>}, {transform_indices = @transform_5, window_bounds = array<i64: 1, 128, 512>}, {transform_indices = @transform_6, window_bounds = array<i64: 1, 512, 128>}, {transform_indices = @transform_7, window_bounds = array<i64: 1, 1, 128>}, {pipeline_mode = #tpu.pipeline_mode<synchronous>, transform_indices = @transform_8, window_bounds = array<i64: 512, 32>}, {pipeline_mode = #tpu.pipeline_mode<synchronous>, transform_indices = @transform_9, window_bounds = array<i64: 32, 32>}, {pipeline_mode = #tpu.pipeline_mode<synchronous>, transform_indices = @transform_10, window_bounds = array<i64: 32, 512>}, {transform_indices = @transform_11, window_bounds = array<i64: 1, 128, 128>}]} {
    %c0 = arith.constant 0 : index
    %c0_0 = arith.constant 0 : index
    %c0_1 = arith.constant 0 : index
    %0 = vector.load %arg2[%c0, %c0_0, %c0_1] : memref<1x128x128xbf16, #tpu.memory_space<vmem>>, vector<1x128x128xbf16>
    %1 = vector.shape_cast %0 : vector<1x128x128xbf16> to vector<128x128xbf16>
    %c0_2 = arith.constant 0 : index
    %c0_3 = arith.constant 0 : index
    %c0_4 = arith.constant 0 : index
    %2 = vector.load %arg4[%c0_2, %c0_3, %c0_4] : memref<1x128x384xbf16, #tpu.memory_space<vmem>>, vector<1x128x384xbf16>
    %3 = vector.shape_cast %2 : vector<1x128x384xbf16> to vector<128x384xbf16>
    %cst = arith.constant dense<0.000000e+00> : vector<128x384xf32>
    %4 = tpu.matmul %1, %3, %cst {dimension_numbers = #tpu.dot_dimension_numbers<[1], [0], [0], [1], [0, 0, 1, 1], [], []>} : vector<128x128xbf16>, vector<128x384xbf16>, vector<128x384xf32> -> vector<128x384xf32>
    %c0_5 = arith.constant 0 : index
    %c0_6 = arith.constant 0 : index
    %c0_7 = arith.constant 0 : index
    %5 = vector.load %arg5[%c0_5, %c0_6, %c0_7] : memref<1x1x384xf32, #tpu.memory_space<vmem>>, vector<1x1x384xf32>
    %6 = vector.shape_cast %5 : vector<1x1x384xf32> to vector<1x384xf32>
    %7 = vector.broadcast %6 : vector<1x384xf32> to vector<128x384xf32>
    %8 = arith.addf %4, %7 : vector<128x384xf32>
    %9 = vector.extract_strided_slice %8 {offsets = [0, 0], sizes = [128, 128], strides = [1, 1]} : vector<128x384xf32> to vector<128x128xf32>
    %10 = arith.truncf %9 : vector<128x128xf32> to vector<128x128xbf16>
    %11 = vector.extract_strided_slice %8 {offsets = [0, 128], sizes = [128, 128], strides = [1, 1]} : vector<128x384xf32> to vector<128x128xf32>
    %12 = vector.extract_strided_slice %8 {offsets = [0, 256], sizes = [128, 128], strides = [1, 1]} : vector<128x384xf32> to vector<128x128xf32>
    %13 = arith.truncf %12 : vector<128x128xf32> to vector<128x128xbf16>
    %c0_8 = arith.constant 0 : index
    %c0_9 = arith.constant 0 : index
    %c0_10 = arith.constant 0 : index
    %14 = vector.load %arg6[%c0_8, %c0_9, %c0_10] : memref<1x128x512xbf16, #tpu.memory_space<vmem>>, vector<1x128x512xbf16>
    %15 = vector.shape_cast %14 : vector<1x128x512xbf16> to vector<128x512xbf16>
    %cst_11 = arith.constant dense<0.000000e+00> : vector<128x512xf32>
    %16 = tpu.matmul %10, %15, %cst_11 {dimension_numbers = #tpu.dot_dimension_numbers<[1], [0], [0], [1], [0, 0, 1, 1], [], []>} : vector<128x128xbf16>, vector<128x512xbf16>, vector<128x512xf32> -> vector<128x512xf32>
    %17 = tpu.concatenate %11, %11, %11, %11 in 1 : vector<128x128xf32>, vector<128x128xf32>, vector<128x128xf32>, vector<128x128xf32> -> vector<128x512xf32>
    %18 = arith.mulf %16, %17 : vector<128x512xf32>
    %19 = arith.truncf %18 : vector<128x512xf32> to vector<128x512xbf16>
    %c0_12 = arith.constant 0 : index
    %c0_13 = arith.constant 0 : index
    %20 = vector.load %arg10[%c0_12, %c0_13] : memref<512x32xbf16, #tpu.memory_space<vmem>>, vector<512x32xbf16>
    %cst_14 = arith.constant dense<0.000000e+00> : vector<128x32xf32>
    %21 = tpu.matmul %19, %20, %cst_14 {dimension_numbers = #tpu.dot_dimension_numbers<[1], [0], [0], [1], [0, 0, 1, 1], [], []>} : vector<128x512xbf16>, vector<512x32xbf16>, vector<128x32xf32> -> vector<128x32xf32>
    %c0_15 = arith.constant 0 : index
    %c0_16 = arith.constant 0 : index
    %c0_17 = arith.constant 0 : index
    %22 = vector.load %arg3[%c0_15, %c0_16, %c0_17] : memref<1x128x32xf32, #tpu.memory_space<vmem>>, vector<1x128x32xf32>
    %23 = vector.shape_cast %22 : vector<1x128x32xf32> to vector<128x32xf32>
    %24 = arith.addf %21, %23 : vector<128x32xf32>
    %cst_18 = arith.constant dense<0xFF800000> : vector<128xf32>
    %25 = vector.multi_reduction <maximumf>, %24, %cst_18 [1] : vector<128x32xf32> to vector<128xf32>
    %26 = vector.shape_cast %25 : vector<128xf32> to vector<128x1xf32>
    %27 = vector.broadcast %26 : vector<128x1xf32> to vector<128x32xf32>
    %28 = arith.subf %24, %27 : vector<128x32xf32>
    %29 = math.exp %28 : vector<128x32xf32>
    %c0_19 = arith.constant 0 : index
    %c0_20 = arith.constant 0 : index
    %30 = vector.load %arg11[%c0_19, %c0_20] : memref<32x32xf32, #tpu.memory_space<vmem>>, vector<32x32xf32>
    %cst_21 = arith.constant dense<0.000000e+00> : vector<128x32xf32>
    %31 = tpu.matmul %29, %30, %cst_21 {dimension_numbers = #tpu.dot_dimension_numbers<[1], [0], [0], [1], [0, 0, 1, 1], [], []>} : vector<128x32xf32>, vector<32x32xf32>, vector<128x32xf32> -> vector<128x32xf32>
    %32 = tpu.reciprocal %31 {approx = true} : vector<128x32xf32> -> vector<128x32xf32>
    %33 = arith.mulf %29, %32 : vector<128x32xf32>
    %c0_22 = arith.constant 0 : index
    %c0_23 = arith.constant 0 : index
    %c0_24 = arith.constant 0 : index
    %34 = vector.load %arg7[%c0_22, %c0_23, %c0_24] : memref<1x128x512xbf16, #tpu.memory_space<vmem>>, vector<1x128x512xbf16>
    %35 = vector.shape_cast %34 : vector<1x128x512xbf16> to vector<128x512xbf16>
    %cst_25 = arith.constant dense<0.000000e+00> : vector<128x512xf32>
    %36 = tpu.matmul %13, %35, %cst_25 {dimension_numbers = #tpu.dot_dimension_numbers<[1], [0], [0], [1], [0, 0, 1, 1], [], []>} : vector<128x128xbf16>, vector<128x512xbf16>, vector<128x512xf32> -> vector<128x512xf32>
    %37 = arith.truncf %33 : vector<128x32xf32> to vector<128x32xbf16>
    %c0_26 = arith.constant 0 : index
    %c0_27 = arith.constant 0 : index
    %38 = vector.load %arg12[%c0_26, %c0_27] : memref<32x512xbf16, #tpu.memory_space<vmem>>, vector<32x512xbf16>
    %cst_28 = arith.constant dense<0.000000e+00> : vector<128x512xf32>
    %39 = tpu.matmul %37, %38, %cst_28 {dimension_numbers = #tpu.dot_dimension_numbers<[1], [0], [0], [1], [0, 0, 1, 1], [], []>} : vector<128x32xbf16>, vector<32x512xbf16>, vector<128x512xf32> -> vector<128x512xf32>
    %40 = arith.mulf %39, %36 : vector<128x512xf32>
    %41 = arith.truncf %40 : vector<128x512xf32> to vector<128x512xbf16>
    %c0_29 = arith.constant 0 : index
    %c0_30 = arith.constant 0 : index
    %c0_31 = arith.constant 0 : index
    %42 = vector.load %arg8[%c0_29, %c0_30, %c0_31] : memref<1x512x128xbf16, #tpu.memory_space<vmem>>, vector<1x512x128xbf16>
    %43 = vector.shape_cast %42 : vector<1x512x128xbf16> to vector<512x128xbf16>
    %cst_32 = arith.constant dense<0.000000e+00> : vector<128x128xf32>
    %44 = tpu.matmul %41, %43, %cst_32 {dimension_numbers = #tpu.dot_dimension_numbers<[1], [0], [0], [1], [0, 0, 1, 1], [], []>} : vector<128x512xbf16>, vector<512x128xbf16>, vector<128x128xf32> -> vector<128x128xf32>
    %c0_33 = arith.constant 0 : index
    %c0_34 = arith.constant 0 : index
    %c0_35 = arith.constant 0 : index
    %45 = vector.load %arg9[%c0_33, %c0_34, %c0_35] : memref<1x1x128xf32, #tpu.memory_space<vmem>>, vector<1x1x128xf32>
    %46 = vector.shape_cast %45 : vector<1x1x128xf32> to vector<1x128xf32>
    %47 = vector.broadcast %46 : vector<1x128xf32> to vector<128x128xf32>
    %48 = arith.addf %44, %47 : vector<128x128xf32>
    %c0_36 = arith.constant 0 : index
    %c0_37 = arith.constant 0 : index
    %c0_38 = arith.constant 0 : index
    %49 = vector.load %arg13[%c0_36, %c0_37, %c0_38] : memref<1x128x128xf32, #tpu.memory_space<vmem>>, vector<1x128x128xf32>
    %50 = vector.shape_cast %49 : vector<1x128x128xf32> to vector<128x128xf32>
    %51 = vector.shape_cast %48 : vector<128x128xf32> to vector<1x128x128xf32>
    tpu.vector_store %arg13[%c0_36, %c0_37, %c0_38], %51 {strides = array<i32>} : memref<1x128x128xf32, #tpu.memory_space<vmem>>, vector<1x128x128xf32>,
    return
  }
  func.func @transform_0(%arg0: i32, %arg1: i32) -> (i32, i32, i32) {
    %c0_i32 = arith.constant 0 : i32
    %c0_i32_0 = arith.constant 0 : i32
    return %arg0, %arg1, %c0_i32 : i32, i32, i32
  }
  func.func @transform_1(%arg0: i32, %arg1: i32) -> (i32, i32, i32) {
    %c0_i32 = arith.constant 0 : i32
    %c0_i32_0 = arith.constant 0 : i32
    return %arg0, %arg1, %c0_i32 : i32, i32, i32
  }
  func.func @transform_2(%arg0: i32, %arg1: i32) -> (i32, i32, i32) {
    %c0_i32 = arith.constant 0 : i32
    %c0_i32_0 = arith.constant 0 : i32
    %c0_i32_1 = arith.constant 0 : i32
    return %arg0, %c0_i32, %c0_i32_0 : i32, i32, i32
  }
  func.func @transform_3(%arg0: i32, %arg1: i32) -> (i32, i32, i32) {
    %c0_i32 = arith.constant 0 : i32
    %c0_i32_0 = arith.constant 0 : i32
    %c0_i32_1 = arith.constant 0 : i32
    return %arg0, %c0_i32, %c0_i32_0 : i32, i32, i32
  }
  func.func @transform_4(%arg0: i32, %arg1: i32) -> (i32, i32, i32) {
    %c0_i32 = arith.constant 0 : i32
    %c0_i32_0 = arith.constant 0 : i32
    %c0_i32_1 = arith.constant 0 : i32
    return %arg0, %c0_i32, %c0_i32_0 : i32, i32, i32
  }
  func.func @transform_5(%arg0: i32, %arg1: i32) -> (i32, i32, i32) {
    %c0_i32 = arith.constant 0 : i32
    %c0_i32_0 = arith.constant 0 : i32
    %c0_i32_1 = arith.constant 0 : i32
    return %arg0, %c0_i32, %c0_i32_0 : i32, i32, i32
  }
  func.func @transform_6(%arg0: i32, %arg1: i32) -> (i32, i32, i32) {
    %c0_i32 = arith.constant 0 : i32
    %c0_i32_0 = arith.constant 0 : i32
    %c0_i32_1 = arith.constant 0 : i32
    return %arg0, %c0_i32, %c0_i32_0 : i32, i32, i32
  }
  func.func @transform_7(%arg0: i32, %arg1: i32) -> (i32, i32, i32) {
    %c0_i32 = arith.constant 0 : i32
    %c0_i32_0 = arith.constant 0 : i32
    %c0_i32_1 = arith.constant 0 : i32
    return %arg0, %c0_i32, %c0_i32_0 : i32, i32, i32
  }
  func.func @transform_8(%arg0: i32, %arg1: i32) -> (i32, i32) {
    %c0_i32 = arith.constant 0 : i32
    %c0_i32_0 = arith.constant 0 : i32
    %c0_i32_1 = arith.constant 0 : i32
    return %c0_i32, %c0_i32_0 : i32, i32
  }
  func.func @transform_9(%arg0: i32, %arg1: i32) -> (i32, i32) {
    %c0_i32 = arith.constant 0 : i32
    %c0_i32_0 = arith.constant 0 : i32
    %c0_i32_1 = arith.constant 0 : i32
    return %c0_i32, %c0_i32_0 : i32, i32
  }
  func.func @transform_10(%arg0: i32, %arg1: i32) -> (i32, i32) {
    %c0_i32 = arith.constant 0 : i32
    %c0_i32_0 = arith.constant 0 : i32
    %c0_i32_1 = arith.constant 0 : i32
    return %c0_i32, %c0_i32_0 : i32, i32
  }
  func.func @transform_11(%arg0: i32, %arg1: i32) -> (i32, i32, i32) {
    %c0_i32 = arith.constant 0 : i32
    %c0_i32_0 = arith.constant 0 : i32
    return %arg0, %arg1, %c0_i32 : i32, i32, i32
  }
}

</mosaic_0001>

<bundles_post_ra>
// kernel: tpu_custom_call.1
= control target key start
LH: loop header
LB: loop body
LE: loop exit
PB: predicated region body
PF: predicated region fallthrough
CT: control target
= control target key end

     0   :  { %s6608_s0 = inlined_call_operand.vmem [shape: bf16[2,256,128], index: 0, kind: input, shape index: {}]   ;;  %s6609_s1 = inlined_call_operand.vmem [shape: f32[2,256,32], index: 1, kind: input, shape index: {}]   ;;  %s6610_s2 = inlined_call_operand.hbm [shape: bf16[2,128,384], index: 2, kind: input, shape index: {}]   ;;  %s6611_s3 = inlined_call_operand.hbm [shape: f32[2,1,384], index: 3, kind: input, shape index: {}]   ;;  %s6612_s4 = inlined_call_operand.vmem [shape: bf16[2,128,512], index: 4, kind: input, shape index: {}]   ;;  %s6613_s5 = inlined_call_operand.hbm [shape: bf16[2,128,512], index: 5, kind: input, shape index: {}]   ;;  %s6614_s6 = inlined_call_operand.hbm [shape: bf16[2,512,128], index: 6, kind: input, shape index: {}]   ;;  %s6615_s7 = inlined_call_operand.hbm [shape: f32[2,1,128], index: 7, kind: input, shape index: {}]   ;;  %s6616_s8 = inlined_call_operand.vmem [shape: bf16[512,32], index: 8, kind: input, shape index: {}]   ;;  %s6617_s9 = inlined_call_operand.hbm [shape: f32[32,32], index: 9, kind: input, shape index: {}]   ;;  %s6618_s10 = inlined_call_operand.vmem [shape: bf16[32,512], index: 10, kind: input, shape index: {}]   ;;  %s6619_s11 = inlined_call_operand.hbm [shape: f32[2,256,128], index: 11, kind: output, shape index: {}]  }
   0x1   :  { %6635 = sst [smem:[#allocation40_spill]] %s6608_s0 }
   0x2   :  { %6636 = sst [smem:[#allocation41_spill]] %s6609_s1 }
   0x3   :  { %6637 = sst [smem:[#allocation42_spill]] %s6611_s3 }
   0x4   :  { %6638 = sst [smem:[#allocation43_spill]] %s6612_s4 }
   0x5   :  { %6639 = sst [smem:[#allocation44_spill]] %s6613_s5 }
   0x6   :  { %6640 = sst [smem:[#allocation45_spill]] %s6614_s6 }
   0x7   :  { %6641 = sst [smem:[#allocation46_spill]] %s6616_s8 }
   0x8   :  { %6642 = sst [smem:[#allocation47_spill]] %s6617_s9 }
   0x9   :  { %6643 = sst [smem:[#allocation48_spill]] %s6618_s10 }
   0xa   :  { %6644 = sst [smem:[#allocation49_spill]] %s6619_s11 }
   0xb   :  { %16 = vsyncpa [#allocation3], 0 }
   0xc   :  { %18 = vsyncpa [#allocation3 + $0x1], 0 }
   0xd   :  { %19 = vsyncpa [#allocation6], 0 }
   0xe   :  { %21 = vsyncpa [#allocation6 + $0x1], 0 }
   0xf   :  { %22 = vsyncpa [#allocation9], 0 }
  0x10   :  { %24 = vsyncpa [#allocation9 + $0x1], 0 }
  0x11   :  { %25 = vsyncpa [#allocation12], 0 }
  0x12   :  { %26 = vsyncpa [#allocation4], 0 }
  0x13   :  { %28 = vsyncpa [#allocation4 + $0x1], 0  ;;  %s5277_s17 = smov 0   ;;  %s5279_s18 = smov 0  }
  0x14   :  { %s5281_s19 = smov 0   ;;  %s5283_s20 = smov 0  }
  0x15   :  { %s5285_s21 = smov 0   ;;  %s5287_s22 = smov 0  }
  0x16   :  { %s5289_s23 = smov 0   ;;  %s5291_s24 = smov 0  }
  0x17   :  { %s5293_s25 = smov 0   ;;  %s5295_s26 = smov 0  }
  0x18   :  { %s5297_s27 = smov 0  }
  0x19 LB: > { %6645 = sst [smem:[#allocation19_spill]] %s5164_s17  ;;  %s43_s28 = sadd.s32 1, %s5196_s25  ;;  %s5204_s27 = sphi %s5297_s27, %s34_s27   ;;  %s5200_s26 = sphi %s5295_s26, %s6710_s26   ;;  %s5196_s25 = sphi %s5293_s25, %s6703_s25   ;;  %s5192_s24 = sphi %s5291_s24, %s6709_s24   ;;  %s5188_s23 = sphi %s5289_s23, %s6702_s23   ;;  %s5184_s22 = sphi %s5287_s22, %s6701_s22   ;;  %s5180_s21 = sphi %s5285_s21, %s6708_s21   ;;  %s5176_s20 = sphi %s5283_s20, %s6707_s20   ;;  %s5172_s19 = sphi %s5281_s19, %s6699_s19   ;;  %s5168_s18 = sphi %s5279_s18, %s6706_s18   ;;  %s5164_s17 = sphi %s5277_s17, %s6705_s17  }
  0x1a   : > { %6646 = sst [smem:[#allocation20_spill]] %s5172_s19  ;;  %s46_s29 = sadd.s32 1, %s5200_s26 }
  0x1b   : > { %6647 = sst [smem:[#allocation21_spill]] %s5184_s22  ;;  %p44_p0 = scmp.ge.s32.totalorder %s43_s28, 2 }
  0x1c   : > { %6648 = sst [smem:[#allocation22_spill]] %s5188_s23  ;;  %s109_s30 = sadd.s32 1, %s5184_s22 }
  0x1d   : > { %6649 = sst [smem:[#allocation23_spill]] %s5192_s24  ;;  %p116_p1 = scmp.ne.s32.totalorder %s5184_s22, %s5180_s21 }
  0x1e   : > { %6650 = sst [smem:[#allocation24_spill]] %s5196_s25  ;;  %p117_p2 = scmp.eq.s32.totalorder %s5204_s27, 0 }
  0x1f   : > { %6651 = sst [smem:[#allocation25_spill]] %s5204_s27  ;;  %s6712_s28 = smov (%p44_p0, %s43_s28), 0 }
  0x20   : > { %6652 = sst [smem:[#allocation26_spill]] %s6712_s28  ;;  %s6714_s29 = smov (!%p44_p0, %s46_s29), %s5200_s26 }
  0x21   : > { %p118_p3 = por %p117_p2, %p116_p1  ;;  %s326_s12 = ssub.s32 %s5196_s25, %s6712_s28 }
  0x22   : > { %p48_p4 = scmp.ge.s32.totalorder %s6714_s29, 2  ;;  %p4723_p5 = scmp.lt.s32.totalorder %s5204_s27, 4 }
  0x23   : > { %s5345_s13 = sand.u32 1, %s5184_s22   ;;  %s4679_s10 = smul.u32 3, %s5200_s26 }
  0x24   : > { %s6716_s29 = smov (%p48_p4, %s6714_s29), 0  ;;  %p5349_p6 = pnand %p4723_p5, %p118_p3 }
  0x25   : > { %6653 = sst [smem:[#allocation27_spill]] %s6716_s29  ;;  %s106_s16 = ssub.s32 %s5200_s26, %s6716_s29 }
  0x26   : > { %p107_p7 = scmp.eq.s32.totalorder %s106_s16, 0  ;;  %s5356_s28 = sor.u32 %s326_s12, %s106_s16 }
  0x27   : > { %p328_p8 = scmp.eq.s32.totalorder %s5356_s28, 0  ;;  %s4678_s11 = smul.u32 3, %s5345_s13 }
  0x28   : > { %s5360_s25 = scalar_select %p107_p7, %s5184_s22, %s109_s30  }
  0x29   : > { %s3760_s1 = sshll.u32 %s5345_s13, 8  ;;  %s6656_s3 = sld [smem:[#allocation42_spill]] }
  0x2a   : > { %6655 = sst [smem:[#allocation28_spill]] %s5360_s25  ;;  %s439_s24 = scalar_lea.vmem [#allocation5], %s4678_s11 }
  0x2b   : > { %s447_s23 = sshll.u32 %s439_s24, 4  ;;  %s4505_s29 = sshll.u32 %s5200_s26, 8  ;;  %s448_s23 = int_to_ptr.vmem [resolvable:$true] %s447_s23 }
  0x2c   : > { %s6657_s12 = sand.u32 1, %s5204_s27   ;;  %s6658_s5 = sld [smem:[#allocation44_spill]] }
  0x2d   : > { %s5371_s16 = scalar_lea.sflag [#allocation6], %s6657_s12  ;;  %s466_s0 = scalar_lea.vmem [#allocation7], %s3760_s1 }
  0x2e   : > { %s474_s8 = sshll.u32 %s466_s0, 4  ;;  %s6659_s6 = sld [smem:[#allocation45_spill]]  ;;  %s5379_s8 = int_to_ptr.vmem [resolvable:$true] %s474_s8 }
  0x2f   : > { %s443_s4 = scalar_lea.hbm %s6656_s3, %s4679_s10  ;;  %s488_s24 = scalar_lea.vmem [#allocation8], %s3760_s1 }
  0x30   : > { %s445_s15 = sshll.u32 %s443_s4, 4  ;;  %s496_s25 = sshll.u32 %s488_s24, 4  ;;  %s446_s15 = int_to_ptr.hbm [resolvable:$true] %s445_s15  ;;  %s497_s25 = int_to_ptr.vmem [resolvable:$true] %s496_s25 }
  0x31   : > { %4708 = dma.hbm_to_vmem [thread:$0]  (!%p5349_p6), %s446_s15, 48, %s448_s23, %s5371_s16  }
  0x32   : > { %s471_s22 = scalar_lea.hbm %s6658_s5, %s4505_s29  ;;  %s5206_s30 = smov 64  }
  0x33   : > { %s472_s4 = sshll.u32 %s471_s22, 4  ;;  %s6660_s22 = smov %s6657_s12  ;;  %s5381_s4 = int_to_ptr.hbm [resolvable:$true] %s472_s4 }
  0x34   : > { %s493_s23 = scalar_lea.hbm %s6659_s6, %s4505_s29  ;;  %s5388_s12 = scalar_lea.sflag [#allocation9], %s6660_s22 }
  0x35   : > { %s494_s15 = sshll.u32 %s493_s23, 4  ;;  %s5207_s0 = smov 4   ;;  %s495_s15 = int_to_ptr.hbm [resolvable:$true] %s494_s15 }
  0x36   : > { %4714 = dma.hbm_to_vmem [thread:$0]  (!%p5349_p6), %s495_s15, 4096, %s497_s25, %s5388_s12, %s5206_s30, %s5206_s30, %s5207_s0  }
  0x37   : > { %s5394_s29 = sadd.s32 4294967295, %s5204_s27   ;;  %s3755_s1 = sadd.s32 4294967294, %s5204_s27  }
  0x38   : > { %p122_p9 = scmp.ne.s32.totalorder %s5180_s21, %s5176_s20  ;;  %p123_p10 = scmp.eq.s32.totalorder %s5394_s29, 0 }
  0x39   : > { %s330_s10 = sadd.s32 1, %s5172_s19  ;;  %p340_p12 = scmp.ne.s32.totalorder %s5172_s19, %s5168_s18 }
  0x3a   : > { %s5404_s11 = scalar_select %p328_p8, %s5172_s19, %s330_s10  }
  0x3b   : > { %p5408_p11 = por %p123_p10, %p122_p9  ;;  %p341_p13 = scmp.eq.s32.totalorder %s5394_s29, 3 }
  0x3c   : > { %6661 = sst [smem:[#allocation29_spill]] %s5404_s11  ;;  %p346_p0 = scmp.ne.s32.totalorder %s5168_s18, %s5164_s17 }
  0x3d   : > { %p347_p1 = scmp.eq.s32.totalorder %s3755_s1, 3  ;;  %p3756_p2 = scmp.ge.s32.totalorder %s5204_s27, 1 }
  0x3e   : > { %p5418_p3 = por %p341_p13, %p340_p12  ;;  %p354_p4 = scmp.lt.s32.totalorder %s5204_s27, 5 }
  0x3f   : > { %p5423_p5 = por %p347_p1, %p346_p0  ;;  %s6668_s9 = sld [smem:[#allocation47_spill]] }
  0x40   : > { %s6663_s20 = scalar_select %p5418_p3, 1, 0 }
  0x41   : > { %s6665_s28 = scalar_select %p5423_p5, 1, 0 }
  0x42   : > { %6664 = sst [smem:[#allocation30_spill]] %s6663_s20  ;;  %p5427_p7 = pnand %p3756_p2, %p354_p4 }
  0x43   : > { %6666 = sst [smem:[#allocation31_spill]] %s6665_s28  ;;  %s5208_s30 = smov [#allocation11]  }
  0x44   : > { %p4698_p8 = pneg %p5427_p7  ;;  %s370_s0 = sshll.u32 %s5208_s30, 4  ;;  %s371_s0 = int_to_ptr.vmem [resolvable:$true] %s370_s0 }
  0x45   : > { %s368_s22 = sshll.u32 %s6668_s9, 4  ;;  %s4676_s1 = smul.u32 192, %s5345_s13  ;;  %s369_s22 = int_to_ptr.hbm [resolvable:$true] %s368_s22 }
  0x46   : > { %p4699_p9 = pnand %p4698_p8, %p123_p10  ;;  %s4677_s10 = smul.u32 192, %s5200_s26 }
  0x47   : > { %s5209_s3 = smov 128   ;;  %s5210_s25 = smov 8  }
  0x48   : > { %4701 = dma.hbm_to_vmem [thread:$0]  (!%p4699_p9), %s369_s22, 512, %s371_s0, [#allocation12], %s5209_s3, %s5209_s3, %s5210_s25  }
  0x49   : > { %s422_s6 = scalar_lea.hbm %s6610_s2, %s4677_s10  ;;  %s417_s9 = scalar_lea.vmem [#allocation2], %s4676_s1 }
  0x4a   : > { %s423_s30 = sshll.u32 %s422_s6, 4  ;;  %s425_s11 = sshll.u32 %s417_s9, 4  ;;  %s424_s30 = int_to_ptr.hbm [resolvable:$true] %s423_s30  ;;  %s426_s11 = int_to_ptr.vmem [resolvable:$true] %s425_s11 }
  0x4b   : > { %s414_s19 = scalar_lea.sflag [#allocation3], %s5345_s13  ;;  %s5211_s28 = smov 192  }
  0x4c   : > { %s5212_s17 = smov 12   ;;  %s5213_s27 = smov 256  }
  0x4d   : > { %4705 = dma.hbm_to_vmem [thread:$0]  (!%p5349_p6), %s424_s30, 3072, %s426_s11, %s414_s19, %s5211_s28, %s5211_s28, %s5212_s17  }
  0x4e   : > { %s5214_s20 = smov 16   ;;  %s512_s22 = scalar_lea.hbm %s6615_s7, %s5200_s26 }
  0x4f   : > { %4711 = dma.hbm_to_vmem [thread:$0]  (!%p5349_p6), %s5381_s4, 4096, %s5379_s8, %s5371_s16, %s5213_s27, %s5213_s27, %s5214_s20  }
  0x50   : > { %s514_s6 = sshll.u32 %s512_s22, 4  ;;  %s509_s0 = scalar_lea.vmem [#allocation10], %s5345_s13  ;;  %s515_s6 = int_to_ptr.hbm [resolvable:$true] %s514_s6 }
  0x51   : > { %s516_s9 = sshll.u32 %s509_s0, 4  ;;  %525 = sbr.rel (%p5427_p7) target bundleno = 1342 (0x53e), region = 64  ;;  %s517_s9 = int_to_ptr.vmem [resolvable:$true] %s516_s9 }
  0x52   : > { %4717 = dma.hbm_to_vmem [thread:$0]  (!%p5349_p6), %s515_s6, 16, %s517_s9, %s5388_s12  }
  0x56   : > { %s5462_s17 = sand.u32 1, %s5180_s21  }
  0x57   : > { %s4680_s19 = smul.u32 192, %s5462_s17  ;;  %s528_s27 = scalar_lea.sflag [#allocation3], %s5462_s17 }
  0x59   : > { %s5466_s16 = scalar_lea.vmem [#allocation2], %s4680_s19 }
  0x5a   : > { %5143 = dma.done.wait (%p5408_p11), %s528_s27, 3072  }
  0x5b   : > { %5145 = vsyncadd (%p5408_p11), %s528_s27, 4294964224  ;;  %s537_s13 = sand.u32 1, %s5394_s29   ;;  %s4681_s14 = smul.u32 3, %s5462_s17 }
  0x5c   : > { %s538_s8 = scalar_lea.sflag [#allocation6], %s537_s13 }
  0x5d   : > { %s5474_s4 = scalar_lea.vmem [#allocation5], %s4681_s14 }
  0x5e   : > { %5147 = dma.done.wait (%p5408_p11), %s538_s8, 4144  }
  0x5f   : > { %5149 = vsyncadd (%p5408_p11), %s538_s8, 4294963152  ;;  %s3767_s12 = sshll.u32 %s5462_s17, 8  ;;  %s558_s20 = scalar_lea.sflag [#allocation9], %s537_s13 }
  0x60   : > { %s5481_s11 = scalar_lea.vmem [#allocation7], %s3767_s12  ;;  %s5483_s28 = scalar_lea.vmem [#allocation8], %s3767_s12 }
  0x61   : > { %5151 = dma.done.wait (%p5408_p11), %s558_s20, 4112  }
  0x62   : > { %5153 = vsyncadd (%p5408_p11), %s558_s20, 4294963184  ;;  %s570_s24 = scalar_lea.vmem [#allocation10], %s5462_s17 }
  0x63   : > { %5155 = dma.done.wait (%p123_p10), [#allocation12], 512  }
  0x64   : > { %5157 = vsyncadd (%p123_p10), [#allocation12], 4294966784  ;;  %v3897_v0 = vld [vmem:[%s5466_s16 + $0xa8] sm:$0xf]  ;;  %v4538_v1 = vld [vmem:[%s5466_s16 + $0xb0] sm:$0xf0] }
  0x65   : > { %v3885_v2 = vld [vmem:[%s5466_s16 + $0x90] sm:$0xf]  ;;  %v3898_v3 = vor.u32 %v4538_v1, %v3897_v0  ;;  %v4535_v4 = vld [vmem:[%s5466_s16 + $0x98] sm:$0xf0]  ;;  %v4537_v7 = vld [vmem:[%s5466_s16 + $0xac] sm:$0xf] }
  0x66   : > { %v3905_v5 = vld [vmem:[%s5466_s16 + $0xb0] sm:$0xf]  ;;  %v4539_v6 = vld [vmem:[%s5466_s16 + $0xb8] sm:$0xf0]  ;;  %v3886_v8 = vor.u32 %v4535_v4, %v3885_v2  ;;  %v3873_v9 = vld [vmem:[%s5466_s16 + $0x78] sm:$0xf] }
  0x67   : > { %916 = vmatpush.bf16.msra.mxu0 %v3898_v3  ;;  %v4532_v10 = vld [vmem:[%s5466_s16 + $0x80] sm:$0xf0]  ;;  %v3906_v11 = vor.u32 %v4539_v6, %v3905_v5  ;;  %v3899_v12 = vld [vmem:[%s5466_s16 + $0xb4] sm:$0xf0]  ;;  %v4534_v16 = vld [vmem:[%s5466_s16 + $0x94] sm:$0xf] }
  0x68   : > { %v3902_v13 = vor.u32 %v4537_v7, %v3899_v12  ;;  %v3893_v14 = vld [vmem:[%s5466_s16 + $0x98] sm:$0xf]  ;;  %v4536_v15 = vld [vmem:[%s5466_s16 + $0xa0] sm:$0xf0]  ;;  %v3887_v18 = vld [vmem:[%s5466_s16 + $0x9c] sm:$0xf0]  ;;  %v3874_v22 = vor.u32 %v4532_v10, %v3873_v9 }
  0x69   : > { %1014 = vmatpush.bf16.msra.mxu2 %v3906_v11  ;;  %v3894_v17 = vor.u32 %v4536_v15, %v3893_v14  ;;  %s6669_s29 = sld [smem:[#allocation22_spill]]  ;;  %v3890_v19 = vor.u32 %v4534_v16, %v3887_v18  ;;  %v3881_v20 = vld [vmem:[%s5466_s16 + $0x80] sm:$0xf]  ;;  %v4533_v21 = vld [vmem:[%s5466_s16 + $0x88] sm:$0xf0]  ;;  %vm2031_vm0 = vcmask 261120  }
  0x6a   : > { %965 = vmatpush.bf16.msra.mxu1 %v3902_v13  ;;  %s6670_s23 = sld [smem:[#allocation23_spill]]  ;;  %v4531_v23 = vld [vmem:[%s5466_s16 + $0x7c] sm:$0xf]  ;;  %v3875_v24 = vld [vmem:[%s5466_s16 + $0x84] sm:$0xf0]  ;;  %v3882_v27 = vor.u32 %v4533_v21, %v3881_v20 }
  0x6b   : > { %917 = vmatpush.bf16.msra.mxu0 %v3886_v8  ;;  %v3861_v25 = vld [vmem:[%s5466_s16 + $0x60] sm:$0xf]  ;;  %v4529_v26 = vld [vmem:[%s5466_s16 + $0x68] sm:$0xf0]  ;;  %v3878_v28 = vor.u32 %v4531_v23, %v3875_v24  ;;  %v3869_v29 = vld [vmem:[%s5466_s16 + $0x68] sm:$0xf] }
  0x6c   : > { %v4530_v30 = vld [vmem:[%s5466_s16 + $0x70] sm:$0xf0]  ;;  %v3862_v31 = vor.u32 %v4529_v26, %v3861_v25  ;;  %v4528_v32 = vld [vmem:[%s5466_s16 + $0x64] sm:$0xf]  ;;  %v3863_v33 = vld [vmem:[%s5466_s16 + $0x6c] sm:$0xf0] }
  0x6d   : > { %1015 = vmatpush.bf16.msra.mxu2 %v3894_v17  ;;  %v3849_v34 = vld [vmem:[%s5466_s16 + $0x48] sm:$0xf]  ;;  %v4526_v35 = vld [vmem:[%s5466_s16 + $0x50] sm:$0xf0]  ;;  %v3870_v36 = vor.u32 %v4530_v30, %v3869_v29  ;;  %v3866_v37 = vor.u32 %v4528_v32, %v3863_v33  ;;  %v3857_v38 = vld [vmem:[%s5466_s16 + $0x50] sm:$0xf] }
  0x6e   : > { %966 = vmatpush.bf16.msra.mxu1 %v3890_v19  ;;  %v4527_v39 = vld [vmem:[%s5466_s16 + $0x58] sm:$0xf0]  ;;  %v3850_v40 = vor.u32 %v4526_v35, %v3849_v34  ;;  %v4525_v41 = vld [vmem:[%s5466_s16 + $0x4c] sm:$0xf]  ;;  %v3851_v42 = vld [vmem:[%s5466_s16 + $0x54] sm:$0xf0] }
  0x6f   : > { %s5517_s1 = sshll.u32 %s6669_s29, 4  ;;  %918 = vmatpush.bf16.msra.mxu0 %v3874_v22  ;;  %v3837_v43 = vld [vmem:[%s5466_s16 + $0x30] sm:$0xf]  ;;  %v4523_v44 = vld [vmem:[%s5466_s16 + $0x38] sm:$0xf0]  ;;  %v3858_v45 = vor.u32 %v4527_v39, %v3857_v38  ;;  %v3854_v46 = vor.u32 %v4525_v41, %v3851_v42  ;;  %s6671_s6 = sld [smem:[#allocation43_spill]] }
  0x70   : > { %p658_p6 = scmp.lt.s32.totalorder %s6670_s23, 1  ;;  %p660_p10 = scmp.lt.s32.totalorder %s5517_s1, 31  ;;  %v3845_v47 = vld [vmem:[%s5466_s16 + $0x38] sm:$0xf]  ;;  %v4524_v48 = vld [vmem:[%s5466_s16 + $0x40] sm:$0xf0]  ;;  %v3838_v49 = vor.u32 %v4523_v44, %v3837_v43 }
  0x71   : > { %1016 = vmatpush.bf16.msra.mxu2 %v3882_v27  ;;  %v4522_v50 = vld [vmem:[%s5466_s16 + $0x34] sm:$0xf]  ;;  %v3839_v51 = vld [vmem:[%s5466_s16 + $0x3c] sm:$0xf0]  ;;  %v3825_v52 = vld [vmem:[%s5466_s16 + $0x18] sm:$0xf]  ;;  %v3846_v54 = vor.u32 %v4524_v48, %v3845_v47 }
  0x72   : > { %967 = vmatpush.bf16.msra.mxu1 %v3878_v28  ;;  %s659_s10 = scalar_select %p658_p6, %s6670_s23, 1  ;;  %v4520_v53 = vld [vmem:[%s5466_s16 + $0x20] sm:$0xf0]  ;;  %v3842_v55 = vor.u32 %v4522_v50, %v3839_v51  ;;  %v3833_v56 = vld [vmem:[%s5466_s16 + $0x20] sm:$0xf] }
  0x73   : > { %919 = vmatpush.bf16.msra.mxu0 %v3862_v31  ;;  %s661_s25 = scalar_select %p660_p10, %s5517_s1, 31  ;;  %v4521_v57 = vld [vmem:[%s5466_s16 + $0x28] sm:$0xf0]  ;;  %v3826_v58 = vor.u32 %v4520_v53, %v3825_v52  ;;  %v4519_v59 = vld [vmem:[%s5466_s16 + $0x1c] sm:$0xf] }
  0x74   : > { %s3772_s15 = sshll.u32 %s659_s10, 5  ;;  %s4507_s30 = sshll.u32 %s659_s10, 8  ;;  %v3827_v60 = vld [vmem:[%s5466_s16 + $0x24] sm:$0xf0]  ;;  %v3813_v61 = vld [vmem:[%s5466_s16] sm:$0xf]  ;;  %v3834_v63 = vor.u32 %v4521_v57, %v3833_v56 }
  0x75   : > { %1017 = vmatpush.bf16.msra.mxu2 %v3870_v36  ;;  %s5543_s3 = sadd.s32 %s3772_s15, %s661_s25  ;;  %s5548_s0 = scalar_lea.vmem %s6671_s6, %s4507_s30  ;;  %v4517_v62 = vld [vmem:[%s5466_s16 + $0x8] sm:$0xf0]  ;;  %v3830_v2 = vor.u32 %v4519_v59, %v3827_v60  ;;  %v3821_v3 = vld [vmem:[%s5466_s16 + $0x8] sm:$0xf]  ;;  %v4518_v4 = vld [vmem:[%s5466_s16 + $0x10] sm:$0xf0] }
  0x76   : > { %968 = vmatpush.bf16.msra.mxu1 %v3866_v37  ;;  %s3773_s9 = sshll.u32 %s5543_s3, 2  ;;  %v4568_v0 = vld [vmem:[%s5548_s0 + $0xe4] sm:$0xf]  ;;  %v4023_v1 = vld [vmem:[%s5548_s0 + $0xf0] sm:$0xf0]  ;;  %v3814_v5 = vor.u32 %v4517_v62, %v3813_v61  ;;  %s6672_s13 = sld [smem:[#allocation40_spill]]  ;;  %v3822_v13 = vor.u32 %v4518_v4, %v3821_v3 }
  0x77   : > { %920 = vmatpush.bf16.msra.mxu0 %v3850_v40  ;;  %v4516_v6 = vld [vmem:[%s5466_s16 + $0x4] sm:$0xf]  ;;  %v3815_v7 = vld [vmem:[%s5466_s16 + $0xc] sm:$0xf0]  ;;  %v4569_v8 = vld [vmem:[%s5548_s0 + $0xec] sm:$0xf]  ;;  %v4026_v10 = vor.u32 %v4568_v0, %v4023_v1 }
  0x78   : > { %v4031_v9 = vld [vmem:[%s5548_s0 + $0xf8] sm:$0xf0]  ;;  %v4029_v11 = vld [vmem:[%s5548_s0 + $0xe8] sm:$0xf]  ;;  %v4571_v12 = vld [vmem:[%s5548_s0 + $0xf4] sm:$0xf0]  ;;  %v3818_v15 = vor.u32 %v4516_v6, %v3815_v7 }
  0x79   : > { %1018 = vmatpush.bf16.msra.mxu2 %v3858_v45  ;;  %v4034_v16 = vor.u32 %v4569_v8, %v4031_v9  ;;  %v4030_v17 = vor.u32 %v4571_v12, %v4029_v11  ;;  %v4565_v18 = vld [vmem:[%s5548_s0 + $0xcc] sm:$0xf]  ;;  %v4015_v19 = vld [vmem:[%s5548_s0 + $0xd8] sm:$0xf0]  ;;  %v4564_v21 = vld [vmem:[%s5548_s0 + $0xc4] sm:$0xf] }
  0x7a   : > { %969 = vmatpush.bf16.msra.mxu1 %v3854_v46  ;;  %v4018_v20 = vor.u32 %v4565_v18, %v4015_v19  ;;  %v4007_v22 = vld [vmem:[%s5548_s0 + $0xd0] sm:$0xf0]  ;;  %v4013_v24 = vld [vmem:[%s5548_s0 + $0xc8] sm:$0xf]  ;;  %v4567_v25 = vld [vmem:[%s5548_s0 + $0xd4] sm:$0xf0] }
  0x7b   : > { %921 = vmatpush.bf16.msra.mxu0 %v3838_v49  ;;  %v4010_v23 = vor.u32 %v4564_v21, %v4007_v22  ;;  %v4014_v26 = vor.u32 %v4567_v25, %v4013_v24  ;;  %v4561_v28 = vld [vmem:[%s5548_s0 + $0xac] sm:$0xf]  ;;  %v3999_v29 = vld [vmem:[%s5548_s0 + $0xb8] sm:$0xf0]  ;;  %v4560_v31 = vld [vmem:[%s5548_s0 + $0xa4] sm:$0xf] }
  0x7c   : > { %s5564_s14 = scalar_lea.vmem %s6672_s13, %s3773_s9  ;;  %v4002_v30 = vor.u32 %v4561_v28, %v3999_v29  ;;  %v3991_v32 = vld [vmem:[%s5548_s0 + $0xb0] sm:$0xf0]  ;;  %v3997_v34 = vld [vmem:[%s5548_s0 + $0xa8] sm:$0xf]  ;;  %v4563_v35 = vld [vmem:[%s5548_s0 + $0xb4] sm:$0xf0] }
  0x7d   : > { %1019 = vmatpush.bf16.msra.mxu2 %v3846_v54  ;;  %v4508_v14 = vld [vmem:[%s5564_s14] sm:$0xff]  ;;  %v4509_v27 = vld [vmem:[%s5564_s14 + $0x8] sm:$0xff]  ;;  %v3994_v33 = vor.u32 %v4560_v31, %v3991_v32  ;;  %v3998_v36 = vor.u32 %v4563_v35, %v3997_v34  ;;  %v4510_v37 = vld [vmem:[%s5564_s14 + $0x10] sm:$0xff]  ;;  %s6673_s12 = sld [smem:[#allocation46_spill]]  ;;  %s3776_s22 = sshll.u32 %s5543_s3, 3 }
  0x7e   : > { %970 = vmatpush.bf16.msra.mxu1 %v3842_v55  ;;  %v4557_v38 = vld [vmem:[%s5548_s0 + $0x8c] sm:$0xf]  ;;  %v3983_v39 = vld [vmem:[%s5548_s0 + $0x98] sm:$0xf0]  ;;  %v4556_v41 = vld [vmem:[%s5548_s0 + $0x84] sm:$0xf] }
  0x7f   : > { %922 = vmatpush.bf16.msra.mxu0 %v3826_v58  ;;  %v3986_v40 = vor.u32 %v4557_v38, %v3983_v39  ;;  %v3975_v42 = vld [vmem:[%s5548_s0 + $0x90] sm:$0xf0]  ;;  %v3981_v44 = vld [vmem:[%s5548_s0 + $0x88] sm:$0xf]  ;;  %v4559_v45 = vld [vmem:[%s5548_s0 + $0x94] sm:$0xf0] }
  0x80   : > { %v3978_v43 = vor.u32 %v4556_v41, %v3975_v42  ;;  %v3982_v46 = vor.u32 %v4559_v45, %v3981_v44  ;;  %v4511_v47 = vld [vmem:[%s5564_s14 + $0x18] sm:$0xff]  ;;  %v4553_v48 = vld [vmem:[%s5548_s0 + $0x6c] sm:$0xf]  ;;  %v4552_v51 = vld [vmem:[%s5548_s0 + $0x64] sm:$0xf]  ;;  %s6674_s9 = sld [smem:[#allocation41_spill]] }
  0x81   : > { %1020 = vmatpush.bf16.msra.mxu2 %v3834_v63  ;;  %v3967_v49 = vld [vmem:[%s5548_s0 + $0x78] sm:$0xf0]  ;;  %v3959_v52 = vld [vmem:[%s5548_s0 + $0x70] sm:$0xf0]  ;;  %v3965_v54 = vld [vmem:[%s5548_s0 + $0x68] sm:$0xf] }
  0x82   : > { %971 = vmatpush.bf16.msra.mxu1 %v3830_v2  ;;  %v3970_v50 = vor.u32 %v4553_v48, %v3967_v49  ;;  %v3962_v53 = vor.u32 %v4552_v51, %v3959_v52  ;;  %v4555_v55 = vld [vmem:[%s5548_s0 + $0x74] sm:$0xf0]  ;;  %v4512_v57 = vld [vmem:[%s5564_s14 + $0x20] sm:$0xff]  ;;  %v4549_v58 = vld [vmem:[%s5548_s0 + $0x4c] sm:$0xf]  ;;  %s6675_s13 = sld [smem:[#allocation48_spill]] }
  0x83   : > { %923 = vmatpush.bf16.msra.mxu0 %v3814_v5  ;;  %v3966_v56 = vor.u32 %v4555_v55, %v3965_v54  ;;  %v3951_v59 = vld [vmem:[%s5548_s0 + $0x58] sm:$0xf0]  ;;  %v4548_v61 = vld [vmem:[%s5548_s0 + $0x44] sm:$0xf]  ;;  %v3943_v62 = vld [vmem:[%s5548_s0 + $0x50] sm:$0xf0] }
  0x84   : > { %v3954_v60 = vor.u32 %v4549_v58, %v3951_v59  ;;  %v3946_v63 = vor.u32 %v4548_v61, %v3943_v62  ;;  %v3949_v0 = vld [vmem:[%s5548_s0 + $0x48] sm:$0xf]  ;;  %v4551_v1 = vld [vmem:[%s5548_s0 + $0x54] sm:$0xf0]  ;;  %v4021_v2 = vld [vmem:[%s5548_s0 + $0xe0] sm:$0xf] }
  0x85   : > { %1021 = vmatpush.bf16.msra.mxu2 %v3822_v13  ;;  %v3950_v3 = vor.u32 %v4551_v1, %v3949_v0  ;;  %v4570_v4 = vld [vmem:[%s5548_s0 + $0xec] sm:$0xf0]  ;;  %v4005_v5 = vld [vmem:[%s5548_s0 + $0xc0] sm:$0xf]  ;;  %v4513_v9 = vld [vmem:[%s5564_s14 + $0x28] sm:$0xff]  ;;  %s4501_s17 = sshll.u32 %s6670_s23, 5 }
  0x86   : > { %924 = vmatmul.bf16.vlgmr.msra.gmra.mxu0 %v4508_v14  ;;  %972 = vmatpush.bf16.msra.mxu1 %v3818_v15  ;;  %v4566_v6 = vld [vmem:[%s5548_s0 + $0xcc] sm:$0xf0]  ;;  %v4022_v7 = vor.u32 %v4570_v4, %v4021_v2  ;;  %v3935_v11 = vld [vmem:[%s5548_s0 + $0x38] sm:$0xf0]  ;;  %v3989_v12 = vld [vmem:[%s5548_s0 + $0xa0] sm:$0xf]  ;;  %s5912_s19 = scalar_lea.vmem %s6674_s9, %s3776_s22 }
  0x87   : > { %1320 = vmatpush.bf16.msrb.mxu0 %v4026_v10  ;;  %v4006_v8 = vor.u32 %v4566_v6, %v4005_v5  ;;  %v4545_v10 = vld [vmem:[%s5548_s0 + $0x2c] sm:$0xf]  ;;  %v3973_v15 = vld [vmem:[%s5548_s0 + $0x80] sm:$0xf]  ;;  %v4544_v18 = vld [vmem:[%s5548_s0 + $0x24] sm:$0xf] }
  0x88   : > { %1022 = vmatmul.bf16.vlgmr.msra.gmra.mxu2 %v4508_v14  ;;  %1271 = vmatpush.bf16.msra.mxu3 %v4022_v7  ;;  %v3938_v13 = vor.u32 %v4545_v10, %v3935_v11  ;;  %v3927_v19 = vld [vmem:[%s5548_s0 + $0x30] sm:$0xf0]  ;;  %v3933_v21 = vld [vmem:[%s5548_s0 + $0x28] sm:$0xf]  ;;  %v4547_v22 = vld [vmem:[%s5548_s0 + $0x34] sm:$0xf0] }
  0x89   : > { %1418 = vmatpush.bf16.msrb.mxu2 %v4034_v16  ;;  %973 = vmatmul.bf16.vlgmr.msra.gmra.mxu1 %v4508_v14  ;;  %v4562_v14 = vld [vmem:[%s5548_s0 + $0xac] sm:$0xf0]  ;;  %v3934_v24 = vor.u32 %v4547_v22, %v3933_v21  ;;  %v3957_v25 = vld [vmem:[%s5548_s0 + $0x60] sm:$0xf]  ;;  %v4541_v32 = vld [vmem:[%s5548_s0 + $0xc] sm:$0xf] }
  0x8a   : > { %1369 = vmatpush.bf16.msrb.mxu1 %v4030_v17  ;;  %v4558_v16 = vld [vmem:[%s5548_s0 + $0x8c] sm:$0xf0]  ;;  %v3990_v17 = vor.u32 %v4562_v14, %v3989_v12  ;;  %v3941_v29 = vld [vmem:[%s5548_s0 + $0x40] sm:$0xf]  ;;  %v3911_v42 = vld [vmem:[%s5548_s0 + $0x10] sm:$0xf0] }
  0x8b   : > { %1321 = vmatpush.bf16.msrb.mxu0 %v4010_v23  ;;  %v3974_v23 = vor.u32 %v4558_v16, %v3973_v15  ;;  %v4514_v28 = vld [vmem:[%s5564_s14 + $0x30] sm:$0xff]  ;;  %v3925_v34 = vld [vmem:[%s5548_s0 + $0x20] sm:$0xf]  ;;  %v4543_v44 = vld [vmem:[%s5548_s0 + $0x14] sm:$0xf0] }
  0x8c   : > { %1272 = vmatpush.bf16.msra.mxu3 %v4006_v8  ;;  %v3909_v38 = vld [vmem:[%s5548_s0] sm:$0xf]  ;;  %v4542_v39 = vld [vmem:[%s5548_s0 + $0xc] sm:$0xf0]  ;;  %v4579_v48 = vld [vmem:[%s6673_s12 + $0x38] sm:$0xff] }
  0x8d   : > { %1419 = vmatpush.bf16.msrb.mxu2 %v4018_v20  ;;  %v3930_v20 = vor.u32 %v4544_v18, %v3927_v19  ;;  %v3910_v41 = vor.u32 %v4542_v39, %v3909_v38  ;;  %v4587_v51 = vld [vmem:[%s6673_s12 + $0x78] sm:$0xff]  ;;  %v5648_v52 = vld [vmem:[%s5474_s4] sm:$0x7]  ;;  %v4602_v4 = vld [vmem:[%s6673_s12 + $0xf0] sm:$0xff] }
  0x8e   : > { %1370 = vmatpush.bf16.msrb.mxu1 %v4014_v26  ;;  %v4554_v26 = vld [vmem:[%s5548_s0 + $0x6c] sm:$0xf0]  ;;  %v4595_v54 = vld [vmem:[%s6673_s12 + $0xb8] sm:$0xff]  ;;  %v5656_v55 = vperm.slane %v5648_v52, 0  ;;  %v5661_v61 = vperm.slane %v5648_v52, 2  ;;  %v4577_v15 = vld [vmem:[%s6673_s12 + $0x28] sm:$0xff] }
  0x8f   : > { %1322 = vmatpush.bf16.msrb.mxu0 %v3994_v33  ;;  %v3919_v33 = vld [vmem:[%s5548_s0 + $0x18] sm:$0xf0]  ;;  %v4586_v5 = vld [vmem:[%s6673_s12 + $0x70] sm:$0xff]  ;;  %v4585_v21 = vld [vmem:[%s6673_s12 + $0x68] sm:$0xff] }
  0x90   : > { %1273 = vmatpush.bf16.msra.mxu3 %v3990_v17  ;;  %v3922_v35 = vor.u32 %v4541_v32, %v3919_v33  ;;  %v4594_v8 = vld [vmem:[%s6673_s12 + $0xb0] sm:$0xff] }
  0x91   : > { %1420 = vmatpush.bf16.msrb.mxu2 %v4002_v30  ;;  %v4550_v30 = vld [vmem:[%s5548_s0 + $0x4c] sm:$0xf0] }
  0x92   : > { %1371 = vmatpush.bf16.msrb.mxu1 %v3998_v36  ;;  %v3942_v31 = vor.u32 %v4550_v30, %v3941_v29  ;;  %v4546_v36 = vld [vmem:[%s5548_s0 + $0x2c] sm:$0xf0] }
  0x93   : > { %1323 = vmatpush.bf16.msrb.mxu0 %v3978_v43  ;;  %v3917_v43 = vld [vmem:[%s5548_s0 + $0x8] sm:$0xf] }
  0x94   : > { %1274 = vmatpush.bf16.msra.mxu3 %v3974_v23 }
  0x95   : > { %1421 = vmatpush.bf16.msrb.mxu2 %v3986_v40  ;;  %v4540_v40 = vld [vmem:[%s5548_s0 + $0x4] sm:$0xf] }
  0x96   : > { %929 = vmatmul.bf16.gmra.mxu0 %v4509_v27  ;;  %1372 = vmatpush.bf16.msrb.mxu1 %v3982_v46  ;;  %v3914_v45 = vor.u32 %v4540_v40, %v3911_v42  ;;  %v3918_v46 = vor.u32 %v4543_v44, %v3917_v43  ;;  %v4592_v40 = vld [vmem:[%s6673_s12 + $0xa0] sm:$0xff] }
  0x97   : > { %1324 = vmatpush.bf16.msrb.mxu0 %v3962_v53 }
  0x98   : > { %1027 = vmatmul.bf16.gmra.mxu2 %v4509_v27 }
  0x99   : > { %978 = vmatmul.bf16.gmra.mxu1 %v4509_v27  ;;  %1422 = vmatpush.bf16.msrb.mxu2 %v3970_v50  ;;  %v3958_v27 = vor.u32 %v4554_v26, %v3957_v25  ;;  %v4603_v50 = vld [vmem:[%s6673_s12 + $0xf8] sm:$0xff] }
  0x9a   : > { %1373 = vmatpush.bf16.msrb.mxu1 %v3966_v56 }
  0x9b   : > { %1325 = vmatpush.bf16.msrb.mxu0 %v3946_v63  ;;  %1275 = vmatpush.bf16.msra.mxu3 %v3958_v27  ;;  %v4578_v63 = vld [vmem:[%s6673_s12 + $0x30] sm:$0xff] }
  0x9d   : > { %1423 = vmatpush.bf16.msrb.mxu2 %v3954_v60 }
  0x9e   : > { %1374 = vmatpush.bf16.msrb.mxu1 %v3950_v3 }
  0x9f   : > { %1326 = vmatpush.bf16.msrb.mxu0 %v3930_v20  ;;  %1276 = vmatpush.bf16.msra.mxu3 %v3942_v31  ;;  %v4601_v20 = vld [vmem:[%s6673_s12 + $0xe8] sm:$0xff]  ;;  %v4576_v31 = vld [vmem:[%s6673_s12 + $0x20] sm:$0xff] }
  0xa1   : > { %1424 = vmatpush.bf16.msrb.mxu2 %v3938_v13 }
  0xa2   : > { %1375 = vmatpush.bf16.msrb.mxu1 %v3934_v24  ;;  %v4593_v24 = vld [vmem:[%s6673_s12 + $0xa8] sm:$0xff] }
  0xa3   : > { %1327 = vmatpush.bf16.msrb.mxu0 %v3914_v45 }
  0xa5   : > { %1425 = vmatpush.bf16.msrb.mxu2 %v3922_v35 }
  0xa6   : > { %934 = vmatmul.bf16.gmra.mxu0 %v4510_v37  ;;  %1376 = vmatpush.bf16.msrb.mxu1 %v3918_v46 }
  0xa7   : > { %1884 = vmatpush.bf16.msra.mxu0 %v4587_v51 }
  0xa8   : > { %1032 = vmatmul.bf16.gmra.mxu2 %v4510_v37 }
  0xa9   : > { %983 = vmatmul.bf16.gmra.mxu1 %v4510_v37  ;;  %v3926_v37 = vor.u32 %v4546_v36, %v3925_v34  ;;  %1982 = vmatpush.bf16.msra.mxu2 %v4603_v50  ;;  %v4600_v36 = vld [vmem:[%s6673_s12 + $0xe0] sm:$0xff] }
  0xaa   : > { %1933 = vmatpush.bf16.msra.mxu1 %v4595_v54  ;;  %v4599_v54 = vld [vmem:[%s6673_s12 + $0xd8] sm:$0xff] }
  0xab   : > { %1277 = vmatpush.bf16.msra.mxu3 %v3926_v37  ;;  %1885 = vmatpush.bf16.msra.mxu0 %v4586_v5  ;;  %v4584_v37 = vld [vmem:[%s6673_s12 + $0x60] sm:$0xff] }
  0xad   : > { %1983 = vmatpush.bf16.msra.mxu2 %v4602_v4  ;;  %v4574_v4 = vld [vmem:[%s6673_s12 + $0x10] sm:$0xff] }
  0xae   : > { %1934 = vmatpush.bf16.msra.mxu1 %v4594_v8 }
  0xaf   : > { %1278 = vmatpush.bf16.msra.mxu3 %v3910_v41  ;;  %1886 = vmatpush.bf16.msra.mxu0 %v4585_v21  ;;  %v4597_v21 = vld [vmem:[%s6673_s12 + $0xc8] sm:$0xff] }
  0xb1   : > { %1984 = vmatpush.bf16.msra.mxu2 %v4601_v20  ;;  %v4573_v20 = vld [vmem:[%s6673_s12 + $0x8] sm:$0xff] }
  0xb2   : > { %1935 = vmatpush.bf16.msra.mxu1 %v4593_v24  ;;  %v4581_v24 = vld [vmem:[%s6673_s12 + $0x48] sm:$0xff] }
  0xb3   : > { %1835 = vmatpush.bf16.msrb.mxu3 %v4579_v48  ;;  %1887 = vmatpush.bf16.msra.mxu0 %v4584_v37 }
  0xb5   : > { %1985 = vmatpush.bf16.msra.mxu2 %v4600_v36 }
  0xb6   : > { %939 = vmatmul.bf16.gmra.mxu0 %v4511_v47  ;;  %1936 = vmatpush.bf16.msra.mxu1 %v4592_v40  ;;  %v4580_v40 = vld [vmem:[%s6673_s12 + $0x40] sm:$0xff] }
  0xb7   : > { %1836 = vmatpush.bf16.msrb.mxu3 %v4578_v63 }
  0xb8   : > { %1037 = vmatmul.bf16.gmra.mxu2 %v4511_v47 }
  0xb9   : > { %988 = vmatmul.bf16.gmra.mxu1 %v4511_v47  ;;  %v4515_v47 = vld [vmem:[%s5564_s14 + $0x38] sm:$0xff]  ;;  %1986 = vmatpush.bf16.msra.mxu2 %v4599_v54 }
  0xbb   : > { %1837 = vmatpush.bf16.msrb.mxu3 %v4577_v15 }
  0xbf   : > { %1838 = vmatpush.bf16.msrb.mxu3 %v4576_v31 }
  0xc6   : > { %944 = vmatmul.bf16.gmra.mxu0 %v4512_v57 }
  0xc8   : > { %1042 = vmatmul.bf16.gmra.mxu2 %v4512_v57 }
  0xc9   : > { %993 = vmatmul.bf16.gmra.mxu1 %v4512_v57 }
  0xd6   : > { %949 = vmatmul.bf16.gmra.mxu0 %v4513_v9 }
  0xd8   : > { %1047 = vmatmul.bf16.gmra.mxu2 %v4513_v9 }
  0xd9   : > { %998 = vmatmul.bf16.gmra.mxu1 %v4513_v9 }
  0xe6   : > { %954 = vmatmul.bf16.gmra.mxu0 %v4514_v28 }
  0xe8   : > { %1052 = vmatmul.bf16.gmra.mxu2 %v4514_v28 }
  0xe9   : > { %1003 = vmatmul.bf16.gmra.mxu1 %v4514_v28 }
  0xf6   : > { %959 = vmatmul.bf16.gmra.mxu0 %v4515_v47 }
  0xf8   : > { %1057 = vmatmul.bf16.gmra.mxu2 %v4515_v47 }
  0xf9   : > { %1008 = vmatmul.bf16.gmra.mxu1 %v4515_v47  ;;  %v4575_v47 = vld [vmem:[%s6673_s12 + $0x18] sm:$0xff] }
  0xfa   : > { %1839 = vmatpush.bf16.msrb.mxu3 %v4575_v47 }
  0xfe   : > { %1840 = vmatpush.bf16.msrb.mxu3 %v4574_v4 }
 0x102   : > { %1841 = vmatpush.bf16.msrb.mxu3 %v4573_v20 }
 0x103   : > { %v925_v49 = vpop.f32.mrf.mxu0 }
 0x104   : > { %v926_v58 = vadd.f32 %v925_v49, %v5656_v55 }
 0x106   : > { %v5650_v53 = vpop.f32.mrf.mxu1 }
 0x10b   : > { %v927_v56 = vpop.f32.mrf.mxu0  ;;  %v1023_v57 = vpop.f32.mrf.mxu2 }
 0x10c   : > { %v928_v59 = vadd.f32 %v927_v56, %v5656_v55  ;;  %v1024_v0 = vadd.f32 %v1023_v57, %v5661_v61  ;;  %v4583_v56 = vld [vmem:[%s6673_s12 + $0x58] sm:$0xff] }
 0x10d   : > { %1888 = vmatpush.bf16.msra.mxu0 %v4583_v56 }
 0x10e   : > { %v1063_v60 = vpack.c.bf16 %v928_v59, %v926_v58  ;;  %v5663_v62 = vpop.f32.mrf.mxu1  ;;  %v4591_v59 = vld [vmem:[%s6673_s12 + $0x98] sm:$0xff] }
 0x10f   : > { %1937 = vmatpush.bf16.msra.mxu1 %v4591_v59 }
 0x110   : > { %1279 = vmatmul.bf16.vlgmr.msra.gmra.mxu3 %v1063_v60  ;;  %1328 = vmatmul.bf16.vlgmr.msrb.gmra.mxu0 %v1063_v60 }
 0x111   : > { %1377 = vmatmul.bf16.vlgmr.msrb.gmra.mxu1 %v1063_v60  ;;  %1426 = vmatmul.bf16.vlgmr.msrb.gmra.mxu2 %v1063_v60 }
 0x113   : > { %v930_v1 = vpop.f32.mrf.mxu0  ;;  %v1025_v2 = vpop.f32.mrf.mxu2 }
 0x114   : > { %v1026_v3 = vadd.f32 %v1025_v2, %v5661_v61  ;;  %v931_v11 = vadd.f32 %v930_v1, %v5656_v55 }
 0x116   : > { %v5676_v6 = vpack.c.bf16 %v1026_v3, %v1024_v0  ;;  %v5678_v7 = vpop.f32.mrf.mxu1 }
 0x11b   : > { %v932_v9 = vpop.f32.mrf.mxu0  ;;  %v1028_v10 = vpop.f32.mrf.mxu2 }
 0x11c   : > { %v933_v12 = vadd.f32 %v932_v9, %v5656_v55  ;;  %v1029_v16 = vadd.f32 %v1028_v10, %v5661_v61  ;;  %v4598_v9 = vld [vmem:[%s6673_s12 + $0xd0] sm:$0xff] }
 0x11d   : > { %v4582_v10 = vld [vmem:[%s6673_s12 + $0x50] sm:$0xff]  ;;  %1987 = vmatpush.bf16.msra.mxu2 %v4598_v9 }
 0x11e   : > { %v1064_v13 = vpack.c.bf16 %v933_v12, %v931_v11  ;;  %v5685_v14 = vpop.f32.mrf.mxu1  ;;  %1889 = vmatpush.bf16.msra.mxu0 %v4582_v10  ;;  %v4590_v12 = vld [vmem:[%s6673_s12 + $0x90] sm:$0xff] }
 0x11f   : > { %1938 = vmatpush.bf16.msra.mxu1 %v4590_v12 }
 0x120   : > { %1284 = vmatmul.bf16.gmra.mxu3 %v1064_v13  ;;  %1333 = vmatmul.bf16.gmra.mxu0 %v1064_v13 }
 0x121   : > { %1382 = vmatmul.bf16.gmra.mxu1 %v1064_v13  ;;  %1431 = vmatmul.bf16.gmra.mxu2 %v1064_v13 }
 0x122   : > { %1988 = vmatpush.bf16.msra.mxu2 %v4597_v21  ;;  %1890 = vmatpush.bf16.msra.mxu0 %v4581_v24 }
 0x123   : > { %v935_v17 = vpop.f32.mrf.mxu0  ;;  %v1030_v18 = vpop.f32.mrf.mxu2 }
 0x124   : > { %v1031_v19 = vadd.f32 %v1030_v18, %v5661_v61  ;;  %v936_v27 = vadd.f32 %v935_v17, %v5656_v55 }
 0x126   : > { %v5698_v22 = vpack.c.bf16 %v1031_v19, %v1029_v16  ;;  %v5700_v23 = vpop.f32.mrf.mxu1  ;;  %1891 = vmatpush.bf16.msra.mxu0 %v4580_v40 }
 0x12b   : > { %v937_v25 = vpop.f32.mrf.mxu0  ;;  %v1033_v26 = vpop.f32.mrf.mxu2 }
 0x12c   : > { %v938_v28 = vadd.f32 %v937_v25, %v5656_v55  ;;  %v1034_v32 = vadd.f32 %v1033_v26, %v5661_v61 }
 0x12e   : > { %v1065_v29 = vpack.c.bf16 %v938_v28, %v936_v27  ;;  %v5707_v30 = vpop.f32.mrf.mxu1  ;;  %v4589_v28 = vld [vmem:[%s6673_s12 + $0x88] sm:$0xff] }
 0x12f   : > { %1939 = vmatpush.bf16.msra.mxu1 %v4589_v28 }
 0x130   : > { %1289 = vmatmul.bf16.gmra.mxu3 %v1065_v29  ;;  %1338 = vmatmul.bf16.gmra.mxu0 %v1065_v29 }
 0x131   : > { %1387 = vmatmul.bf16.gmra.mxu1 %v1065_v29  ;;  %1436 = vmatmul.bf16.gmra.mxu2 %v1065_v29 }
 0x133   : > { %v940_v33 = vpop.f32.mrf.mxu0  ;;  %v1035_v34 = vpop.f32.mrf.mxu2 }
 0x134   : > { %v1036_v35 = vadd.f32 %v1035_v34, %v5661_v61  ;;  %v941_v43 = vadd.f32 %v940_v33, %v5656_v55 }
 0x136   : > { %v5720_v38 = vpack.c.bf16 %v1036_v35, %v1034_v32  ;;  %v5722_v39 = vpop.f32.mrf.mxu1  ;;  %v4572_v35 = vld [vmem:[%s6673_s12] sm:$0xff] }
 0x137   : > { %1842 = vmatpush.bf16.msrb.mxu3 %v4572_v35 }
 0x13b   : > { %v942_v41 = vpop.f32.mrf.mxu0  ;;  %v1038_v42 = vpop.f32.mrf.mxu2 }
 0x13c   : > { %v943_v44 = vadd.f32 %v942_v41, %v5656_v55  ;;  %v1039_v48 = vadd.f32 %v1038_v42, %v5661_v61  ;;  %v4588_v41 = vld [vmem:[%s6673_s12 + $0x80] sm:$0xff] }
 0x13d   : > { %1940 = vmatpush.bf16.msra.mxu1 %v4588_v41 }
 0x13e   : > { %v1066_v45 = vpack.c.bf16 %v943_v44, %v941_v43  ;;  %v5729_v46 = vpop.f32.mrf.mxu1  ;;  %v4596_v43 = vld [vmem:[%s6673_s12 + $0xc0] sm:$0xff] }
 0x13f   : > { %1989 = vmatpush.bf16.msra.mxu2 %v4596_v43 }
 0x140   : > { %1294 = vmatmul.bf16.gmra.mxu3 %v1066_v45  ;;  %1343 = vmatmul.bf16.gmra.mxu0 %v1066_v45 }
 0x141   : > { %1392 = vmatmul.bf16.gmra.mxu1 %v1066_v45  ;;  %1441 = vmatmul.bf16.gmra.mxu2 %v1066_v45 }
 0x143   : > { %v945_v49 = vpop.f32.mrf.mxu0  ;;  %v1040_v50 = vpop.f32.mrf.mxu2 }
 0x144   : > { %v1041_v51 = vadd.f32 %v1040_v50, %v5661_v61  ;;  %v946_v0 = vadd.f32 %v945_v49, %v5656_v55 }
 0x146   : > { %v5742_v57 = vpack.c.bf16 %v1041_v51, %v1039_v48  ;;  %v5744_v58 = vpop.f32.mrf.mxu1 }
 0x14b   : > { %v947_v60 = vpop.f32.mrf.mxu0  ;;  %v5749_v63 = vpop.f32.mrf.mxu2 }
 0x14c   : > { %v948_v1 = vadd.f32 %v947_v60, %v5656_v55  ;;  %v5824_v60 = vperm.slane %v5648_v52, 1 }
 0x14e   : > { %v1067_v2 = vpack.c.bf16 %v948_v1, %v946_v0  ;;  %v5753_v3 = vpop.f32.mrf.mxu1  ;;  %v977_v1 = vadd.f32 %v5663_v62, %v5824_v60 }
 0x150   : > { %1299 = vmatmul.bf16.gmra.mxu3 %v1067_v2  ;;  %1348 = vmatmul.bf16.gmra.mxu0 %v1067_v2 }
 0x151   : > { %1397 = vmatmul.bf16.gmra.mxu1 %v1067_v2  ;;  %1446 = vmatmul.bf16.gmra.mxu2 %v1067_v2 }
 0x153   : > { %v950_v5 = vpop.f32.mrf.mxu0  ;;  %v5758_v8 = vpop.f32.mrf.mxu2 }
 0x154   : > { %v951_v16 = vadd.f32 %v950_v5, %v5656_v55 }
 0x156   : > { %v5766_v11 = vpop.f32.mrf.mxu1 }
 0x15b   : > { %v952_v13 = vpop.f32.mrf.mxu0  ;;  %v5771_v15 = vpop.f32.mrf.mxu2 }
 0x15c   : > { %v953_v17 = vadd.f32 %v952_v13, %v5656_v55 }
 0x15e   : > { %v1068_v18 = vpack.c.bf16 %v953_v17, %v951_v16  ;;  %v5775_v19 = vpop.f32.mrf.mxu1 }
 0x160   : > { %1304 = vmatmul.bf16.gmra.mxu3 %v1068_v18  ;;  %1353 = vmatmul.bf16.gmra.mxu0 %v1068_v18 }
 0x161   : > { %1402 = vmatmul.bf16.gmra.mxu1 %v1068_v18  ;;  %1451 = vmatmul.bf16.gmra.mxu2 %v1068_v18 }
 0x163   : > { %v955_v25 = vpop.f32.mrf.mxu0  ;;  %v5786_v26 = vpop.f32.mrf.mxu2 }
 0x164   : > { %v956_v31 = vadd.f32 %v955_v25, %v5656_v55 }
 0x166   : > { %v5788_v27 = vpop.f32.mrf.mxu1 }
 0x16b   : > { %v957_v29 = vpop.f32.mrf.mxu0  ;;  %v5795_v34 = vpop.f32.mrf.mxu2 }
 0x16c   : > { %v958_v32 = vadd.f32 %v957_v29, %v5656_v55 }
 0x16e   : > { %v1069_v33 = vpack.c.bf16 %v958_v32, %v956_v31  ;;  %v5800_v36 = vpop.f32.mrf.mxu1  ;;  %v980_v32 = vadd.f32 %v5678_v7, %v5824_v60 }
 0x170   : > { %1309 = vmatmul.bf16.gmra.mxu3 %v1069_v33  ;;  %1358 = vmatmul.bf16.gmra.mxu0 %v1069_v33 }
 0x171   : > { %1407 = vmatmul.bf16.gmra.mxu1 %v1069_v33  ;;  %1456 = vmatmul.bf16.gmra.mxu2 %v1069_v33  ;;  %v982_v33 = vadd.f32 %v5685_v14, %v5824_v60 }
 0x173   : > { %v960_v37 = vpop.f32.mrf.mxu0  ;;  %v5808_v42 = vpop.f32.mrf.mxu2 }
 0x174   : > { %v961_v47 = vadd.f32 %v960_v37, %v5656_v55 }
 0x176   : > { %v5813_v44 = vpop.f32.mrf.mxu1 }
 0x17b   : > { %v962_v45 = vpop.f32.mrf.mxu0  ;;  %v5817_v50 = vpop.f32.mrf.mxu2 }
 0x17c   : > { %v963_v48 = vadd.f32 %v962_v45, %v5656_v55  ;;  %v975_v55 = vadd.f32 %v5650_v53, %v5824_v60 }
 0x17e   : > { %v1070_v49 = vpack.c.bf16 %v963_v48, %v961_v47  ;;  %v5819_v51 = vpop.f32.mrf.mxu1 }
 0x180   : > { %1314 = vmatmul.bf16.gmra.mxu3 %v1070_v49  ;;  %1363 = vmatmul.bf16.gmra.mxu0 %v1070_v49 }
 0x181   : > { %1412 = vmatmul.bf16.gmra.mxu1 %v1070_v49  ;;  %1461 = vmatmul.bf16.gmra.mxu2 %v1070_v49 }
 0x183   : > { %v5821_v54 = vpop.f32.mrf.mxu2 }
 0x18d   : > { %v1329_v56 = vpop.f32.mrf.mxu0 }
 0x18e   : > { %v1378_v59 = vpop.f32.mrf.mxu1  ;;  %v1468_v5 = vmul.f32 %v1329_v56, %v975_v55 }
 0x18f   : > { %v1469_v12 = vmul.f32 %v1378_v59, %v975_v55 }
 0x193   : > { %v1280_v0 = vpop.f32.mrf.mxu3 }
 0x194   : > { %v1427_v2 = vpop.f32.mrf.mxu2  ;;  %v1467_v18 = vmul.f32 %v1280_v0, %v975_v55 }
 0x195   : > { %v1331_v4 = vpop.f32.mrf.mxu0  ;;  %v1470_v24 = vmul.f32 %v1427_v2, %v975_v55 }
 0x196   : > { %v1472_v9 = vmul.f32 %v1331_v4, %v977_v1  ;;  %v1380_v10 = vpop.f32.mrf.mxu1 }
 0x197   : > { %v1473_v13 = vmul.f32 %v1380_v10, %v977_v1  ;;  %v985_v10 = vadd.f32 %v5700_v23, %v5824_v60 }
 0x198   : > { %v1532_v16 = vpack.c.bf16 %v1472_v9, %v1468_v5 }
 0x199   : > { %v1533_v17 = vpack.c.bf16 %v1473_v13, %v1469_v12  ;;  %v987_v12 = vadd.f32 %v5707_v30, %v5824_v60 }
 0x19a   : > { %1892 = vmatmul.bf16.vlgmr.msra.gmra.mxu0 %v1532_v16 }
 0x19b   : > { %1941 = vmatmul.bf16.vlgmr.msra.gmra.mxu1 %v1533_v17  ;;  %v1282_v52 = vpop.f32.mrf.mxu3 }
 0x19c   : > { %v1471_v20 = vmul.f32 %v1282_v52, %v977_v1  ;;  %v1429_v21 = vpop.f32.mrf.mxu2 }
 0x19d   : > { %v1474_v53 = vmul.f32 %v1429_v21, %v977_v1  ;;  %v1334_v25 = vpop.f32.mrf.mxu0 }
 0x19e   : > { %v1531_v28 = vpack.c.bf16 %v1471_v20, %v1467_v18  ;;  %v1383_v62 = vpop.f32.mrf.mxu1  ;;  %v1476_v40 = vmul.f32 %v1334_v25, %v980_v32 }
 0x19f   : > { %v1534_v29 = vpack.c.bf16 %v1474_v53, %v1470_v24  ;;  %v1477_v45 = vmul.f32 %v1383_v62, %v980_v32 }
 0x1a0   : > { %1843 = vmatmul.bf16.vlgmr.msrb.gmra.mxu3 %v1531_v28 }
 0x1a1   : > { %1990 = vmatmul.bf16.vlgmr.msra.gmra.mxu2 %v1534_v29 }
 0x1a3   : > { %v1285_v31 = vpop.f32.mrf.mxu3 }
 0x1a4   : > { %v1432_v35 = vpop.f32.mrf.mxu2  ;;  %v1475_v59 = vmul.f32 %v1285_v31, %v980_v32 }
 0x1a5   : > { %v1336_v37 = vpop.f32.mrf.mxu0  ;;  %v1478_v1 = vmul.f32 %v1432_v35, %v980_v32 }
 0x1a6   : > { %v1480_v41 = vmul.f32 %v1336_v37, %v982_v33  ;;  %v1385_v43 = vpop.f32.mrf.mxu1 }
 0x1a7   : > { %v1481_v47 = vmul.f32 %v1385_v43, %v982_v33 }
 0x1a8   : > { %v1536_v48 = vpack.c.bf16 %v1480_v41, %v1476_v40  ;;  %v990_v40 = vadd.f32 %v5722_v39, %v5824_v60  ;;  %v992_v41 = vadd.f32 %v5729_v46, %v5824_v60 }
 0x1a9   : > { %v1537_v49 = vpack.c.bf16 %v1481_v47, %v1477_v45 }
 0x1aa   : > { %1897 = vmatmul.bf16.gmra.mxu0 %v1536_v48 }
 0x1ab   : > { %1946 = vmatmul.bf16.gmra.mxu1 %v1537_v49  ;;  %v1287_v56 = vpop.f32.mrf.mxu3 }
 0x1ac   : > { %v1479_v0 = vmul.f32 %v1287_v56, %v982_v33  ;;  %v1434_v55 = vpop.f32.mrf.mxu2 }
 0x1ad   : > { %v1482_v7 = vmul.f32 %v1434_v55, %v982_v33  ;;  %v1339_v2 = vpop.f32.mrf.mxu0 }
 0x1ae   : > { %v1388_v4 = vpop.f32.mrf.mxu1  ;;  %v1535_v14 = vpack.c.bf16 %v1479_v0, %v1475_v59  ;;  %v1484_v17 = vmul.f32 %v1339_v2, %v985_v10 }
 0x1af   : > { %v1538_v5 = vpack.c.bf16 %v1482_v7, %v1478_v1  ;;  %v1485_v20 = vmul.f32 %v1388_v4, %v985_v10 }
 0x1b0   : > { %1848 = vmatmul.bf16.gmra.mxu3 %v1535_v14 }
 0x1b1   : > { %1995 = vmatmul.bf16.gmra.mxu2 %v1538_v5 }
 0x1b3   : > { %v1290_v9 = vpop.f32.mrf.mxu3 }
 0x1b4   : > { %v1437_v13 = vpop.f32.mrf.mxu2  ;;  %v1483_v28 = vmul.f32 %v1290_v9, %v985_v10 }
 0x1b5   : > { %v1341_v16 = vpop.f32.mrf.mxu0  ;;  %v1486_v31 = vmul.f32 %v1437_v13, %v985_v10  ;;  %v995_v13 = vadd.f32 %v5744_v58, %v5824_v60 }
 0x1b6   : > { %v1488_v52 = vmul.f32 %v1341_v16, %v987_v12  ;;  %v1390_v18 = vpop.f32.mrf.mxu1  ;;  %v997_v16 = vadd.f32 %v5753_v3, %v5824_v60 }
 0x1b7   : > { %v1489_v21 = vmul.f32 %v1390_v18, %v987_v12 }
 0x1b8   : > { %v1540_v24 = vpack.c.bf16 %v1488_v52, %v1484_v17 }
 0x1b9   : > { %v1541_v53 = vpack.c.bf16 %v1489_v21, %v1485_v20 }
 0x1ba   : > { %1902 = vmatmul.bf16.gmra.mxu0 %v1540_v24 }
 0x1bb   : > { %1951 = vmatmul.bf16.gmra.mxu1 %v1541_v53  ;;  %v1292_v25 = vpop.f32.mrf.mxu3 }
 0x1bc   : > { %v1487_v62 = vmul.f32 %v1292_v25, %v987_v12  ;;  %v1439_v29 = vpop.f32.mrf.mxu2 }
 0x1bd   : > { %v1490_v23 = vmul.f32 %v1439_v29, %v987_v12  ;;  %v1344_v32 = vpop.f32.mrf.mxu0  ;;  %v4634_v29 = vld [vmem:[%s5481_s11 + $0xec] sm:$0xf0] }
 0x1be   : > { %v1393_v33 = vpop.f32.mrf.mxu1  ;;  %v1539_v30 = vpack.c.bf16 %v1487_v62, %v1483_v28  ;;  %v1492_v47 = vmul.f32 %v1344_v32, %v990_v40  ;;  %v4293_v62 = vld [vmem:[%s5481_s11 + $0xe0] sm:$0xf] }
 0x1bf   : > { %v1542_v35 = vpack.c.bf16 %v1490_v23, %v1486_v31  ;;  %v1493_v56 = vmul.f32 %v1393_v33, %v990_v40  ;;  %v4632_v31 = vld [vmem:[%s5481_s11 + $0xe4] sm:$0xf]  ;;  %v4294_v58 = vor.u32 %v4634_v29, %v4293_v62  ;;  %v4295_v23 = vld [vmem:[%s5481_s11 + $0xf0] sm:$0xf0] }
 0x1c0   : > { %1853 = vmatmul.bf16.gmra.mxu3 %v1539_v30  ;;  %v4298_v32 = vor.u32 %v4632_v31, %v4295_v23  ;;  %v4247_v29 = vld [vmem:[%s5481_s11 + $0x90] sm:$0xf0]  ;;  %v4269_v23 = vld [vmem:[%s5481_s11 + $0xa8] sm:$0xf] }
 0x1c1   : > { %2000 = vmatmul.bf16.gmra.mxu2 %v1542_v35  ;;  %2469 = vmatpush.bf16.msrb.mxu0 %v4294_v58 }
 0x1c2   : > { %2518 = vmatpush.bf16.msrb.mxu1 %v4298_v32 }
 0x1c3   : > { %v1295_v37 = vpop.f32.mrf.mxu3 }
 0x1c4   : > { %v1442_v43 = vpop.f32.mrf.mxu2  ;;  %v1491_v7 = vmul.f32 %v1295_v37, %v990_v40 }
 0x1c5   : > { %v1346_v45 = vpop.f32.mrf.mxu0  ;;  %v1494_v14 = vmul.f32 %v1442_v43, %v990_v40  ;;  %v4277_v43 = vld [vmem:[%s5481_s11 + $0xc0] sm:$0xf] }
 0x1c6   : > { %v1496_v48 = vmul.f32 %v1346_v45, %v992_v41  ;;  %v1395_v49 = vpop.f32.mrf.mxu1  ;;  %v4630_v45 = vld [vmem:[%s5481_s11 + $0xcc] sm:$0xf0] }
 0x1c7   : > { %v1497_v59 = vmul.f32 %v1395_v49, %v992_v41 }
 0x1c8   : > { %v1544_v0 = vpack.c.bf16 %v1496_v48, %v1492_v47  ;;  %v4628_v47 = vld [vmem:[%s5481_s11 + $0xc4] sm:$0xf] }
 0x1c9   : > { %v1545_v55 = vpack.c.bf16 %v1497_v59, %v1493_v56  ;;  %v4278_v56 = vor.u32 %v4630_v45, %v4277_v43  ;;  %v4279_v59 = vld [vmem:[%s5481_s11 + $0xd0] sm:$0xf0] }
 0x1ca   : > { %1907 = vmatmul.bf16.gmra.mxu0 %v1544_v0  ;;  %v4231_v43 = vld [vmem:[%s5481_s11 + $0x70] sm:$0xf0] }
 0x1cb   : > { %1956 = vmatmul.bf16.gmra.mxu1 %v1545_v55  ;;  %v1297_v1 = vpop.f32.mrf.mxu3  ;;  %v4282_v55 = vor.u32 %v4628_v47, %v4279_v59  ;;  %2470 = vmatpush.bf16.msrb.mxu0 %v4278_v56 }
 0x1cc   : > { %v1495_v2 = vmul.f32 %v1297_v1, %v992_v41  ;;  %v1444_v4 = vpop.f32.mrf.mxu2  ;;  %v4301_v1 = vld [vmem:[%s5481_s11 + $0xe8] sm:$0xf] }
 0x1cd   : > { %v1498_v39 = vmul.f32 %v1444_v4, %v992_v41  ;;  %v1349_v5 = vpop.f32.mrf.mxu0  ;;  %2519 = vmatpush.bf16.msrb.mxu1 %v4282_v55  ;;  %v4261_v4 = vld [vmem:[%s5481_s11 + $0xa0] sm:$0xf] }
 0x1ce   : > { %v1398_v9 = vpop.f32.mrf.mxu1  ;;  %v1543_v46 = vpack.c.bf16 %v1495_v2, %v1491_v7  ;;  %v1500_v18 = vmul.f32 %v1349_v5, %v995_v13  ;;  %v4635_v7 = vld [vmem:[%s5481_s11 + $0xf4] sm:$0xf0] }
 0x1cf   : > { %v1546_v10 = vpack.c.bf16 %v1498_v39, %v1494_v14  ;;  %v1501_v24 = vmul.f32 %v1398_v9, %v995_v13  ;;  %v4302_v2 = vor.u32 %v4635_v7, %v4301_v1  ;;  %v4626_v14 = vld [vmem:[%s5481_s11 + $0xac] sm:$0xf0]  ;;  %v4624_v39 = vld [vmem:[%s5481_s11 + $0xa4] sm:$0xf]  ;;  %v4263_v9 = vld [vmem:[%s5481_s11 + $0xb0] sm:$0xf0] }
 0x1d0   : > { %1858 = vmatmul.bf16.gmra.mxu3 %v1543_v46  ;;  %v4262_v5 = vor.u32 %v4626_v14, %v4261_v4  ;;  %v4213_v4 = vld [vmem:[%s5481_s11 + $0x40] sm:$0xf]  ;;  %v4614_v14 = vld [vmem:[%s5481_s11 + $0x4c] sm:$0xf0] }
 0x1d1   : > { %2005 = vmatmul.bf16.gmra.mxu2 %v1546_v10  ;;  %v4266_v10 = vor.u32 %v4624_v39, %v4263_v9  ;;  %v4612_v39 = vld [vmem:[%s5481_s11 + $0x44] sm:$0xf] }
 0x1d2   : > { %2567 = vmatpush.bf16.msrb.mxu2 %v4302_v2  ;;  %2471 = vmatpush.bf16.msrb.mxu0 %v4262_v5 }
 0x1d3   : > { %v1300_v12 = vpop.f32.mrf.mxu3  ;;  %2520 = vmatpush.bf16.msrb.mxu1 %v4266_v10  ;;  %v4215_v10 = vld [vmem:[%s5481_s11 + $0x50] sm:$0xf0] }
 0x1d4   : > { %v1447_v17 = vpop.f32.mrf.mxu2  ;;  %v1499_v33 = vmul.f32 %v1300_v12, %v995_v13  ;;  %v4285_v12 = vld [vmem:[%s5481_s11 + $0xc8] sm:$0xf] }
 0x1d5   : > { %v1351_v52 = vpop.f32.mrf.mxu0  ;;  %v1502_v37 = vmul.f32 %v1447_v17, %v995_v13  ;;  %v4631_v13 = vld [vmem:[%s5481_s11 + $0xd4] sm:$0xf0]  ;;  %v1002_v17 = vadd.f32 %v5775_v19, %v5824_v60 }
 0x1d6   : > { %v1504_v20 = vmul.f32 %v1351_v52, %v997_v16  ;;  %v1400_v21 = vpop.f32.mrf.mxu1 }
 0x1d7   : > { %v1505_v53 = vmul.f32 %v1400_v21, %v997_v16  ;;  %v4245_v21 = vld [vmem:[%s5481_s11 + $0x80] sm:$0xf] }
 0x1d8   : > { %v1548_v25 = vpack.c.bf16 %v1504_v20, %v1500_v18  ;;  %v4286_v18 = vor.u32 %v4631_v13, %v4285_v12  ;;  %v4218_v13 = vor.u32 %v4612_v39, %v4215_v10 }
 0x1d9   : > { %v1549_v28 = vpack.c.bf16 %v1505_v53, %v1501_v24  ;;  %v4622_v24 = vld [vmem:[%s5481_s11 + $0x8c] sm:$0xf0]  ;;  %v4620_v53 = vld [vmem:[%s5481_s11 + $0x84] sm:$0xf] }
 0x1da   : > { %1912 = vmatmul.bf16.gmra.mxu0 %v1548_v25  ;;  %2568 = vmatpush.bf16.msrb.mxu2 %v4286_v18  ;;  %v4250_v58 = vor.u32 %v4620_v53, %v4247_v29  ;;  %v4197_v18 = vld [vmem:[%s5481_s11 + $0x20] sm:$0xf]  ;;  %v4199_v53 = vld [vmem:[%s5481_s11 + $0x30] sm:$0xf0] }
 0x1db   : > { %1961 = vmatmul.bf16.gmra.mxu1 %v1549_v28  ;;  %v1302_v3 = vpop.f32.mrf.mxu3 }
 0x1dc   : > { %v1503_v30 = vmul.f32 %v1302_v3, %v997_v16  ;;  %v1449_v35 = vpop.f32.mrf.mxu2  ;;  %v4627_v3 = vld [vmem:[%s5481_s11 + $0xb4] sm:$0xf0]  ;;  %2521 = vmatpush.bf16.msrb.mxu1 %v4250_v58 }
 0x1dd   : > { %v1506_v40 = vmul.f32 %v1449_v35, %v997_v16  ;;  %v1354_v41 = vpop.f32.mrf.mxu0  ;;  %v1000_v16 = vadd.f32 %v5766_v11, %v5824_v60  ;;  %v4246_v11 = vor.u32 %v4622_v24, %v4245_v21  ;;  %v4229_v35 = vld [vmem:[%s5481_s11 + $0x60] sm:$0xf]  ;;  %v4608_v21 = vld [vmem:[%s5481_s11 + $0x24] sm:$0xf] }
 0x1de   : > { %v1547_v48 = vpack.c.bf16 %v1503_v30, %v1499_v33  ;;  %v1403_v49 = vpop.f32.mrf.mxu1  ;;  %v4270_v33 = vor.u32 %v4627_v3, %v4269_v23  ;;  %v4181_v3 = vld [vmem:[%s5481_s11] sm:$0xf] }
 0x1df   : > { %v1550_v0 = vpack.c.bf16 %v1506_v40, %v1502_v37  ;;  %v1508_v25 = vmul.f32 %v1354_v41, %v1000_v16  ;;  %v1509_v19 = vmul.f32 %v1403_v49, %v1000_v16  ;;  %2472 = vmatpush.bf16.msrb.mxu0 %v4246_v11  ;;  %v4618_v37 = vld [vmem:[%s5481_s11 + $0x6c] sm:$0xf0]  ;;  %v4616_v40 = vld [vmem:[%s5481_s11 + $0x64] sm:$0xf]  ;;  %v4623_v49 = vld [vmem:[%s5481_s11 + $0x94] sm:$0xf0]  ;;  %v4202_v11 = vor.u32 %v4608_v21, %v4199_v53 }
 0x1e0   : > { %1863 = vmatmul.bf16.gmra.mxu3 %v1547_v48  ;;  %2569 = vmatpush.bf16.msrb.mxu2 %v4270_v33  ;;  %v4230_v41 = vor.u32 %v4618_v37, %v4229_v35  ;;  %v4234_v47 = vor.u32 %v4616_v40, %v4231_v43  ;;  %v4253_v48 = vld [vmem:[%s5481_s11 + $0x88] sm:$0xf]  ;;  %v4604_v33 = vld [vmem:[%s5481_s11 + $0x4] sm:$0xf] }
 0x1e1   : > { %2010 = vmatmul.bf16.gmra.mxu2 %v1550_v0  ;;  %v4254_v55 = vor.u32 %v4623_v49, %v4253_v48 }
 0x1e2   : > { %2522 = vmatpush.bf16.msrb.mxu1 %v4234_v47  ;;  %v4611_v47 = vld [vmem:[%s5481_s11 + $0x34] sm:$0xf0] }
 0x1e3   : > { %v1305_v46 = vpop.f32.mrf.mxu3  ;;  %2473 = vmatpush.bf16.msrb.mxu0 %v4230_v41  ;;  %v4183_v41 = vld [vmem:[%s5481_s11 + $0x10] sm:$0xf0] }
 0x1e4   : > { %v1452_v52 = vpop.f32.mrf.mxu2  ;;  %v1507_v56 = vmul.f32 %v1305_v46, %v1000_v16  ;;  %2570 = vmatpush.bf16.msrb.mxu2 %v4254_v55  ;;  %v4214_v46 = vor.u32 %v4614_v14, %v4213_v4  ;;  %v4607_v55 = vld [vmem:[%s5481_s11 + $0x14] sm:$0xf0] }
 0x1e5   : > { %v1356_v20 = vpop.f32.mrf.mxu0  ;;  %v1510_v1 = vmul.f32 %v1452_v52, %v1000_v16  ;;  %v4237_v16 = vld [vmem:[%s5481_s11 + $0x68] sm:$0xf] }
 0x1e6   : > { %v1512_v28 = vmul.f32 %v1356_v20, %v1002_v17  ;;  %v1405_v62 = vpop.f32.mrf.mxu1  ;;  %2523 = vmatpush.bf16.msrb.mxu1 %v4218_v13  ;;  %v4610_v20 = vld [vmem:[%s5481_s11 + $0x2c] sm:$0xf0]  ;;  %v1010_v13 = vadd.f32 %v5813_v44, %v5824_v60 }
 0x1e7   : > { %v1513_v31 = vmul.f32 %v1405_v62, %v1002_v17  ;;  %2474 = vmatpush.bf16.msrb.mxu0 %v4214_v46  ;;  %v4198_v24 = vor.u32 %v4610_v20, %v4197_v18 }
 0x1e8   : > { %v1552_v32 = vpack.c.bf16 %v1512_v28, %v1508_v25  ;;  %v4221_v25 = vld [vmem:[%s5481_s11 + $0x48] sm:$0xf]  ;;  %v4615_v28 = vld [vmem:[%s5481_s11 + $0x54] sm:$0xf0] }
 0x1e9   : > { %v1553_v30 = vpack.c.bf16 %v1513_v31, %v1509_v19  ;;  %v4222_v29 = vor.u32 %v4615_v28, %v4221_v25  ;;  %v1005_v19 = vadd.f32 %v5788_v27, %v5824_v60  ;;  %v1007_v31 = vadd.f32 %v5800_v36, %v5824_v60 }
 0x1ea   : > { %1917 = vmatmul.bf16.gmra.mxu0 %v1552_v32  ;;  %2524 = vmatpush.bf16.msrb.mxu1 %v4202_v11  ;;  %v4606_v32 = vld [vmem:[%s5481_s11 + $0xc] sm:$0xf0]  ;;  %v4186_v36 = vor.u32 %v4604_v33, %v4183_v41 }
 0x1eb   : > { %1966 = vmatmul.bf16.gmra.mxu1 %v1553_v30  ;;  %v1307_v45 = vpop.f32.mrf.mxu3  ;;  %2475 = vmatpush.bf16.msrb.mxu0 %v4198_v24  ;;  %v4182_v40 = vor.u32 %v4606_v32, %v4181_v3 }
 0x1ec   : > { %v1511_v59 = vmul.f32 %v1307_v45, %v1002_v17  ;;  %v1454_v0 = vpop.f32.mrf.mxu2  ;;  %v4205_v45 = vld [vmem:[%s5481_s11 + $0x28] sm:$0xf] }
 0x1ed   : > { %v1514_v7 = vmul.f32 %v1454_v0, %v1002_v17  ;;  %v1359_v2 = vpop.f32.mrf.mxu0  ;;  %v4619_v17 = vld [vmem:[%s5481_s11 + $0x74] sm:$0xf0]  ;;  %v4206_v49 = vor.u32 %v4611_v47, %v4205_v45  ;;  %v4189_v0 = vld [vmem:[%s5481_s11 + $0x8] sm:$0xf] }
 0x1ee   : > { %v1551_v5 = vpack.c.bf16 %v1511_v59, %v1507_v56  ;;  %v1408_v9 = vpop.f32.mrf.mxu1  ;;  %v4238_v52 = vor.u32 %v4619_v17, %v4237_v16  ;;  %v1516_v30 = vmul.f32 %v1359_v2, %v1005_v19  ;;  %2525 = vmatpush.bf16.msrb.mxu1 %v4186_v36  ;;  %v4190_v4 = vor.u32 %v4607_v55, %v4189_v0  ;;  %v1628_v45 = vld [vmem:[%s5912_s19 + $0x8] sm:$0xff] }
 0x1ef   : > { %v1554_v12 = vpack.c.bf16 %v1514_v7, %v1510_v1  ;;  %v1517_v27 = vmul.f32 %v1408_v9, %v1005_v19  ;;  %2476 = vmatpush.bf16.msrb.mxu0 %v4182_v40  ;;  %v1012_v16 = vadd.f32 %v5819_v51, %v5824_v60  ;;  %v2131_v60 = vld [vmem:[#allocation11 + $0x18] sm:$0xff] }
 0x1f0   : > { %1868 = vmatmul.bf16.gmra.mxu3 %v1551_v5  ;;  %2571 = vmatpush.bf16.msrb.mxu2 %v4238_v52 }
 0x1f1   : > { %2015 = vmatmul.bf16.gmra.mxu2 %v1554_v12  ;;  %2192 = vmatpush.msra.mxu3 %v2131_v60 }
 0x1f3   : > { %v1310_v62 = vpop.f32.mrf.mxu3 }
 0x1f4   : > { %v1457_v58 = vpop.f32.mrf.mxu2  ;;  %2572 = vmatpush.bf16.msrb.mxu2 %v4222_v29  ;;  %v1515_v1 = vmul.f32 %v1310_v62, %v1005_v19 }
 0x1f5   : > { %v1361_v23 = vpop.f32.mrf.mxu0  ;;  %v1518_v14 = vmul.f32 %v1457_v58, %v1005_v19 }
 0x1f6   : > { %v1520_v35 = vmul.f32 %v1361_v23, %v1007_v31  ;;  %v1410_v37 = vpop.f32.mrf.mxu1 }
 0x1f7   : > { %v1521_v43 = vmul.f32 %v1410_v37, %v1007_v31 }
 0x1f8   : > { %v1556_v48 = vpack.c.bf16 %v1520_v35, %v1516_v30  ;;  %2573 = vmatpush.bf16.msrb.mxu2 %v4206_v49  ;;  %v1627_v30 = vld [vmem:[%s5912_s19] sm:$0xff] }
 0x1f9   : > { %v1557_v56 = vpack.c.bf16 %v1521_v43, %v1517_v27 }
 0x1fa   : > { %1922 = vmatmul.bf16.gmra.mxu0 %v1556_v48 }
 0x1fb   : > { %1971 = vmatmul.bf16.gmra.mxu1 %v1557_v56  ;;  %v1312_v59 = vpop.f32.mrf.mxu3 }
 0x1fc   : > { %v1519_v7 = vmul.f32 %v1312_v59, %v1007_v31  ;;  %v1459_v2 = vpop.f32.mrf.mxu2  ;;  %2574 = vmatpush.bf16.msrb.mxu2 %v4190_v4 }
 0x1fd   : > { %v1522_v39 = vmul.f32 %v1459_v2, %v1007_v31  ;;  %v1364_v5 = vpop.f32.mrf.mxu0  ;;  %v1629_v2 = vld [vmem:[%s5912_s19 + $0x10] sm:$0xff] }
 0x1fe   : > { %v1555_v9 = vpack.c.bf16 %v1519_v7, %v1515_v1  ;;  %v1413_v46 = vpop.f32.mrf.mxu1  ;;  %v1524_v18 = vmul.f32 %v1364_v5, %v1010_v13 }
 0x1ff   : > { %v1558_v10 = vpack.c.bf16 %v1522_v39, %v1518_v14  ;;  %v1525_v24 = vmul.f32 %v1413_v46, %v1010_v13  ;;  %v2130_v14 = vld [vmem:[#allocation11 + $0x10] sm:$0xff] }
 0x200   : > { %1873 = vmatmul.bf16.gmra.mxu3 %v1555_v9 }
 0x201   : > { %2020 = vmatmul.bf16.gmra.mxu2 %v1558_v10  ;;  %2193 = vmatpush.msra.mxu3 %v2130_v14 }
 0x203   : > { %v1315_v12 = vpop.f32.mrf.mxu3 }
 0x204   : > { %v1462_v17 = vpop.f32.mrf.mxu2  ;;  %v1523_v11 = vmul.f32 %v1315_v12, %v1010_v13 }
 0x205   : > { %v1366_v52 = vpop.f32.mrf.mxu0  ;;  %v1526_v44 = vmul.f32 %v1462_v17, %v1010_v13  ;;  %v1630_v17 = vld [vmem:[%s5912_s19 + $0x18] sm:$0xff] }
 0x206   : > { %v1528_v20 = vmul.f32 %v1366_v52, %v1012_v16  ;;  %v1415_v21 = vpop.f32.mrf.mxu1 }
 0x207   : > { %v1529_v53 = vmul.f32 %v1415_v21, %v1012_v16 }
 0x208   : > { %v1560_v25 = vpack.c.bf16 %v1528_v20, %v1524_v18 }
 0x209   : > { %v1561_v28 = vpack.c.bf16 %v1529_v53, %v1525_v24 }
 0x20a   : > { %1927 = vmatmul.bf16.gmra.mxu0 %v1560_v25 }
 0x20b   : > { %1976 = vmatmul.bf16.gmra.mxu1 %v1561_v28  ;;  %v1317_v62 = vpop.f32.mrf.mxu3 }
 0x20c   : > { %v1527_v29 = vmul.f32 %v1317_v62, %v1012_v16  ;;  %v1464_v19 = vpop.f32.mrf.mxu2 }
 0x20d   : > { %v1530_v31 = vmul.f32 %v1464_v19, %v1012_v16 }
 0x20e   : > { %v1559_v58 = vpack.c.bf16 %v1527_v29, %v1523_v11  ;;  %v1631_v11 = vld [vmem:[%s5912_s19 + $0x20] sm:$0xff] }
 0x20f   : > { %v1562_v51 = vpack.c.bf16 %v1530_v31, %v1526_v44 }
 0x210   : > { %1878 = vmatmul.bf16.gmra.mxu3 %v1559_v58 }
 0x211   : > { %2025 = vmatmul.bf16.gmra.mxu2 %v1562_v51 }
 0x217   : > { %v1893_v23 = vpop.f32.mrf.mxu0 }
 0x218   : > { %v1942_v3 = vpop.f32.mrf.mxu1 }
 0x21a   : > { %2477 = vmatmul.bf16.vlgmr.msrb.gmra.mxu0 %v5676_v6 }
 0x21b   : > { %2526 = vmatmul.bf16.vlgmr.msrb.gmra.mxu1 %v5676_v6 }
 0x21f   : > { %v1895_v32 = vpop.f32.mrf.mxu0 }
 0x220   : > { %v1944_v33 = vpop.f32.mrf.mxu1 }
 0x221   : > { %2575 = vmatmul.bf16.vlgmr.msrb.gmra.mxu2 %v5676_v6 }
 0x223   : > { %v1844_v35 = vpop.f32.mrf.mxu3 }
 0x224   : > { %v1845_v37 = vadd.f32 %v1844_v35, %v1627_v30  ;;  %v1991_v40 = vpop.f32.mrf.mxu2 }
 0x226   : > { %v1894_v41 = vadd.f32 %v1893_v23, %v1845_v37 }
 0x227   : > { %v1898_v27 = vpop.f32.mrf.mxu0 }
 0x228   : > { %v1943_v43 = vadd.f32 %v1942_v3, %v1894_v41  ;;  %v1947_v36 = vpop.f32.mrf.mxu1 }
 0x22a   : > { %v5917_v47 = vadd.f32 %v1991_v40, %v1943_v43  ;;  %2482 = vmatmul.bf16.gmra.mxu0 %v5698_v22 }
 0x22b   : > { %2531 = vmatmul.bf16.gmra.mxu1 %v5698_v22  ;;  %v1846_v48 = vpop.f32.mrf.mxu3 }
 0x22c   : > { %v1847_v49 = vadd.f32 %v1846_v48, %v1628_v45  ;;  %v1993_v56 = vpop.f32.mrf.mxu2  ;;  %v2032_v59 = vsel %vm2031_vm0, %v5917_v47, -inf  ;;  %v1633_v45 = vld [vmem:[%s5912_s19 + $0x30] sm:$0xff] }
 0x22d   : > { %2033 = vmax.xlane.f32.xlu0 %v2032_v59  ;;  %v1044_v59 = vadd.f32 %v5749_v63, %v5661_v61 }
 0x22e   : > { %v1896_v0 = vadd.f32 %v1895_v32, %v1847_v49  ;;  %v1632_v32 = vld [vmem:[%s5912_s19 + $0x28] sm:$0xff]  ;;  %v2129_v49 = vld [vmem:[#allocation11 + $0x8] sm:$0xff] }
 0x22f   : > { %v1900_v55 = vpop.f32.mrf.mxu0  ;;  %2194 = vmatpush.msra.mxu3 %v2129_v49 }
 0x230   : > { %v1945_v1 = vadd.f32 %v1944_v33, %v1896_v0  ;;  %v1949_v7 = vpop.f32.mrf.mxu1  ;;  %v1046_v0 = vadd.f32 %v5758_v8, %v5661_v61 }
 0x231   : > { %2580 = vmatmul.bf16.gmra.mxu2 %v5698_v22 }
 0x232   : > { %v5925_v4 = vadd.f32 %v1993_v56, %v1945_v1 }
 0x233   : > { %v1849_v39 = vpop.f32.mrf.mxu3 }
 0x234   : > { %v1850_v5 = vadd.f32 %v1849_v39, %v1629_v2  ;;  %v1996_v9 = vpop.f32.mrf.mxu2  ;;  %v2035_v46 = vsel %vm2031_vm0, %v5925_v4, -inf  ;;  %v5959_v39 = vpack.c.bf16 %v1046_v0, %v1044_v59 }
 0x235   : > { %2036 = vmax.xlane.f32.xlu0 %v2035_v46  ;;  %v1634_v46 = vld [vmem:[%s5912_s19 + $0x38] sm:$0xff] }
 0x236   : > { %v1899_v10 = vadd.f32 %v1898_v27, %v1850_v5 }
 0x237   : > { %v1903_v12 = vpop.f32.mrf.mxu0 }
 0x238   : > { %v1948_v13 = vadd.f32 %v1947_v36, %v1899_v10  ;;  %v1952_v16 = vpop.f32.mrf.mxu1 }
 0x23a   : > { %v5930_v52 = vadd.f32 %v1996_v9, %v1948_v13  ;;  %2487 = vmatmul.bf16.gmra.mxu0 %v5720_v38 }
 0x23b   : > { %2536 = vmatmul.bf16.gmra.mxu1 %v5720_v38  ;;  %v1851_v18 = vpop.f32.mrf.mxu3 }
 0x23c   : > { %v1852_v20 = vadd.f32 %v1851_v18, %v1630_v17  ;;  %v1998_v21 = vpop.f32.mrf.mxu2  ;;  %v2038_v24 = vsel %vm2031_vm0, %v5930_v52, -inf }
 0x23d   : > { %2039 = vmax.xlane.f32.xlu1 %v2038_v24 }
 0x23e   : > { %v1901_v53 = vadd.f32 %v1900_v55, %v1852_v20  ;;  %v1635_v20 = vld [vmem:[%s5912_s19 + $0x40] sm:$0xff] }
 0x23f   : > { %v1905_v25 = vpop.f32.mrf.mxu0 }
 0x240   : > { %v1950_v28 = vadd.f32 %v1949_v7, %v1901_v53  ;;  %v1954_v62 = vpop.f32.mrf.mxu1 }
 0x241   : > { %2585 = vmatmul.bf16.gmra.mxu2 %v5720_v38 }
 0x242   : > { %v5938_v29 = vadd.f32 %v1998_v21, %v1950_v28  ;;  %v1051_v28 = vadd.f32 %v5786_v26, %v5661_v61 }
 0x243   : > { %v1854_v19 = vpop.f32.mrf.mxu3 }
 0x244   : > { %v1855_v44 = vadd.f32 %v1854_v19, %v1631_v11  ;;  %v2001_v31 = vpop.f32.mrf.mxu2  ;;  %v2041_v58 = vsel %vm2031_vm0, %v5938_v29, -inf }
 0x245   : > { %2042 = vmax.xlane.f32.xlu1 %v2041_v58 }
 0x246   : > { %v1904_v51 = vadd.f32 %v1903_v12, %v1855_v44 }
 0x247   : > { %v1908_v60 = vpop.f32.mrf.mxu0 }
 0x248   : > { %v1953_v23 = vadd.f32 %v1952_v16, %v1904_v51  ;;  %v1957_v3 = vpop.f32.mrf.mxu1  ;;  %v1636_v51 = vld [vmem:[%s5912_s19 + $0x48] sm:$0xff] }
 0x24a   : > { %v5943_v33 = vadd.f32 %v2001_v31, %v1953_v23  ;;  %2492 = vmatmul.bf16.gmra.mxu0 %v5742_v57 }
 0x24b   : > { %2541 = vmatmul.bf16.gmra.mxu1 %v5742_v57  ;;  %v1856_v30 = vpop.f32.mrf.mxu3 }
 0x24c   : > { %v1857_v35 = vadd.f32 %v1856_v30, %v1632_v32  ;;  %v2003_v37 = vpop.f32.mrf.mxu2  ;;  %v2044_v40 = vsel %vm2031_vm0, %v5943_v33, -inf }
 0x24d   : > { %2045 = vmax.xlane.f32.xlu2 %v2044_v40  ;;  %v1637_v40 = vld [vmem:[%s5912_s19 + $0x50] sm:$0xff] }
 0x24e   : > { %v1906_v41 = vadd.f32 %v1905_v25, %v1857_v35  ;;  %v1049_v25 = vadd.f32 %v5771_v15, %v5661_v61 }
 0x24f   : > { %v1910_v27 = vpop.f32.mrf.mxu0 }
 0x250   : > { %v1955_v43 = vadd.f32 %v1954_v62, %v1906_v41  ;;  %v1959_v36 = vpop.f32.mrf.mxu1  ;;  %v5978_v31 = vpack.c.bf16 %v1051_v28, %v1049_v25 }
 0x251   : > { %2590 = vmatmul.bf16.gmra.mxu2 %v5742_v57 }
 0x252   : > { %v5951_v48 = vadd.f32 %v2003_v37, %v1955_v43 }
 0x253   : > { %v1859_v56 = vpop.f32.mrf.mxu3 }
 0x254   : > { %v1860_v55 = vadd.f32 %v1859_v56, %v1633_v45  ;;  %v2006_v1 = vpop.f32.mrf.mxu2  ;;  %v2047_v7 = vsel %vm2031_vm0, %v5951_v48, -inf  ;;  %v1056_v45 = vadd.f32 %v5808_v42, %v5661_v61 }
 0x255   : > { %2048 = vmax.xlane.f32.xlu2 %v2047_v7 }
 0x256   : > { %v1909_v2 = vadd.f32 %v1908_v60, %v1860_v55 }
 0x257   : > { %v1913_v14 = vpop.f32.mrf.mxu0 }
 0x258   : > { %v1958_v5 = vadd.f32 %v1957_v3, %v1909_v2  ;;  %v1962_v9 = vpop.f32.mrf.mxu1 }
 0x25a   : > { %v5962_v10 = vadd.f32 %v2006_v1, %v1958_v5  ;;  %2497 = vmatmul.bf16.gmra.mxu0 %v5959_v39 }
 0x25b   : > { %2546 = vmatmul.bf16.gmra.mxu1 %v5959_v39  ;;  %v1861_v63 = vpop.f32.mrf.mxu3 }
 0x25c   : > { %v1862_v8 = vadd.f32 %v1861_v63, %v1634_v46  ;;  %v2008_v12 = vpop.f32.mrf.mxu2  ;;  %v2050_v13 = vsel %vm2031_vm0, %v5962_v10, -inf }
 0x25d   : > { %2051 = vmax.xlane.f32.xlu0 %v2050_v13 }
 0x25e   : > { %v1911_v16 = vadd.f32 %v1910_v27, %v1862_v8  ;;  %v2128_v27 = vld [vmem:[#allocation11] sm:$0xff] }
 0x25f   : > { %v1915_v18 = vpop.f32.mrf.mxu0  ;;  %2195 = vmatpush.msra.mxu3 %v2128_v27 }
 0x260   : > { %v1960_v17 = vadd.f32 %v1959_v36, %v1911_v16  ;;  %v1964_v24 = vpop.f32.mrf.mxu1  ;;  %v1054_v36 = vadd.f32 %v5795_v34, %v5661_v61  ;;  %v1639_v16 = vld [vmem:[%s5912_s19 + $0x60] sm:$0xff] }
 0x261   : > { %2595 = vmatmul.bf16.gmra.mxu2 %v5959_v39 }
 0x262   : > { %v5970_v21 = vadd.f32 %v2008_v12, %v1960_v17  ;;  %v5997_v7 = vpack.c.bf16 %v1056_v45, %v1054_v36 }
 0x263   : > { %v1864_v53 = vpop.f32.mrf.mxu3 }
 0x264   : > { %v1865_v62 = vadd.f32 %v1864_v53, %v1635_v20  ;;  %v2011_v11 = vpop.f32.mrf.mxu2  ;;  %v2053_v19 = vsel %vm2031_vm0, %v5970_v21, -inf  ;;  %v1059_v20 = vadd.f32 %v5817_v50, %v5661_v61 }
 0x265   : > { %2054 = vmax.xlane.f32.xlu1 %v2053_v19 }
 0x266   : > { %v1914_v44 = vadd.f32 %v1913_v14, %v1865_v62  ;;  %v1638_v14 = vld [vmem:[%s5912_s19 + $0x58] sm:$0xff] }
 0x267   : > { %v1918_v15 = vpop.f32.mrf.mxu0 }
 0x268   : > { %v1963_v58 = vadd.f32 %v1962_v9, %v1914_v44  ;;  %v1967_v30 = vpop.f32.mrf.mxu1 }
 0x26a   : > { %v5981_v60 = vadd.f32 %v2011_v11, %v1963_v58  ;;  %2502 = vmatmul.bf16.gmra.mxu0 %v5978_v31  ;;  %v1640_v58 = vld [vmem:[%s5912_s19 + $0x68] sm:$0xff] }
 0x26b   : > { %2551 = vmatmul.bf16.gmra.mxu1 %v5978_v31  ;;  %v1866_v26 = vpop.f32.mrf.mxu3 }
 0x26c   : > { %v1867_v23 = vadd.f32 %v1866_v26, %v1636_v51  ;;  %v2013_v3 = vpop.f32.mrf.mxu2  ;;  %v2056_v32 = vsel %vm2031_vm0, %v5981_v60, -inf }
 0x26d   : > { %2057 = vmax.xlane.f32.xlu2 %v2056_v32 }
 0x26e   : > { %v1916_v35 = vadd.f32 %v1915_v18, %v1867_v23  ;;  %v4633_v23 = vld [vmem:[%s5481_s11 + $0xec] sm:$0xf] }
 0x26f   : > { %v1920_v0 = vpop.f32.mrf.mxu0 }
 0x270   : > { %v1965_v37 = vadd.f32 %v1964_v24, %v1916_v35  ;;  %v1969_v1 = vpop.f32.mrf.mxu1  ;;  %v1061_v24 = vadd.f32 %v5821_v54, %v5661_v61 }
 0x271   : > { %2600 = vmatmul.bf16.gmra.mxu2 %v5978_v31 }
 0x272   : > { %v5989_v41 = vadd.f32 %v2013_v3, %v1965_v37  ;;  %v6016_v11 = vpack.c.bf16 %v1061_v24, %v1059_v20  ;;  %v4303_v3 = vld [vmem:[%s5481_s11 + $0xf8] sm:$0xf0]  ;;  %v1641_v37 = vld [vmem:[%s5912_s19 + $0x70] sm:$0xff] }
 0x273   : > { %v1869_v43 = vpop.f32.mrf.mxu3 }
 0x274   : > { %v1870_v49 = vadd.f32 %v1869_v43, %v1637_v40  ;;  %v2016_v56 = vpop.f32.mrf.mxu2  ;;  %v2059_v59 = vsel %vm2031_vm0, %v5989_v41, -inf }
 0x275   : > { %2060 = vmax.xlane.f32.xlu0 %v2059_v59 }
 0x276   : > { %v1919_v55 = vadd.f32 %v1918_v15, %v1870_v49 }
 0x277   : > { %v1923_v8 = vpop.f32.mrf.mxu0 }
 0x278   : > { %v1968_v2 = vadd.f32 %v1967_v30, %v1919_v55  ;;  %v1972_v13 = vpop.f32.mrf.mxu1  ;;  %v4306_v30 = vor.u32 %v4633_v23, %v4303_v3  ;;  %v1642_v55 = vld [vmem:[%s5912_s19 + $0x78] sm:$0xff]  ;;  %s6692_s19 = sld [smem:[#allocation49_spill]] }
 0x27a   : > { %v6000_v5 = vadd.f32 %v2016_v56, %v1968_v2  ;;  %2507 = vmatmul.bf16.gmra.mxu0 %v5997_v7  ;;  %2616 = vmatpush.bf16.msrb.mxu3 %v4306_v30  ;;  %v4621_v30 = vld [vmem:[%s5481_s11 + $0x8c] sm:$0xf] }
 0x27b   : > { %2556 = vmatmul.bf16.gmra.mxu1 %v5997_v7  ;;  %v1871_v34 = vpop.f32.mrf.mxu3 }
 0x27c   : > { %v1872_v42 = vadd.f32 %v1871_v34, %v1638_v14  ;;  %v2018_v9 = vpop.f32.mrf.mxu2  ;;  %v2062_v46 = vsel %vm2031_vm0, %v6000_v5, -inf }
 0x27d   : > { %2063 = vmax.xlane.f32.xlu1 %v2062_v46  ;;  %v4287_v46 = vld [vmem:[%s5481_s11 + $0xd8] sm:$0xf0] }
 0x27e   : > { %v1921_v63 = vadd.f32 %v1920_v0, %v1872_v42  ;;  %s6693_s3 = smov %s6692_s19 }
 0x27f   : > { %v1925_v44 = vpop.f32.mrf.mxu0  ;;  %s5090_s10 = scalar_lea.hbm %s6693_s3, 512 }
 0x280   : > { %v1970_v12 = vadd.f32 %v1969_v1, %v1921_v63  ;;  %v1974_v61 = vpop.f32.mrf.mxu1 }
 0x281   : > { %2605 = vmatmul.bf16.gmra.mxu2 %v5997_v7 }
 0x282   : > { %v6008_v17 = vadd.f32 %v2018_v9, %v1970_v12  ;;  %v4629_v9 = vld [vmem:[%s5481_s11 + $0xcc] sm:$0xf] }
 0x283   : > { %v1874_v18 = vpop.f32.mrf.mxu3 }
 0x284   : > { %v1875_v53 = vadd.f32 %v1874_v18, %v1639_v16  ;;  %v2021_v25 = vpop.f32.mrf.mxu2  ;;  %v2065_v28 = vsel %vm2031_vm0, %v6008_v17, -inf }
 0x285   : > { %2066 = vmax.xlane.f32.xlu2 %v2065_v28 }
 0x286   : > { %v1924_v62 = vadd.f32 %v1923_v8, %v1875_v53  ;;  %v4290_v8 = vor.u32 %v4629_v9, %v4287_v46 }
 0x287   : > { %v1928_v27 = vpop.f32.mrf.mxu0 }
 0x288   : > { %v1973_v19 = vadd.f32 %v1972_v13, %v1924_v62  ;;  %v1977_v49 = vpop.f32.mrf.mxu1  ;;  %2617 = vmatpush.bf16.msrb.mxu3 %v4290_v8 }
 0x28a   : > { %v6019_v51 = vadd.f32 %v2021_v25, %v1973_v19  ;;  %2512 = vmatmul.bf16.gmra.mxu0 %v6016_v11 }
 0x28b   : > { %2561 = vmatmul.bf16.gmra.mxu1 %v6016_v11  ;;  %v1876_v50 = vpop.f32.mrf.mxu3 }
 0x28c   : > { %v1877_v54 = vadd.f32 %v1876_v50, %v1640_v58  ;;  %v2068_v15 = vsel %vm2031_vm0, %v6019_v51, -inf  ;;  %v2023_v26 = vpop.f32.mrf.mxu2  ;;  %v4625_v58 = vld [vmem:[%s5481_s11 + $0xac] sm:$0xf] }
 0x28d   : > { %2069 = vmax.xlane.f32.xlu0 %v2068_v15 }
 0x28e   : > { %v1926_v32 = vadd.f32 %v1925_v44, %v1877_v54 }
 0x28f   : > { %v1930_v42 = vpop.f32.mrf.mxu0 }
 0x290   : > { %v1975_v35 = vadd.f32 %v1974_v61, %v1926_v32  ;;  %v1979_v12 = vpop.f32.mrf.mxu1 }
 0x291   : > { %2610 = vmatmul.bf16.gmra.mxu2 %v6016_v11 }
 0x292   : > { %v6029_v40 = vadd.f32 %v2023_v26, %v1975_v35 }
 0x293   : > { %v1879_v43 = vpop.f32.mrf.mxu3 }
 0x294   : > { %v1880_v36 = vadd.f32 %v1879_v43, %v1641_v37  ;;  %v2071_v45 = vsel %vm2031_vm0, %v6029_v40, -inf  ;;  %v2026_v59 = vpop.f32.mrf.mxu2 }
 0x295   : > { %2072 = vmax.xlane.f32.xlu1 %v2071_v45 }
 0x296   : > { %v1929_v56 = vadd.f32 %v1928_v27, %v1880_v36 }
 0x298   : > { %v1978_v0 = vadd.f32 %v1977_v49, %v1929_v56 }
 0x29a   : > { %v6034_v1 = vadd.f32 %v2026_v59, %v1978_v0  ;;  %v4617_v59 = vld [vmem:[%s5481_s11 + $0x6c] sm:$0xf] }
 0x29b   : > { %v1881_v2 = vpop.f32.mrf.mxu3 }
 0x29c   : > { %v1882_v14 = vadd.f32 %v1881_v2, %v1642_v55  ;;  %v2074_v34 = vsel %vm2031_vm0, %v6034_v1, -inf  ;;  %v2028_v18 = vpop.f32.mrf.mxu2 }
 0x29d   : > { %2075 = vmax.xlane.f32.xlu2 %v2074_v34 }
 0x29e   : > { %v1931_v63 = vadd.f32 %v1930_v42, %v1882_v14 }
 0x2a0   : > { %v1980_v13 = vadd.f32 %v1979_v12, %v1931_v63  ;;  %v2034_v16 = vpop.xlane.xlu0 %2033  ;;  %v4613_v63 = vld [vmem:[%s5481_s11 + $0x4c] sm:$0xf] }
 0x2a1   : > { %v2080_v20 = vsub.f32 %v5917_v47, %v2034_v16  ;;  %v4271_v47 = vld [vmem:[%s5481_s11 + $0xb8] sm:$0xf0] }
 0x2a2   : > { %v6041_v24 = vadd.f32 %v2028_v18, %v1980_v13  ;;  %v4274_v61 = vor.u32 %v4625_v58, %v4271_v47 }
 0x2a3   : > { %v2096_v53 = vmul.f32 1.442695, %v2080_v20 }
 0x2a4   : > { %v2077_v25 = vsel %vm2031_vm0, %v6041_v24, -inf  ;;  %2618 = vmatpush.bf16.msrb.mxu3 %v4274_v61 }
 0x2a5   : > { %4826 = vpow2.f32 %v2096_v53  ;;  %2078 = vmax.xlane.f32.xlu0 %v2077_v25 }
 0x2a8   : > { %v2037_v28 = vpop.xlane.xlu0 %2036 }
 0x2a9   : > { %v2081_v62 = vsub.f32 %v5925_v4, %v2037_v28  ;;  %v4609_v28 = vld [vmem:[%s5481_s11 + $0x2c] sm:$0xf] }
 0x2ab   : > { %v6046_v19 = vpop.eup %4826  ;;  %v2098_v44 = vmul.f32 1.442695, %v2081_v62 }
 0x2ac   : > { %4163 = vmatmul.msk.f32.vlgmr.msra.gmra.mxu3 %vm2031_vm0, %v6046_v19 }
 0x2ad   : > { %4828 = vpow2.f32 %v2098_v44 }
 0x2b0   : > { %v2040_v50 = vpop.xlane.xlu1 %2039 }
 0x2b1   : > { %v2082_v54 = vsub.f32 %v5930_v52, %v2040_v50  ;;  %v4255_v52 = vld [vmem:[%s5481_s11 + $0x98] sm:$0xf0] }
 0x2b2   : > { %v4258_v35 = vor.u32 %v4621_v30, %v4255_v52 }
 0x2b3   : > { %v6053_v15 = vpop.eup %4828  ;;  %v2100_v26 = vmul.f32 1.442695, %v2082_v54 }
 0x2b4   : > { %4164 = vmatmul.msk.f32.gmra.mxu3 %vm2031_vm0, %v6053_v15 }
 0x2b5   : > { %4830 = vpow2.f32 %v2100_v26  ;;  %2619 = vmatpush.bf16.msrb.mxu3 %v4258_v35 }
 0x2b8   : > { %v2043_v4 = vpop.xlane.xlu1 %2042 }
 0x2b9   : > { %v2083_v23 = vsub.f32 %v5938_v29, %v2043_v4  ;;  %v4605_v4 = vld [vmem:[%s5481_s11 + $0xc] sm:$0xf] }
 0x2bb   : > { %v6058_v3 = vpop.eup %4830  ;;  %v2102_v32 = vmul.f32 1.442695, %v2083_v23  ;;  %v4191_v23 = vld [vmem:[%s5481_s11 + $0x18] sm:$0xf0] }
 0x2bc   : > { %4165 = vmatmul.msk.f32.gmra.mxu3 %vm2031_vm0, %v6058_v3 }
 0x2bd   : > { %4832 = vpow2.f32 %v2102_v32 }
 0x2c0   : > { %v2046_v37 = vpop.xlane.xlu2 %2045 }
 0x2c1   : > { %v2084_v27 = vsub.f32 %v5943_v33, %v2046_v37  ;;  %v4239_v33 = vld [vmem:[%s5481_s11 + $0x78] sm:$0xf0]  ;;  %v4643_v37 = vld [vmem:[%s6675_s13 + $0x34] sm:$0xf0] }
 0x2c2   : > { %v4242_v0 = vor.u32 %v4617_v59, %v4239_v33  ;;  %v4335_v59 = vld [vmem:[%s6675_s13 + $0x38] sm:$0xf0] }
 0x2c3   : > { %v6065_v43 = vpop.eup %4832  ;;  %v2104_v36 = vmul.f32 1.442695, %v2084_v27 }
 0x2c4   : > { %4166 = vmatmul.msk.f32.gmra.mxu3 %vm2031_vm0, %v6065_v43 }
 0x2c5   : > { %4834 = vpow2.f32 %v2104_v36  ;;  %2620 = vmatpush.bf16.msrb.mxu3 %v4242_v0 }
 0x2c8   : > { %v2049_v29 = vpop.xlane.xlu2 %2048 }
 0x2c9   : > { %v2085_v45 = vsub.f32 %v5951_v48, %v2049_v29 }
 0x2cb   : > { %v6070_v49 = vpop.eup %4834  ;;  %v2106_v56 = vmul.f32 1.442695, %v2085_v45 }
 0x2cc   : > { %4167 = vmatmul.msk.f32.gmra.mxu3 %vm2031_vm0, %v6070_v49 }
 0x2cd   : > { %4836 = vpow2.f32 %v2106_v56  ;;  %v4641_v56 = vld [vmem:[%s6675_s13 + $0x2c] sm:$0xf] }
 0x2ce   : > { %v4338_v33 = vor.u32 %v4641_v56, %v4335_v59 }
 0x2d0   : > { %v2052_v55 = vpop.xlane.xlu0 %2051 }
 0x2d1   : > { %v2086_v2 = vsub.f32 %v5962_v10, %v2052_v55  ;;  %v4223_v10 = vld [vmem:[%s5481_s11 + $0x58] sm:$0xf0] }
 0x2d2   : > { %v4226_v8 = vor.u32 %v4613_v63, %v4223_v10  ;;  %v4327_v63 = vld [vmem:[%s6675_s13 + $0x30] sm:$0xf0] }
 0x2d3   : > { %v6077_v14 = vpop.eup %4836  ;;  %v2108_v34 = vmul.f32 1.442695, %v2086_v2 }
 0x2d4   : > { %4168 = vmatmul.msk.f32.gmra.mxu3 %vm2031_vm0, %v6077_v14 }
 0x2d5   : > { %4838 = vpow2.f32 %v2108_v34  ;;  %2621 = vmatpush.bf16.msrb.mxu3 %v4226_v8  ;;  %v4325_v34 = vld [vmem:[%s6675_s13 + $0x20] sm:$0xf] }
 0x2d8   : > { %v2055_v48 = vpop.xlane.xlu1 %2054 }
 0x2d9   : > { %v2087_v42 = vsub.f32 %v5970_v21, %v2055_v48  ;;  %v4642_v48 = vld [vmem:[%s6675_s13 + $0x2c] sm:$0xf0] }
 0x2db   : > { %v6082_v9 = vpop.eup %4838  ;;  %v2110_v46 = vmul.f32 1.442695, %v2087_v42  ;;  %v4640_v42 = vld [vmem:[%s6675_s13 + $0x24] sm:$0xf] }
 0x2dc   : > { %4169 = vmatmul.msk.f32.gmra.mxu3 %vm2031_vm0, %v6082_v9  ;;  %v4330_v8 = vor.u32 %v4640_v42, %v4327_v63  ;;  %v4637_v42 = vld [vmem:[%s6675_s13 + $0xc] sm:$0xf] }
 0x2dd   : > { %4840 = vpow2.f32 %v2110_v46  ;;  %v4326_v46 = vor.u32 %v4642_v48, %v4325_v34 }
 0x2de   : > { %2800 = vmatpush.bf16.msra.mxu1 %v4330_v8 }
 0x2df   : > { %2751 = vmatpush.bf16.msra.mxu0 %v4326_v46 }
 0x2e0   : > { %v2058_v12 = vpop.xlane.xlu2 %2057 }
 0x2e1   : > { %v2088_v13 = vsub.f32 %v5981_v60, %v2058_v12  ;;  %v4207_v60 = vld [vmem:[%s5481_s11 + $0x38] sm:$0xf0] }
 0x2e2   : > { %v4210_v62 = vor.u32 %v4609_v28, %v4207_v60  ;;  %v4317_v28 = vld [vmem:[%s6675_s13 + $0x8] sm:$0xf]  ;;  %v4639_v60 = vld [vmem:[%s6675_s13 + $0x14] sm:$0xf0] }
 0x2e3   : > { %v6089_v16 = vpop.eup %4840  ;;  %v2112_v18 = vmul.f32 1.442695, %v2088_v13 }
 0x2e4   : > { %4170 = vmatmul.msk.f32.gmra.mxu3 %vm2031_vm0, %v6089_v16 }
 0x2e5   : > { %4842 = vpow2.f32 %v2112_v18  ;;  %2622 = vmatpush.bf16.msrb.mxu3 %v4210_v62  ;;  %v4309_v18 = vld [vmem:[%s6675_s13] sm:$0xf] }
 0x2e8   : > { %v2061_v21 = vpop.xlane.xlu0 %2060 }
 0x2e9   : > { %v2089_v20 = vsub.f32 %v5989_v41, %v2061_v21  ;;  %v4638_v21 = vld [vmem:[%s6675_s13 + $0xc] sm:$0xf0] }
 0x2eb   : > { %v6094_v53 = vpop.eup %4842  ;;  %v2114_v25 = vmul.f32 1.442695, %v2089_v20  ;;  %v4310_v20 = vor.u32 %v4638_v21, %v4309_v18 }
 0x2ec   : > { %4171 = vmatmul.msk.f32.gmra.mxu3 %vm2031_vm0, %v6094_v53 }
 0x2ed   : > { %4844 = vpow2.f32 %v2114_v25  ;;  %v4311_v25 = vld [vmem:[%s6675_s13 + $0x10] sm:$0xf0]  ;;  %2752 = vmatpush.bf16.msra.mxu0 %v4310_v20 }
 0x2f0   : > { %v2064_v44 = vpop.xlane.xlu1 %2063 }
 0x2f1   : > { %v2090_v58 = vsub.f32 %v6000_v5, %v2064_v44  ;;  %v4194_v5 = vor.u32 %v4605_v4, %v4191_v23  ;;  %v4318_v44 = vor.u32 %v4639_v60, %v4317_v28 }
 0x2f3   : > { %v6101_v47 = vpop.eup %4844  ;;  %v2116_v61 = vmul.f32 1.442695, %v2090_v58  ;;  %2623 = vmatpush.bf16.msrb.mxu3 %v4194_v5  ;;  %v6174_v58 = vpop.f32.mrf.mxu0 }
 0x2f4   : > { %4172 = vmatmul.msk.f32.gmra.mxu3 %vm2031_vm0, %v6101_v47 }
 0x2f5   : > { %4846 = vpow2.f32 %v2116_v61  ;;  %v6176_v61 = vpop.f32.mrf.mxu1 }
 0x2f7   : > { %2898 = vmatpush.bf16.msra.mxu3 %v4338_v33 }
 0x2f8   : > { %v2067_v41 = vpop.xlane.xlu2 %2066 }
 0x2f9   : > { %v2091_v50 = vsub.f32 %v6008_v17, %v2067_v41  ;;  %v4333_v17 = vld [vmem:[%s6675_s13 + $0x28] sm:$0xf] }
 0x2fa   : > { %v4334_v27 = vor.u32 %v4643_v37, %v4333_v17 }
 0x2fb   : > { %v6106_v54 = vpop.eup %4846  ;;  %v2118_v26 = vmul.f32 1.442695, %v2091_v50  ;;  %v6182_v50 = vpop.f32.mrf.mxu2 }
 0x2fc   : > { %4173 = vmatmul.msk.f32.gmra.mxu3 %vm2031_vm0, %v6106_v54  ;;  %2849 = vmatpush.bf16.msra.mxu2 %v4334_v27 }
 0x2fd   : > { %4848 = vpow2.f32 %v2118_v26  ;;  %v6184_v26 = vpop.f32.mrf.mxu0  ;;  %v6186_v4 = vpop.f32.mrf.mxu1 }
 0x300   : > { %v2070_v32 = vpop.xlane.xlu0 %2069  ;;  %2850 = vmatpush.bf16.msra.mxu2 %v4318_v44 }
 0x301   : > { %v2092_v30 = vsub.f32 %v6019_v51, %v2070_v32 }
 0x303   : > { %v6113_v52 = vpop.eup %4848  ;;  %v2120_v35 = vmul.f32 1.442695, %v2092_v30  ;;  %v6189_v5 = vpop.f32.mrf.mxu2 }
 0x304   : > { %4174 = vmatmul.msk.f32.gmra.mxu3 %vm2031_vm0, %v6113_v52 }
 0x305   : > { %4850 = vpow2.f32 %v2120_v35  ;;  %v6191_v32 = vpop.f32.mrf.mxu0  ;;  %v6193_v30 = vpop.f32.mrf.mxu1 }
 0x308   : > { %v2073_v36 = vpop.xlane.xlu1 %2072 }
 0x309   : > { %v2093_v51 = vsub.f32 %v6029_v40, %v2073_v36 }
 0x30b   : > { %v6124_v29 = vpop.eup %4850  ;;  %v2122_v45 = vmul.f32 1.442695, %v2093_v51  ;;  %v6196_v37 = vpop.f32.mrf.mxu2 }
 0x30c   : > { %4175 = vmatmul.msk.f32.gmra.mxu3 %vm2031_vm0, %v6124_v29 }
 0x30d   : > { %4852 = vpow2.f32 %v2122_v45  ;;  %v6200_v45 = vpop.f32.mrf.mxu0  ;;  %v6202_v56 = vpop.f32.mrf.mxu1 }
 0x310   : > { %v2076_v0 = vpop.xlane.xlu2 %2075 }
 0x311   : > { %v2094_v40 = vsub.f32 %v6034_v1, %v2076_v0 }
 0x313   : > { %v6135_v55 = vpop.eup %4852  ;;  %v2124_v2 = vmul.f32 1.442695, %v2094_v40 }
 0x314   : > { %4176 = vmatmul.msk.f32.gmra.mxu3 %vm2031_vm0, %v6135_v55 }
 0x315   : > { %4854 = vpow2.f32 %v2124_v2  ;;  %v6216_v33 = vpop.f32.mrf.mxu1 }
 0x318   : > { %v2079_v1 = vpop.xlane.xlu0 %2078 }
 0x319   : > { %v2095_v10 = vsub.f32 %v6041_v24, %v2079_v1  ;;  %v4636_v24 = vld [vmem:[%s6675_s13 + $0x4] sm:$0xf]  ;;  %v4319_v1 = vld [vmem:[%s6675_s13 + $0x18] sm:$0xf0] }
 0x31a   : > { %v4314_v62 = vor.u32 %v4636_v24, %v4311_v25  ;;  %v4322_v46 = vor.u32 %v4637_v42, %v4319_v1 }
 0x31b   : > { %v6152_v12 = vpop.eup %4854  ;;  %v2126_v13 = vmul.f32 1.442695, %v2095_v10 }
 0x31c   : > { %4177 = vmatmul.msk.f32.gmra.mxu3 %vm2031_vm0, %v6152_v12  ;;  %2801 = vmatpush.bf16.msra.mxu1 %v4314_v62 }
 0x31d   : > { %4856 = vpow2.f32 %v2126_v13  ;;  %2899 = vmatpush.bf16.msra.mxu3 %v4322_v46 }
 0x323   : > { %v6178_v41 = vpop.eup %4856 }
 0x324   : > { %4178 = vmatmul.msk.f32.gmra.mxu3 %vm2031_vm0, %v6178_v41 }
 0x32c   : > { %2624 = vmatmul.bf16.vlgmr.msrb.gmra.mxu3 %v5676_v6 }
 0x32f   : > { %v2197_v23 = vpop.f32.mrf.mxu3 }
 0x330   : > { %4858 = vrcp.f32 %v2197_v23 }
 0x336   : > { %v4859_v17 = vpop.eup %4858 }
 0x337   : > { %v2200_v35 = vpop.f32.mrf.mxu3  ;;  %v2261_v36 = vmul.f32 %v4859_v17, %v6046_v19 }
 0x338   : > { %4860 = vrcp.f32 %v2200_v35 }
 0x33c   : > { %2629 = vmatmul.bf16.gmra.mxu3 %v5698_v22  ;;  %v6212_v22 = vpop.f32.mrf.mxu2 }
 0x33e   : > { %v4861_v27 = vpop.eup %4860 }
 0x33f   : > { %v2262_v6 = vmul.f32 %v4861_v27, %v6053_v15  ;;  %v2203_v51 = vpop.f32.mrf.mxu3  ;;  %v6214_v15 = vpop.f32.mrf.mxu0 }
 0x340   : > { %4862 = vrcp.f32 %v2203_v51 }
 0x341   : > { %v6204_v59 = vpack.c.bf16 %v2262_v6, %v2261_v36 }
 0x343   : > { %4339 = vmatmul.msk.bf16.vlgmr.msra.gmra.mxu0 %vm2031_vm0, %v6204_v59  ;;  %4347 = vmatmul.msk.bf16.vlgmr.msra.gmra.mxu1 %vm2031_vm0, %v6204_v59 }
 0x344   : > { %4355 = vmatmul.msk.bf16.vlgmr.msra.gmra.mxu2 %vm2031_vm0, %v6204_v59  ;;  %v6227_v63 = vpop.f32.mrf.mxu2 }
 0x346   : > { %v4863_v0 = vpop.eup %4862 }
 0x347   : > { %v2206_v19 = vpop.f32.mrf.mxu3  ;;  %v2263_v2 = vmul.f32 %v4863_v0, %v6058_v3  ;;  %v6237_v3 = vpop.f32.mrf.mxu1 }
 0x348   : > { %4864 = vrcp.f32 %v2206_v19 }
 0x34c   : > { %2634 = vmatmul.bf16.gmra.mxu3 %v5720_v38  ;;  %v6235_v38 = vpop.f32.mrf.mxu0  ;;  %v6241_v8 = vpop.f32.mrf.mxu2 }
 0x34e   : > { %v4865_v40 = vpop.eup %4864 }
 0x34f   : > { %v2264_v34 = vmul.f32 %v4865_v40, %v6065_v43  ;;  %v2209_v48 = vpop.f32.mrf.mxu3  ;;  %v6246_v24 = vpop.f32.mrf.mxu1 }
 0x350   : > { %4866 = vrcp.f32 %v2209_v48 }
 0x351   : > { %v6229_v10 = vpack.c.bf16 %v2264_v34, %v2263_v2 }
 0x353   : > { %4340 = vmatmul.msk.bf16.gmra.mxu0 %vm2031_vm0, %v6229_v10  ;;  %4348 = vmatmul.msk.bf16.gmra.mxu1 %vm2031_vm0, %v6229_v10 }
 0x354   : > { %4356 = vmatmul.msk.bf16.gmra.mxu2 %vm2031_vm0, %v6229_v10  ;;  %v6244_v21 = vpop.f32.mrf.mxu0 }
 0x356   : > { %v4867_v13 = vpop.eup %4866 }
 0x357   : > { %v2212_v43 = vpop.f32.mrf.mxu3  ;;  %v2265_v20 = vmul.f32 %v4867_v13, %v6070_v49  ;;  %v6262_v49 = vpop.f32.mrf.mxu1 }
 0x358   : > { %4868 = vrcp.f32 %v2212_v43 }
 0x35c   : > { %2639 = vmatmul.bf16.gmra.mxu3 %v5742_v57  ;;  %v6258_v57 = vpop.f32.mrf.mxu2  ;;  %v6260_v44 = vpop.f32.mrf.mxu0 }
 0x35e   : > { %v4869_v18 = vpop.eup %4868 }
 0x35f   : > { %v2266_v25 = vmul.f32 %v4869_v18, %v6077_v14  ;;  %v2215_v28 = vpop.f32.mrf.mxu3  ;;  %v6273_v19 = vpop.f32.mrf.mxu1  ;;  %v4651_v18 = vld [vmem:[%s5483_s28 + $0x38] sm:$0xff] }
 0x360   : > { %4870 = vrcp.f32 %v2215_v28  ;;  %3297 = vmatpush.bf16.msrb.mxu0 %v4651_v18  ;;  %v4665_v18 = vld [vmem:[%s5483_s28 + $0xa8] sm:$0xff] }
 0x361   : > { %v6250_v60 = vpack.c.bf16 %v2266_v25, %v2265_v20  ;;  %v4659_v20 = vld [vmem:[%s5483_s28 + $0x78] sm:$0xff] }
 0x362   : > { %3346 = vmatpush.bf16.msrb.mxu1 %v4659_v20 }
 0x363   : > { %4341 = vmatmul.msk.bf16.gmra.mxu0 %vm2031_vm0, %v6250_v60  ;;  %4349 = vmatmul.msk.bf16.gmra.mxu1 %vm2031_vm0, %v6250_v60 }
 0x364   : > { %4357 = vmatmul.msk.bf16.gmra.mxu2 %vm2031_vm0, %v6250_v60  ;;  %v6265_v35 = vpop.f32.mrf.mxu2  ;;  %v6271_v51 = vpop.f32.mrf.mxu0 }
 0x366   : > { %v4871_v14 = vpop.eup %4870 }
 0x367   : > { %v2218_v62 = vpop.f32.mrf.mxu3  ;;  %v2267_v17 = vmul.f32 %v4871_v14, %v6082_v9  ;;  %v6285_v40 = vpop.f32.mrf.mxu1 }
 0x368   : > { %4872 = vrcp.f32 %v2218_v62 }
 0x36c   : > { %2644 = vmatmul.bf16.gmra.mxu3 %v5959_v39  ;;  %v6281_v9 = vpop.f32.mrf.mxu2  ;;  %v6283_v0 = vpop.f32.mrf.mxu0 }
 0x36e   : > { %v4873_v23 = vpop.eup %4872 }
 0x36f   : > { %v2268_v27 = vmul.f32 %v4873_v23, %v6089_v16  ;;  %v2221_v36 = vpop.f32.mrf.mxu3 }
 0x370   : > { %4874 = vrcp.f32 %v2221_v36  ;;  %v4658_v36 = vld [vmem:[%s5483_s28 + $0x70] sm:$0xff] }
 0x371   : > { %v6269_v6 = vpack.c.bf16 %v2268_v27, %v2267_v17  ;;  %3347 = vmatpush.bf16.msrb.mxu1 %v4658_v36 }
 0x373   : > { %4342 = vmatmul.msk.bf16.gmra.mxu0 %vm2031_vm0, %v6269_v6  ;;  %4350 = vmatmul.msk.bf16.gmra.mxu1 %vm2031_vm0, %v6269_v6 }
 0x374   : > { %4358 = vmatmul.msk.bf16.gmra.mxu2 %vm2031_vm0, %v6269_v6  ;;  %v6292_v46 = vpop.f32.mrf.mxu2 }
 0x376   : > { %v4875_v16 = vpop.eup %4874 }
 0x377   : > { %v2224_v39 = vpop.f32.mrf.mxu3  ;;  %v2269_v34 = vmul.f32 %v4875_v16, %v6094_v53  ;;  %v6302_v53 = vpop.f32.mrf.mxu1 }
 0x378   : > { %4876 = vrcp.f32 %v2224_v39  ;;  %v4657_v39 = vld [vmem:[%s5483_s28 + $0x68] sm:$0xff] }
 0x379   : > { %3348 = vmatpush.bf16.msrb.mxu1 %v4657_v39 }
 0x37c   : > { %2649 = vmatmul.bf16.gmra.mxu3 %v5978_v31  ;;  %v6300_v31 = vpop.f32.mrf.mxu0  ;;  %v6305_v13 = vpop.f32.mrf.mxu2 }
 0x37e   : > { %v4877_v2 = vpop.eup %4876 }
 0x37f   : > { %v2270_v48 = vmul.f32 %v4877_v2, %v6101_v47  ;;  %v2227_v42 = vpop.f32.mrf.mxu3  ;;  %v6313_v17 = vpop.f32.mrf.mxu1 }
 0x380   : > { %4878 = vrcp.f32 %v2227_v42  ;;  %v4656_v42 = vld [vmem:[%s5483_s28 + $0x60] sm:$0xff] }
 0x381   : > { %v6290_v1 = vpack.c.bf16 %v2270_v48, %v2269_v34  ;;  %v4666_v34 = vld [vmem:[%s5483_s28 + $0xb0] sm:$0xff]  ;;  %v4648_v48 = vld [vmem:[%s5483_s28 + $0x20] sm:$0xff]  ;;  %3349 = vmatpush.bf16.msrb.mxu1 %v4656_v42  ;;  %v4645_v42 = vld [vmem:[%s5483_s28 + $0x8] sm:$0xff] }
 0x383   : > { %4343 = vmatmul.msk.bf16.gmra.mxu0 %vm2031_vm0, %v6290_v1  ;;  %4351 = vmatmul.msk.bf16.gmra.mxu1 %vm2031_vm0, %v6290_v1 }
 0x384   : > { %4359 = vmatmul.msk.bf16.gmra.mxu2 %vm2031_vm0, %v6290_v1  ;;  %v6311_v23 = vpop.f32.mrf.mxu0  ;;  %v6328_v16 = vpop.f32.mrf.mxu2 }
 0x386   : > { %v4879_v43 = vpop.eup %4878 }
 0x387   : > { %v2230_v47 = vpop.f32.mrf.mxu3  ;;  %v2271_v28 = vmul.f32 %v4879_v43, %v6106_v54  ;;  %v4667_v54 = vld [vmem:[%s5483_s28 + $0xb8] sm:$0xff]  ;;  %v6335_v43 = vpop.f32.mrf.mxu1 }
 0x388   : > { %4880 = vrcp.f32 %v2230_v47  ;;  %3395 = vmatpush.bf16.msrb.mxu2 %v4667_v54 }
 0x38c   : > { %2654 = vmatmul.bf16.gmra.mxu3 %v5997_v7  ;;  %v4650_v7 = vld [vmem:[%s5483_s28 + $0x30] sm:$0xff]  ;;  %3396 = vmatpush.bf16.msrb.mxu2 %v4666_v34  ;;  %v6333_v47 = vpop.f32.mrf.mxu0 }
 0x38d   : > { %3298 = vmatpush.bf16.msrb.mxu0 %v4650_v7  ;;  %v4654_v34 = vld [vmem:[%s5483_s28 + $0x50] sm:$0xff] }
 0x38e   : > { %v4881_v25 = vpop.eup %4880 }
 0x38f   : > { %v2272_v62 = vmul.f32 %v4881_v25, %v6113_v52  ;;  %v2233_v14 = vpop.f32.mrf.mxu3  ;;  %v4649_v52 = vld [vmem:[%s5483_s28 + $0x28] sm:$0xff]  ;;  %v4675_v25 = vld [vmem:[%s5483_s28 + $0xf8] sm:$0xff] }
 0x390   : > { %4882 = vrcp.f32 %v2233_v14  ;;  %3397 = vmatpush.bf16.msrb.mxu2 %v4665_v18  ;;  %3444 = vmatpush.bf16.msrb.mxu3 %v4675_v25  ;;  %v4653_v18 = vld [vmem:[%s5483_s28 + $0x48] sm:$0xff]  ;;  %v4662_v25 = vld [vmem:[%s5483_s28 + $0x90] sm:$0xff] }
 0x391   : > { %v6316_v27 = vpack.c.bf16 %v2272_v62, %v2271_v28  ;;  %3299 = vmatpush.bf16.msrb.mxu0 %v4649_v52  ;;  %v4647_v28 = vld [vmem:[%s5483_s28 + $0x18] sm:$0xff]  ;;  %v4664_v52 = vld [vmem:[%s5483_s28 + $0xa0] sm:$0xff] }
 0x392   : > { %v4655_v62 = vld [vmem:[%s5483_s28 + $0x58] sm:$0xff] }
 0x393   : > { %4344 = vmatmul.msk.bf16.gmra.mxu0 %vm2031_vm0, %v6316_v27  ;;  %4352 = vmatmul.msk.bf16.gmra.mxu1 %vm2031_vm0, %v6316_v27 }
 0x394   : > { %4360 = vmatmul.msk.bf16.gmra.mxu2 %vm2031_vm0, %v6316_v27  ;;  %3350 = vmatpush.bf16.msrb.mxu1 %v4655_v62  ;;  %v4652_v62 = vld [vmem:[%s5483_s28 + $0x40] sm:$0xff] }
 0x395   : > { %3300 = vmatpush.bf16.msrb.mxu0 %v4648_v48  ;;  %3398 = vmatpush.bf16.msrb.mxu2 %v4664_v52  ;;  %v4663_v48 = vld [vmem:[%s5483_s28 + $0x98] sm:$0xff]  ;;  %v4674_v52 = vld [vmem:[%s5483_s28 + $0xf0] sm:$0xff] }
 0x396   : > { %v4883_v20 = vpop.eup %4882  ;;  %3445 = vmatpush.bf16.msrb.mxu3 %v4674_v52 }
 0x397   : > { %v2236_v2 = vpop.f32.mrf.mxu3  ;;  %v2273_v7 = vmul.f32 %v4883_v20, %v6124_v29  ;;  %v6356_v29 = vpop.f32.mrf.mxu0 }
 0x398   : > { %4884 = vrcp.f32 %v2236_v2  ;;  %v4646_v2 = vld [vmem:[%s5483_s28 + $0x10] sm:$0xff]  ;;  %3351 = vmatpush.bf16.msrb.mxu1 %v4654_v34 }
 0x399   : > { %3301 = vmatpush.bf16.msrb.mxu0 %v4647_v28  ;;  %3399 = vmatpush.bf16.msrb.mxu2 %v4663_v48  ;;  %v4644_v28 = vld [vmem:[%s5483_s28] sm:$0xff] }
 0x39c   : > { %2659 = vmatmul.bf16.gmra.mxu3 %v6016_v11  ;;  %v6345_v11 = vpop.f32.mrf.mxu2  ;;  %3352 = vmatpush.bf16.msrb.mxu1 %v4653_v18 }
 0x39d   : > { %3302 = vmatpush.bf16.msrb.mxu0 %v4646_v2  ;;  %3400 = vmatpush.bf16.msrb.mxu2 %v4662_v25 }
 0x39e   : > { %v4885_v14 = vpop.eup %4884 }
 0x39f   : > { %v2274_v36 = vmul.f32 %v4885_v14, %v6135_v55  ;;  %v2239_v54 = vpop.f32.mrf.mxu3  ;;  %v6358_v55 = vpop.f32.mrf.mxu1 }
 0x3a0   : > { %4886 = vrcp.f32 %v2239_v54  ;;  %3353 = vmatpush.bf16.msrb.mxu1 %v4652_v62  ;;  %v6373_v2 = vpop.f32.mrf.mxu0  ;;  %v4673_v62 = vld [vmem:[%s5483_s28 + $0xe8] sm:$0xff] }
 0x3a1   : > { %v6347_v39 = vpack.c.bf16 %v2274_v36, %v2273_v7  ;;  %3303 = vmatpush.bf16.msrb.mxu0 %v4645_v42  ;;  %v4661_v7 = vld [vmem:[%s5483_s28 + $0x88] sm:$0xff]  ;;  %6676 = vst [vmem:[#allocation32_spill] sm:$0xff] %v6373_v2  ;;  %3446 = vmatpush.bf16.msrb.mxu3 %v4673_v62 }
 0x3a2   : > { %3401 = vmatpush.bf16.msrb.mxu2 %v4661_v7 }
 0x3a3   : > { %4345 = vmatmul.msk.bf16.gmra.mxu0 %vm2031_vm0, %v6347_v39  ;;  %4353 = vmatmul.msk.bf16.gmra.mxu1 %vm2031_vm0, %v6347_v39 }
 0x3a4   : > { %4361 = vmatmul.msk.bf16.gmra.mxu2 %vm2031_vm0, %v6347_v39  ;;  %v6367_v14 = vpop.f32.mrf.mxu2 }
 0x3a5   : > { %3304 = vmatpush.bf16.msrb.mxu0 %v4644_v28 }
 0x3a6   : > { %v4887_v36 = vpop.eup %4886 }
 0x3a7   : > { %v2242_v20 = vpop.f32.mrf.mxu3  ;;  %v6375_v34 = vpop.f32.mrf.mxu1  ;;  %v2275_v48 = vmul.f32 %v4887_v36, %v6152_v12 }
 0x3a8   : > { %4888 = vrcp.f32 %v2242_v20  ;;  %6677 = vst [vmem:[#allocation33_spill] sm:$0xff] %v6375_v34  ;;  %v4660_v20 = vld [vmem:[%s5483_s28 + $0x80] sm:$0xff] }
 0x3a9   : > { %3402 = vmatpush.bf16.msrb.mxu2 %v4660_v20 }
 0x3ac   : > { %4363 = vmatmul.msk.bf16.vlgmr.msra.gmra.mxu3 %vm2031_vm0, %v6204_v59  ;;  %v6390_v59 = vpop.f32.mrf.mxu2 }
 0x3ad   : > { %6678 = vst [vmem:[#allocation34_spill] sm:$0xff] %v6390_v59 }
 0x3ae   : > { %v4889_v54 = vpop.eup %4888 }
 0x3af   : > { %v2276_v42 = vmul.f32 %v4889_v54, %v6178_v41  ;;  %v6379_v18 = vpop.f32.mrf.mxu3  ;;  %v6394_v41 = vpop.f32.mrf.mxu0 }
 0x3b0   : > { %6679 = vst [vmem:[#allocation35_spill] sm:$0xff] %v6394_v41  ;;  %v6396_v28 = vpop.f32.mrf.mxu1 }
 0x3b1   : > { %v6382_v25 = vpack.c.bf16 %v2276_v42, %v2275_v48  ;;  %6680 = vst [vmem:[#allocation36_spill] sm:$0xff] %v6396_v28 }
 0x3b3   : > { %4346 = vmatmul.msk.bf16.gmra.mxu0 %vm2031_vm0, %v6382_v25  ;;  %4354 = vmatmul.msk.bf16.gmra.mxu1 %vm2031_vm0, %v6382_v25 }
 0x3b4   : > { %4362 = vmatmul.msk.bf16.gmra.mxu2 %vm2031_vm0, %v6382_v25  ;;  %v6401_v7 = vpop.f32.mrf.mxu2 }
 0x3b5   : > { %6681 = vst [vmem:[#allocation37_spill] sm:$0xff] %v6401_v7 }
 0x3b7   : > { %v6392_v12 = vpop.f32.mrf.mxu3 }
 0x3bc   : > { %4364 = vmatmul.msk.bf16.gmra.mxu3 %vm2031_vm0, %v6229_v10 }
 0x3bf   : > { %v6403_v36 = vpop.f32.mrf.mxu3 }
 0x3c0   : > { %6682 = vst [vmem:[#allocation38_spill] sm:$0xff] %v6403_v36  ;;  %v2754_v52 = vpop.f32.mrf.mxu0  ;;  %v2803_v54 = vpop.f32.mrf.mxu1  ;;  %v4672_v36 = vld [vmem:[%s5483_s28 + $0xe0] sm:$0xff] }
 0x3c1   : > { %v2941_v41 = vmul.f32 %v2754_v52, %v6174_v58  ;;  %v2942_v28 = vmul.f32 %v2803_v54, %v6176_v61  ;;  %3447 = vmatpush.bf16.msrb.mxu3 %v4672_v36 }
 0x3c7   : > { %v2852_v48 = vpop.f32.mrf.mxu2  ;;  %v6405_v42 = vpop.f32.mrf.mxu3 }
 0x3c8   : > { %6683 = vst [vmem:[#allocation39_spill] sm:$0xff] %v6405_v42  ;;  %v2756_v20 = vpop.f32.mrf.mxu0  ;;  %v2805_v59 = vpop.f32.mrf.mxu1  ;;  %v2943_v58 = vmul.f32 %v2852_v48, %v6182_v50  ;;  %v4671_v48 = vld [vmem:[%s5483_s28 + $0xd8] sm:$0xff] }
 0x3c9   : > { %v2945_v10 = vmul.f32 %v2756_v20, %v6184_v26  ;;  %v2946_v62 = vmul.f32 %v2805_v59, %v6186_v4  ;;  %3448 = vmatpush.bf16.msrb.mxu3 %v4671_v48 }
 0x3cb   : > { %v3005_v34 = vpack.c.bf16 %v2945_v10, %v2941_v41  ;;  %v3006_v2 = vpack.c.bf16 %v2946_v62, %v2942_v28 }
 0x3cc   : > { %4365 = vmatmul.msk.bf16.gmra.mxu3 %vm2031_vm0, %v6250_v60 }
 0x3cd   : > { %3305 = vmatmul.bf16.vlgmr.msrb.gmra.mxu0 %v3005_v34  ;;  %3354 = vmatmul.bf16.vlgmr.msrb.gmra.mxu1 %v3006_v2 }
 0x3cf   : > { %v2854_v42 = vpop.f32.mrf.mxu2  ;;  %v6414_v7 = vpop.f32.mrf.mxu3 }
 0x3d0   : > { %v2947_v61 = vmul.f32 %v2854_v42, %v6189_v5  ;;  %v2759_v26 = vpop.f32.mrf.mxu0  ;;  %v2808_v52 = vpop.f32.mrf.mxu1 }
 0x3d1   : > { %v2949_v2 = vmul.f32 %v2759_v26, %v6191_v32  ;;  %v2950_v34 = vmul.f32 %v2808_v52, %v6193_v30 }
 0x3d2   : > { %v3007_v4 = vpack.c.bf16 %v2947_v61, %v2943_v58 }
 0x3d4   : > { %3403 = vmatmul.bf16.vlgmr.msrb.gmra.mxu2 %v3007_v4 }
 0x3d7   : > { %v2857_v59 = vpop.f32.mrf.mxu2  ;;  %v6418_v41 = vpop.f32.mrf.mxu3 }
 0x3d8   : > { %v2761_v60 = vpop.f32.mrf.mxu0  ;;  %v2810_v28 = vpop.f32.mrf.mxu1  ;;  %v2951_v32 = vmul.f32 %v2857_v59, %v6196_v37 }
 0x3d9   : > { %v2953_v36 = vmul.f32 %v2761_v60, %v6200_v45  ;;  %v2954_v50 = vmul.f32 %v2810_v28, %v6202_v56  ;;  %v4670_v60 = vld [vmem:[%s5483_s28 + $0xd0] sm:$0xff] }
 0x3da   : > { %3449 = vmatpush.bf16.msrb.mxu3 %v4670_v60 }
 0x3db   : > { %v3009_v54 = vpack.c.bf16 %v2953_v36, %v2949_v2  ;;  %v3010_v5 = vpack.c.bf16 %v2954_v50, %v2950_v34 }
 0x3dc   : > { %4366 = vmatmul.msk.bf16.gmra.mxu3 %vm2031_vm0, %v6269_v6 }
 0x3dd   : > { %3310 = vmatmul.bf16.gmra.mxu0 %v3009_v54  ;;  %3359 = vmatmul.bf16.gmra.mxu1 %v3010_v5 }
 0x3df   : > { %v2859_v42 = vpop.f32.mrf.mxu2  ;;  %v6427_v20 = vpop.f32.mrf.mxu3 }
 0x3e0   : > { %v2955_v30 = vmul.f32 %v2859_v42, %v6212_v22  ;;  %v2764_v45 = vpop.f32.mrf.mxu0  ;;  %v2813_v10 = vpop.f32.mrf.mxu1 }
 0x3e1   : > { %v2957_v26 = vmul.f32 %v2764_v45, %v6214_v15  ;;  %v2958_v52 = vmul.f32 %v2813_v10, %v6216_v33 }
 0x3e2   : > { %v3011_v56 = vpack.c.bf16 %v2955_v30, %v2951_v32  ;;  %v4669_v30 = vld [vmem:[%s5483_s28 + $0xc8] sm:$0xff] }
 0x3e3   : > { %3450 = vmatpush.bf16.msrb.mxu3 %v4669_v30 }
 0x3e4   : > { %3408 = vmatmul.bf16.gmra.mxu2 %v3011_v56 }
 0x3e7   : > { %v2862_v62 = vpop.f32.mrf.mxu2  ;;  %v6431_v58 = vpop.f32.mrf.mxu3 }
 0x3e8   : > { %v2766_v6 = vpop.f32.mrf.mxu0  ;;  %v2815_v61 = vpop.f32.mrf.mxu1  ;;  %v2959_v15 = vmul.f32 %v2862_v62, %v6227_v63 }
 0x3e9   : > { %v2961_v4 = vmul.f32 %v2766_v6, %v6235_v38  ;;  %v2962_v37 = vmul.f32 %v2815_v61, %v6237_v3 }
 0x3eb   : > { %v3013_v59 = vpack.c.bf16 %v2961_v4, %v2957_v26  ;;  %v3014_v22 = vpack.c.bf16 %v2962_v37, %v2958_v52 }
 0x3ec   : > { %4367 = vmatmul.msk.bf16.gmra.mxu3 %vm2031_vm0, %v6290_v1 }
 0x3ed   : > { %3315 = vmatmul.bf16.gmra.mxu0 %v3013_v59  ;;  %3364 = vmatmul.bf16.gmra.mxu1 %v3014_v22 }
 0x3ef   : > { %v2864_v28 = vpop.f32.mrf.mxu2  ;;  %v6440_v2 = vpop.f32.mrf.mxu3 }
 0x3f0   : > { %v2963_v33 = vmul.f32 %v2864_v28, %v6241_v8  ;;  %v2769_v38 = vpop.f32.mrf.mxu0  ;;  %v2818_v34 = vpop.f32.mrf.mxu1 }
 0x3f1   : > { %v2965_v5 = vmul.f32 %v2769_v38, %v6244_v21  ;;  %v2966_v48 = vmul.f32 %v2818_v34, %v6246_v24 }
 0x3f2   : > { %v3015_v3 = vpack.c.bf16 %v2963_v33, %v2959_v15 }
 0x3f4   : > { %3413 = vmatmul.bf16.gmra.mxu2 %v3015_v3 }
 0x3f7   : > { %v2867_v36 = vpop.f32.mrf.mxu2  ;;  %v6444_v50 = vpop.f32.mrf.mxu3 }
 0x3f8   : > { %v2771_v1 = vpop.f32.mrf.mxu0  ;;  %v2820_v54 = vpop.f32.mrf.mxu1  ;;  %v2967_v21 = vmul.f32 %v2867_v36, %v6258_v57 }
 0x3f9   : > { %v2969_v42 = vmul.f32 %v2771_v1, %v6260_v44  ;;  %v2970_v63 = vmul.f32 %v2820_v54, %v6262_v49 }
 0x3fb   : > { %v3017_v32 = vpack.c.bf16 %v2969_v42, %v2965_v5  ;;  %v3018_v8 = vpack.c.bf16 %v2970_v63, %v2966_v48 }
 0x3fc   : > { %4368 = vmatmul.msk.bf16.gmra.mxu3 %vm2031_vm0, %v6316_v27 }
 0x3fd   : > { %3320 = vmatmul.bf16.gmra.mxu0 %v3017_v32  ;;  %3369 = vmatmul.bf16.gmra.mxu1 %v3018_v8 }
 0x3ff   : > { %v2869_v45 = vpop.f32.mrf.mxu2  ;;  %v6453_v10 = vpop.f32.mrf.mxu3 }
 0x400   : > { %v2971_v24 = vmul.f32 %v2869_v45, %v6265_v35  ;;  %v2774_v44 = vpop.f32.mrf.mxu0  ;;  %v2823_v56 = vpop.f32.mrf.mxu1  ;;  %v4668_v35 = vld [vmem:[%s5483_s28 + $0xc0] sm:$0xff]  ;;  %s654_s28 = sand.u32 1, %s5168_s18  }
 0x401   : > { %v2973_v26 = vmul.f32 %v2774_v44, %v6271_v51  ;;  %v2974_v52 = vmul.f32 %v2823_v56, %v6273_v19  ;;  %3451 = vmatpush.bf16.msrb.mxu3 %v4668_v35  ;;  %v6686_v35 = vld [vmem:[#allocation35_spill] sm:$0xff]  ;;  %s3770_s5 = sshll.u32 %s654_s28, 7  ;;  %s3510_s16 = scalar_lea.sflag [#allocation4], %s654_s28 }
 0x402   : > { %v3019_v49 = vpack.c.bf16 %v2971_v24, %v2967_v21  ;;  %s6521_s22 = scalar_lea.vmem [#allocation13], %s3770_s5 }
 0x404   : > { %3418 = vmatmul.bf16.gmra.mxu2 %v3019_v49 }
 0x407   : > { %v2872_v62 = vpop.f32.mrf.mxu2  ;;  %v6457_v6 = vpop.f32.mrf.mxu3 }
 0x408   : > { %v2776_v27 = vpop.f32.mrf.mxu0  ;;  %v2825_v61 = vpop.f32.mrf.mxu1  ;;  %v2975_v51 = vmul.f32 %v2872_v62, %v6281_v9 }
 0x409   : > { %v2977_v4 = vmul.f32 %v2776_v27, %v6283_v0  ;;  %v2978_v57 = vmul.f32 %v2825_v61, %v6285_v40 }
 0x40b   : > { %v3021_v37 = vpack.c.bf16 %v2977_v4, %v2973_v26  ;;  %v3022_v59 = vpack.c.bf16 %v2978_v57, %v2974_v52  ;;  %v6684_v4 = vld [vmem:[#allocation32_spill] sm:$0xff] }
 0x40c   : > { %4369 = vmatmul.msk.bf16.gmra.mxu3 %vm2031_vm0, %v6347_v39 }
 0x40d   : > { %3325 = vmatmul.bf16.gmra.mxu0 %v3021_v37  ;;  %3374 = vmatmul.bf16.gmra.mxu1 %v3022_v59  ;;  %v6685_v37 = vld [vmem:[#allocation33_spill] sm:$0xff] }
 0x40f   : > { %v2874_v22 = vpop.f32.mrf.mxu2  ;;  %v6466_v60 = vpop.f32.mrf.mxu3 }
 0x410   : > { %v2979_v19 = vmul.f32 %v2874_v22, %v6292_v46  ;;  %v2779_v28 = vpop.f32.mrf.mxu0  ;;  %v2828_v0 = vpop.f32.mrf.mxu1  ;;  %v6687_v22 = vld [vmem:[#allocation36_spill] sm:$0xff] }
 0x411   : > { %v2981_v39 = vmul.f32 %v2779_v28, %v6300_v31  ;;  %v2982_v3 = vmul.f32 %v2828_v0, %v6302_v53 }
 0x412   : > { %v3023_v15 = vpack.c.bf16 %v2979_v19, %v2975_v51 }
 0x414   : > { %3423 = vmatmul.bf16.gmra.mxu2 %v3023_v15  ;;  %v6688_v15 = vld [vmem:[#allocation34_spill] sm:$0xff] }
 0x417   : > { %v2877_v40 = vpop.f32.mrf.mxu2  ;;  %v6470_v33 = vpop.f32.mrf.mxu3 }
 0x418   : > { %v2781_v38 = vpop.f32.mrf.mxu0  ;;  %v2830_v34 = vpop.f32.mrf.mxu1  ;;  %v2983_v48 = vmul.f32 %v2877_v40, %v6305_v13  ;;  %v6689_v40 = vld [vmem:[#allocation37_spill] sm:$0xff] }
 0x419   : > { %v2985_v36 = vmul.f32 %v2781_v38, %v6311_v23  ;;  %v2986_v1 = vmul.f32 %v2830_v34, %v6313_v17 }
 0x41b   : > { %v3025_v9 = vpack.c.bf16 %v2985_v36, %v2981_v39  ;;  %v3026_v54 = vpack.c.bf16 %v2986_v1, %v2982_v3  ;;  %v6690_v3 = vld [vmem:[#allocation38_spill] sm:$0xff]  ;;  %v6691_v1 = vld [vmem:[#allocation39_spill] sm:$0xff] }
 0x41c   : > { %4370 = vmatmul.msk.bf16.gmra.mxu3 %vm2031_vm0, %v6382_v25 }
 0x41d   : > { %3330 = vmatmul.bf16.gmra.mxu0 %v3025_v9  ;;  %3379 = vmatmul.bf16.gmra.mxu1 %v3026_v54 }
 0x41f   : > { %v2879_v46 = vpop.f32.mrf.mxu2  ;;  %v6478_v5 = vpop.f32.mrf.mxu3 }
 0x420   : > { %v2987_v31 = vmul.f32 %v2879_v46, %v6328_v16  ;;  %v2784_v42 = vpop.f32.mrf.mxu0  ;;  %v2833_v53 = vpop.f32.mrf.mxu1 }
 0x421   : > { %v2989_v25 = vmul.f32 %v2784_v42, %v6333_v47  ;;  %v2990_v30 = vmul.f32 %v2833_v53, %v6335_v43 }
 0x422   : > { %v3027_v63 = vpack.c.bf16 %v2987_v31, %v2983_v48 }
 0x424   : > { %3428 = vmatmul.bf16.gmra.mxu2 %v3027_v63 }
 0x427   : > { %v2882_v23 = vpop.f32.mrf.mxu2  ;;  %v6482_v17 = vpop.f32.mrf.mxu3 }
 0x428   : > { %v2786_v32 = vpop.f32.mrf.mxu0  ;;  %v2835_v8 = vpop.f32.mrf.mxu1  ;;  %v2991_v56 = vmul.f32 %v2882_v23, %v6345_v11 }
 0x429   : > { %v2993_v45 = vmul.f32 %v2786_v32, %v6356_v29  ;;  %v2994_v21 = vmul.f32 %v2835_v8, %v6358_v55 }
 0x42b   : > { %v3029_v13 = vpack.c.bf16 %v2993_v45, %v2989_v25  ;;  %v3030_v24 = vpack.c.bf16 %v2994_v21, %v2990_v30 }
 0x42d   : > { %3335 = vmatmul.bf16.gmra.mxu0 %v3029_v13  ;;  %3384 = vmatmul.bf16.gmra.mxu1 %v3030_v24 }
 0x42f   : > { %v2884_v16 = vpop.f32.mrf.mxu2  ;;  %v2901_v44 = vpop.f32.mrf.mxu3 }
 0x430   : > { %v2995_v49 = vmul.f32 %v2884_v16, %v6367_v14  ;;  %v2789_v62 = vpop.f32.mrf.mxu0  ;;  %v2838_v27 = vpop.f32.mrf.mxu1  ;;  %v2944_v29 = vmul.f32 %v2901_v44, %v6379_v18 }
 0x431   : > { %v2997_v57 = vmul.f32 %v2789_v62, %v6684_v4  ;;  %v2998_v59 = vmul.f32 %v2838_v27, %v6685_v37 }
 0x432   : > { %v3031_v61 = vpack.c.bf16 %v2995_v49, %v2991_v56 }
 0x434   : > { %3433 = vmatmul.bf16.gmra.mxu2 %v3031_v61 }
 0x437   : > { %v2887_v47 = vpop.f32.mrf.mxu2  ;;  %v2903_v43 = vpop.f32.mrf.mxu3 }
 0x438   : > { %v2948_v55 = vmul.f32 %v2903_v43, %v6392_v12  ;;  %v2791_v26 = vpop.f32.mrf.mxu0  ;;  %v2840_v52 = vpop.f32.mrf.mxu1  ;;  %v2999_v12 = vmul.f32 %v2887_v47, %v6688_v15 }
 0x439   : > { %v3001_v11 = vmul.f32 %v2791_v26, %v6686_v35  ;;  %v3002_v14 = vmul.f32 %v2840_v52, %v6687_v22 }
 0x43a   : > { %v3008_v51 = vpack.c.bf16 %v2948_v55, %v2944_v29 }
 0x43b   : > { %v3033_v19 = vpack.c.bf16 %v3001_v11, %v2997_v57  ;;  %v3034_v28 = vpack.c.bf16 %v3002_v14, %v2998_v59  ;;  %v6514_v57 = vld [vmem:[%s570_s24] ss:$0 sm:$0xff]  ;;  %s3521_s24 = sadd.s32 %s4501_s17, %s5517_s1  ;;  %s3524_s1 = sshll.u32 %s6521_s22, 4  ;;  %s3525_s1 = int_to_ptr.vmem [resolvable:$true] %s3524_s1 }
 0x43c   : > { %3452 = vmatmul.bf16.vlgmr.msrb.gmra.mxu3 %v3008_v51  ;;  %s4502_s6 = sshll.u32 %s3521_s24, 3 }
 0x43d   : > { %3340 = vmatmul.bf16.gmra.mxu0 %v3033_v19  ;;  %3389 = vmatmul.bf16.gmra.mxu1 %v3034_v28  ;;  %s3523_s23 = scalar_lea.hbm %s6692_s19, %s4502_s6 }
 0x43e   : > { %s3526_s27 = sshll.u32 %s3523_s23, 4  ;;  %s3527_s27 = int_to_ptr.hbm [resolvable:$true] %s3526_s27 }
 0x43f   : > { %v2889_v0 = vpop.f32.mrf.mxu2  ;;  %v2906_v18 = vpop.f32.mrf.mxu3  ;;  %s5084_s11 = sshra.s32 %s3527_s27, 4  ;;  %s5085_s11 = int_to_ptr.hbm [resolvable:$true] %s5084_s11 }
 0x440   : > { %v3003_v38 = vmul.f32 %v2889_v0, %v6689_v40  ;;  %v2952_v36 = vmul.f32 %v2906_v18, %v6690_v3  ;;  %s5086_s8 = scalar_lea.hbm %s5085_s11, 128  ;;  %p5091_p0 = scmp.lt.s32.totalorder %s5085_s11, %s6693_s3 }
 0x441   : > { %p5087_p11 = scmp.ne.s32.totalorder %s5085_s11, %s5086_s8  ;;  %p5092_p1 = scmp.lt.s32.totalorder %s5090_s10, %s5086_s8 }
 0x442   : > { %v3035_v34 = vpack.c.bf16 %v3003_v38, %v2999_v12 }
 0x443   : > { %p5088_p12 = pnand %p5087_p11, %p5418_p3  ;;  %p5093_p2 = por %p5092_p1, %p5091_p0 }
 0x444   : > { %3438 = vmatmul.bf16.gmra.mxu2 %v3035_v34 }
 0x445   : > { %p5089_p13 = pneg %p5088_p12 }
 0x447   : > { %v2908_v39 = vpop.f32.mrf.mxu3  ;;  %p5094_p4 = pnand %p5093_p2, %p5089_p13 }
 0x448   : > { %v2956_v9 = vmul.f32 %v2908_v39, %v6691_v1 }
 0x44a   : > { %v3012_v54 = vpack.c.bf16 %v2956_v9, %v2952_v36 }
 0x44c   : > { %3457 = vmatmul.bf16.gmra.mxu3 %v3012_v54 }
 0x44f   : > { %v2911_v46 = vpop.f32.mrf.mxu3 }
 0x450   : > { %v2960_v31 = vmul.f32 %v2911_v46, %v6414_v7 }
 0x457   : > { %v2913_v48 = vpop.f32.mrf.mxu3  ;;  %v3404_v61 = vpop.f32.mrf.mxu2 }
 0x458   : > { %v2964_v42 = vmul.f32 %v2913_v48, %v6418_v41 }
 0x45a   : > { %v3016_v53 = vpack.c.bf16 %v2964_v42, %v2960_v31 }
 0x45c   : > { %3462 = vmatmul.bf16.gmra.mxu3 %v3016_v53 }
 0x45f   : > { %v2916_v63 = vpop.f32.mrf.mxu3  ;;  %v3406_v29 = vpop.f32.mrf.mxu2 }
 0x460   : > { %v2968_v32 = vmul.f32 %v2916_v63, %v6427_v20 }
 0x467   : > { %v2918_v23 = vpop.f32.mrf.mxu3  ;;  %v3409_v4 = vpop.f32.mrf.mxu2 }
 0x468   : > { %v2972_v8 = vmul.f32 %v2918_v23, %v6431_v58  ;;  %v3306_v58 = vpop.f32.mrf.mxu0 }
 0x469   : > { %v3307_v59 = vadd.f32 %v6514_v57, %v3306_v58 }
 0x46a   : > { %v3020_v25 = vpack.c.bf16 %v2972_v8, %v2968_v32 }
 0x46c   : > { %3467 = vmatmul.bf16.gmra.mxu3 %v3020_v25 }
 0x46f   : > { %v2921_v30 = vpop.f32.mrf.mxu3  ;;  %v3411_v11 = vpop.f32.mrf.mxu2 }
 0x470   : > { %v2976_v21 = vmul.f32 %v2921_v30, %v6440_v2  ;;  %v3308_v43 = vpop.f32.mrf.mxu0 }
 0x471   : > { %v3309_v51 = vadd.f32 %v6514_v57, %v3308_v43 }
 0x477   : > { %v2923_v45 = vpop.f32.mrf.mxu3  ;;  %v3414_v18 = vpop.f32.mrf.mxu2 }
 0x478   : > { %v2980_v13 = vmul.f32 %v2923_v45, %v6444_v50  ;;  %v3355_v50 = vpop.f32.mrf.mxu1 }
 0x479   : > { %v3356_v22 = vadd.f32 %v3355_v50, %v3307_v59 }
 0x47a   : > { %v3024_v24 = vpack.c.bf16 %v2980_v13, %v2976_v21 }
 0x47c   : > { %3472 = vmatmul.bf16.gmra.mxu3 %v3024_v24 }
 0x47f   : > { %v2926_v7 = vpop.f32.mrf.mxu3  ;;  %v3416_v1 = vpop.f32.mrf.mxu2 }
 0x480   : > { %v2984_v16 = vmul.f32 %v2926_v7, %v6453_v10  ;;  %v3357_v10 = vpop.f32.mrf.mxu1 }
 0x481   : > { %v3358_v28 = vadd.f32 %v3357_v10, %v3309_v51 }
 0x483   : > { %v3407_v15 = vadd.f32 %v3406_v29, %v3358_v28 }
 0x487   : > { %v2928_v41 = vpop.f32.mrf.mxu3  ;;  %v3419_v8 = vpop.f32.mrf.mxu2 }
 0x488   : > { %v2988_v44 = vmul.f32 %v2928_v41, %v6457_v6 }
 0x48a   : > { %v3028_v56 = vpack.c.bf16 %v2988_v44, %v2984_v16 }
 0x48c   : > { %3477 = vmatmul.bf16.gmra.mxu3 %v3028_v56 }
 0x48f   : > { %v2931_v20 = vpop.f32.mrf.mxu3  ;;  %v3421_v41 = vpop.f32.mrf.mxu2 }
 0x490   : > { %v2992_v62 = vmul.f32 %v2931_v20, %v6466_v60  ;;  %v3311_v60 = vpop.f32.mrf.mxu0 }
 0x491   : > { %v3312_v40 = vadd.f32 %v6514_v57, %v3311_v60 }
 0x497   : > { %v2933_v49 = vpop.f32.mrf.mxu3 }
 0x498   : > { %v2996_v27 = vmul.f32 %v2933_v49, %v6470_v33  ;;  %v3360_v33 = vpop.f32.mrf.mxu1  ;;  %v3313_v37 = vpop.f32.mrf.mxu0 }
 0x499   : > { %v3361_v39 = vadd.f32 %v3360_v33, %v3312_v40  ;;  %v3314_v54 = vadd.f32 %v6514_v57, %v3313_v37 }
 0x49a   : > { %v3032_v2 = vpack.c.bf16 %v2996_v27, %v2992_v62 }
 0x49b   : > { %v3410_v3 = vadd.f32 %v3409_v4, %v3361_v39 }
 0x49c   : > { %3482 = vmatmul.bf16.gmra.mxu3 %v3032_v2  ;;  %v3424_v2 = vpop.f32.mrf.mxu2 }
 0x49f   : > { %v2936_v47 = vpop.f32.mrf.mxu3 }
 0x4a0   : > { %v3000_v55 = vmul.f32 %v2936_v47, %v6478_v5  ;;  %v3362_v35 = vpop.f32.mrf.mxu1  ;;  %v3405_v5 = vadd.f32 %v3404_v61, %v3356_v22  ;;  %v3316_v14 = vpop.f32.mrf.mxu0 }
 0x4a1   : > { %v3363_v31 = vadd.f32 %v3362_v35, %v3314_v54  ;;  %v3317_v63 = vadd.f32 %v6514_v57, %v3316_v14 }
 0x4a3   : > { %v3412_v42 = vadd.f32 %v3411_v11, %v3363_v31 }
 0x4a7   : > { %v2938_v6 = vpop.f32.mrf.mxu3 }
 0x4a8   : > { %v3004_v26 = vmul.f32 %v2938_v6, %v6482_v17  ;;  %v3365_v0 = vpop.f32.mrf.mxu1  ;;  %v3318_v34 = vpop.f32.mrf.mxu0 }
 0x4a9   : > { %v3366_v25 = vadd.f32 %v3365_v0, %v3317_v63  ;;  %v3319_v13 = vadd.f32 %v6514_v57, %v3318_v34 }
 0x4aa   : > { %v3036_v52 = vpack.c.bf16 %v3004_v26, %v3000_v55  ;;  %v3426_v26 = vpop.f32.mrf.mxu2 }
 0x4ab   : > { %v3415_v45 = vadd.f32 %v3414_v18, %v3366_v25 }
 0x4ac   : > { %3487 = vmatmul.bf16.gmra.mxu3 %v3036_v52 }
 0x4b0   : > { %v3367_v36 = vpop.f32.mrf.mxu1  ;;  %v3321_v48 = vpop.f32.mrf.mxu0 }
 0x4b1   : > { %v3368_v16 = vadd.f32 %v3367_v36, %v3319_v13  ;;  %v3322_v58 = vadd.f32 %v6514_v57, %v3321_v48 }
 0x4b2   : > { %v3429_v14 = vpop.f32.mrf.mxu2 }
 0x4b3   : > { %v3417_v44 = vadd.f32 %v3416_v1, %v3368_v16 }
 0x4b8   : > { %v3370_v23 = vpop.f32.mrf.mxu1  ;;  %v3323_v30 = vpop.f32.mrf.mxu0 }
 0x4b9   : > { %v3371_v62 = vadd.f32 %v3370_v23, %v3322_v58  ;;  %v3324_v47 = vadd.f32 %v6514_v57, %v3323_v30 }
 0x4bb   : > { %v3420_v50 = vadd.f32 %v3419_v8, %v3371_v62 }
 0x4bf   : > { %v3453_v17 = vpop.f32.mrf.mxu3 }
 0x4c0   : > { %v3454_v19 = vadd.f32 %v3453_v17, %v3405_v5  ;;  %v3372_v7 = vpop.f32.mrf.mxu1  ;;  %v3326_v56 = vpop.f32.mrf.mxu0 }
 0x4c1   : > { %v3373_v29 = vadd.f32 %v3372_v7, %v3324_v47  ;;  %v3327_v60 = vadd.f32 %v6514_v57, %v3326_v56 }
 0x4c2   : > { %3493 = vst [vmem:[%s6521_s22] sm:$0xff] %v3454_v19 }
 0x4c3   : > { %v3422_v6 = vadd.f32 %v3421_v41, %v3373_v29 }
 0x4c7   : > { %v3455_v12 = vpop.f32.mrf.mxu3 }
 0x4c8   : > { %v3456_v38 = vadd.f32 %v3455_v12, %v3407_v15  ;;  %v3375_v27 = vpop.f32.mrf.mxu1  ;;  %v3328_v10 = vpop.f32.mrf.mxu0 }
 0x4c9   : > { %v3376_v37 = vadd.f32 %v3375_v27, %v3327_v60  ;;  %v3329_v11 = vadd.f32 %v6514_v57, %v3328_v10  ;;  %v3431_v12 = vpop.f32.mrf.mxu2 }
 0x4ca   : > { %3494 = vst [vmem:[%s6521_s22 + $0x8] sm:$0xff] %v3456_v38 }
 0x4cb   : > { %v3425_v59 = vadd.f32 %v3424_v2, %v3376_v37 }
 0x4cf   : > { %v3458_v9 = vpop.f32.mrf.mxu3 }
 0x4d0   : > { %v3459_v46 = vadd.f32 %v3458_v9, %v3410_v3  ;;  %v3377_v55 = vpop.f32.mrf.mxu1  ;;  %v3331_v4 = vpop.f32.mrf.mxu0 }
 0x4d1   : > { %v3378_v17 = vadd.f32 %v3377_v55, %v3329_v11  ;;  %v3332_v0 = vadd.f32 %v6514_v57, %v3331_v4  ;;  %v3434_v54 = vpop.f32.mrf.mxu2 }
 0x4d2   : > { %3495 = vst [vmem:[%s6521_s22 + $0x10] sm:$0xff] %v3459_v46 }
 0x4d3   : > { %v3427_v19 = vadd.f32 %v3426_v26, %v3378_v17 }
 0x4d7   : > { %v3460_v53 = vpop.f32.mrf.mxu3 }
 0x4d8   : > { %v3461_v32 = vadd.f32 %v3460_v53, %v3412_v42  ;;  %v3380_v22 = vpop.f32.mrf.mxu1  ;;  %v3333_v51 = vpop.f32.mrf.mxu0 }
 0x4d9   : > { %v3381_v40 = vadd.f32 %v3380_v22, %v3332_v0  ;;  %v3334_v3 = vadd.f32 %v6514_v57, %v3333_v51  ;;  %v3436_v8 = vpop.f32.mrf.mxu2 }
 0x4da   : > { %3496 = vst [vmem:[%s6521_s22 + $0x18] sm:$0xff] %v3461_v32 }
 0x4db   : > { %v3430_v38 = vadd.f32 %v3429_v14, %v3381_v40 }
 0x4df   : > { %v3463_v21 = vpop.f32.mrf.mxu3 }
 0x4e0   : > { %v3464_v24 = vadd.f32 %v3463_v21, %v3415_v45  ;;  %v3382_v15 = vpop.f32.mrf.mxu1  ;;  %v3336_v34 = vpop.f32.mrf.mxu0 }
 0x4e1   : > { %v3383_v1 = vadd.f32 %v3382_v15, %v3334_v3  ;;  %v3337_v31 = vadd.f32 %v6514_v57, %v3336_v34  ;;  %v3439_v56 = vpop.f32.mrf.mxu2 }
 0x4e2   : > { %3497 = vst [vmem:[%s6521_s22 + $0x20] sm:$0xff] %v3464_v24 }
 0x4e3   : > { %v3432_v46 = vadd.f32 %v3431_v12, %v3383_v1 }
 0x4e7   : > { %v3465_v20 = vpop.f32.mrf.mxu3 }
 0x4e8   : > { %v3466_v49 = vadd.f32 %v3465_v20, %v3417_v44  ;;  %v3385_v9 = vpop.f32.mrf.mxu1  ;;  %v3338_v53 = vpop.f32.mrf.mxu0 }
 0x4e9   : > { %v3386_v63 = vadd.f32 %v3385_v9, %v3337_v31  ;;  %v3339_v30 = vadd.f32 %v6514_v57, %v3338_v53 }
 0x4ea   : > { %3498 = vst [vmem:[%s6521_s22 + $0x28] sm:$0xff] %v3466_v49 }
 0x4eb   : > { %v3435_v32 = vadd.f32 %v3434_v54, %v3386_v63 }
 0x4ef   : > { %v3468_v61 = vpop.f32.mrf.mxu3 }
 0x4f0   : > { %v3469_v43 = vadd.f32 %v3468_v61, %v3420_v50  ;;  %v3387_v23 = vpop.f32.mrf.mxu1  ;;  %v3341_v21 = vpop.f32.mrf.mxu0 }
 0x4f1   : > { %v3388_v13 = vadd.f32 %v3387_v23, %v3339_v30  ;;  %v3342_v41 = vadd.f32 %v6514_v57, %v3341_v21  ;;  %v3441_v61 = vpop.f32.mrf.mxu2 }
 0x4f2   : > { %3499 = vst [vmem:[%s6521_s22 + $0x30] sm:$0xff] %v3469_v43 }
 0x4f3   : > { %v3437_v24 = vadd.f32 %v3436_v8, %v3388_v13 }
 0x4f7   : > { %v3470_v52 = vpop.f32.mrf.mxu3 }
 0x4f8   : > { %v3471_v33 = vadd.f32 %v3470_v52, %v3422_v6  ;;  %v3390_v44 = vpop.f32.mrf.mxu1  ;;  %v3343_v58 = vpop.f32.mrf.mxu0 }
 0x4f9   : > { %v3391_v20 = vadd.f32 %v3390_v44, %v3342_v41  ;;  %v3344_v27 = vadd.f32 %v6514_v57, %v3343_v58 }
 0x4fa   : > { %3500 = vst [vmem:[%s6521_s22 + $0x38] sm:$0xff] %v3471_v33 }
 0x4fb   : > { %v3440_v49 = vadd.f32 %v3439_v56, %v3391_v20 }
 0x4ff   : > { %v3473_v35 = vpop.f32.mrf.mxu3 }
 0x500   : > { %v3474_v5 = vadd.f32 %v3473_v35, %v3425_v59  ;;  %v3392_v50 = vpop.f32.mrf.mxu1 }
 0x501   : > { %v3393_v47 = vadd.f32 %v3392_v50, %v3344_v27 }
 0x502   : > { %3501 = vst [vmem:[%s6521_s22 + $0x40] sm:$0xff] %v3474_v5 }
 0x503   : > { %v3442_v43 = vadd.f32 %v3441_v61, %v3393_v47 }
 0x507   : > { %v3475_v28 = vpop.f32.mrf.mxu3 }
 0x508   : > { %v3476_v18 = vadd.f32 %v3475_v28, %v3427_v19 }
 0x50a   : > { %3502 = vst [vmem:[%s6521_s22 + $0x48] sm:$0xff] %v3476_v18 }
 0x50f   : > { %v3478_v39 = vpop.f32.mrf.mxu3 }
 0x510   : > { %v3479_v36 = vadd.f32 %v3478_v39, %v3430_v38 }
 0x512   : > { %3503 = vst [vmem:[%s6521_s22 + $0x50] sm:$0xff] %v3479_v36 }
 0x517   : > { %v3480_v48 = vpop.f32.mrf.mxu3 }
 0x518   : > { %v3481_v42 = vadd.f32 %v3480_v48, %v3432_v46 }
 0x51a   : > { %3504 = vst [vmem:[%s6521_s22 + $0x58] sm:$0xff] %v3481_v42 }
 0x51f   : > { %v3483_v25 = vpop.f32.mrf.mxu3 }
 0x520   : > { %v3484_v45 = vadd.f32 %v3483_v25, %v3435_v32 }
 0x522   : > { %3505 = vst [vmem:[%s6521_s22 + $0x60] sm:$0xff] %v3484_v45 }
 0x527   : > { %v3485_v7 = vpop.f32.mrf.mxu3 }
 0x528   : > { %v3486_v16 = vadd.f32 %v3485_v7, %v3437_v24 }
 0x52a   : > { %3506 = vst [vmem:[%s6521_s22 + $0x68] sm:$0xff] %v3486_v16 }
 0x52f   : > { %v3488_v62 = vpop.f32.mrf.mxu3 }
 0x530   : > { %v3489_v2 = vadd.f32 %v3488_v62, %v3440_v49 }
 0x532   : > { %3507 = vst [vmem:[%s6521_s22 + $0x70] sm:$0xff] %v3489_v2 }
 0x537   : > { %v3490_v10 = vpop.f32.mrf.mxu3 }
 0x538   : > { %v3491_v29 = vadd.f32 %v3490_v10, %v3442_v43 }
 0x53a   : > { %3508 = vst [vmem:[%s6521_s22 + $0x78] sm:$0xff] %v3491_v29 }
 0x53b   : > { %5097 = shalt.err (!%p5094_p4)
}
 0x53c   : > { %s5215_s30 = smov 128   ;;  %s5216_s4 = smov 8  }
 0x53d   : > { %4696 = dma.vmem_to_hbm [thread:$0]  (%p5418_p3), %s3525_s1, 2048, %s3527_s27, %s3510_s16, %s5215_s30, %s5215_s30, %s5216_s4  }
 0x53e PF: > { %s6695_s28 = sld [smem:[#allocation25_spill]] }
 0x53f   : > { %s6696_s5 = sld [smem:[#allocation19_spill]] }
 0x544   : > { %p4725_p7 = scmp.ge.s32.totalorder %s6695_s28, 2 }
 0x545   : > { %s3541_s17 = sand.u32 1, %s6696_s5  }
 0x546   : > { %p4719_p8 = pnand %p4725_p7, %p5423_p5  ;;  %s3542_s24 = scalar_lea.sflag [#allocation4], %s3541_s17 }
 0x548   : > { %p4720_p9 = pneg %p4719_p8 }
 0x54a   : > { %5159 = dma.done.wait (%p4720_p9), %s3542_s24, 2048  }
 0x54b   : > { %5161 = vsyncadd (%p4720_p9), %s3542_s24, 4294965248  ;;  %s34_s27 = sadd.s32 1, %s6695_s28   ;;  %s6698_s6 = sld [smem:[#allocation20_spill]] }
 0x54c   : > { %p31_p6 = scmp.ge.s32.totalorder %s34_s27, 6   ;;  %s6699_s19 = sld [smem:[#allocation29_spill]] }
 0x54d   : > { %s6700_s0 = sld [smem:[#allocation21_spill]]  ;;  %s6705_s17 = smov %s5168_s18 }
 0x54e   : > { %s6701_s22 = sld [smem:[#allocation28_spill]]  ;;  %s6707_s20 = smov %s5180_s21 }
 0x54f   : > { %s6702_s23 = sld [smem:[#allocation24_spill]]  ;;  %s6709_s24 = smov %s5200_s26 }
 0x550   : > { %s6703_s25 = sld [smem:[#allocation26_spill]] }
 0x551   : > { %s6704_s9 = sld [smem:[#allocation27_spill]]  ;;  %s6706_s18 = smov %s6698_s6 }
 0x553   : > { %s6708_s21 = smov %s6700_s0  ;;  %33 = sbr.rel (!%p31_p6) target bundleno = 25 (0x19), region = 170 }
 0x557   : > { %s6710_s26 = smov %s6704_s9 }
 0x558   :  { %3548 = vsyncpa [#allocation3], 1 }
 0x559   :  { %3550 = vsyncpa [#allocation3 + $0x1], 1 }
 0x55a   :  { %3551 = vsyncpa [#allocation6], 1 }
 0x55b   :  { %3553 = vsyncpa [#allocation6 + $0x1], 1 }
 0x55c   :  { %3554 = vsyncpa [#allocation9], 1 }
 0x55d   :  { %3556 = vsyncpa [#allocation9 + $0x1], 1 }
 0x55e   :  { %3557 = vsyncpa [#allocation12], 1 }
 0x55f   :  { %3558 = vsyncpa [#allocation4], 1 }
 0x560   :  { %3560 = vsyncpa [#allocation4 + $0x1], 1 }

</bundles_post_ra>
